<compile_context>
chip_gen: v6e
topology: v6e:2x2x1
jax: 0.10.0
libtpu: 0.0.40
codegen_flags: <defaults>
</compile_context>

<pallas_src>
import functools

import jax
import jax.numpy as jnp
from jax.experimental import pallas as pl
from jax.experimental.pallas import tpu as pltpu


_VMEM_LIMIT = 64 * 1024 * 1024   # <= v7x physical VMEM; > v5e/v6e defaults
_NEG_SLOPE = 0.1


def _lrelu(x):
    return jnp.where(x > 0, x, _NEG_SLOPE * x)


def _bn_fold(gamma, beta, mean, var, eps=1e-5):
    scale = gamma / jnp.sqrt(var + eps)
    bias = beta - mean * scale
    return scale, bias


# ----------------------------------------------------------------------------
# Kernel 1: fused bottleneck path (stride 1, inp == oup)
#   y1  = LeakyReLU_0.1( x  @ (W1*s1) + b1 )            (1x1 conv + BN)
#   out = LeakyReLU_0.1( conv3x3(y1, W2*s2) + b2 )       (3x3 conv + BN)
# x arrives halo-padded and row-flattened: (ph*pw, cin) with ph=H+3, pw=W+2.
# ----------------------------------------------------------------------------
def _fused_bottleneck_kernel(xf_ref, mask_ref, w1_ref, b1_ref, w2_ref, b2_ref,
                             o_ref, y1s_ref, *, h, w):
    pw = w + 2

    # 1x1 conv (BN scale folded into w1) + bias + LeakyReLU over the whole
    # padded plane; the halo rows/cols are then zeroed via the 0/1 mask so the
    # 3x3 stage sees exact zero padding.
    y1 = jnp.dot(xf_ref[...], w1_ref[...], preferred_element_type=jnp.float32)
    y1 = _lrelu(y1 + b1_ref[...])
    y1s_ref[...] = (y1 * mask_ref[...]).astype(y1s_ref.dtype)

    # 3x3 conv (stride 1, pad 1) as implicit GEMM: 9 sublane-shifted 2D slices
    # of the VMEM-resident intermediate, one matmul each.  The two junk
    # columns per output row are computed and discarded by the wrapper.
    oup = w2_ref.shape[2]
    acc = jnp.zeros((h * pw, oup), jnp.float32)
    for ky in range(3):
        for kx in range(3):
            off = ky * pw + kx
            tap = y1s_ref[off:off + h * pw, :]
            acc = acc + jnp.dot(tap, w2_ref[ky * 3 + kx],
                                preferred_element_type=jnp.float32)
    o_ref[...] = _lrelu(acc + b2_ref[...]).astype(o_ref.dtype)


# ----------------------------------------------------------------------------
# Kernel 2: single 3x3 conv (any stride) + BN (folded) + LeakyReLU.
# Input arrives phase-split on the stride and row-flattened per phase:
# (s*s, ph*pw, cin); every tap is a contiguous sublane-offset slice.
# ----------------------------------------------------------------------------
def _conv3x3_bn_lrelu_kernel(xph_ref, w_ref, b_ref, o_ref, *, stride, ho, pw):
    oup = w_ref.shape[2]
    acc = jnp.zeros((ho * pw, oup), jnp.float32)
    for ky in range(3):
        for kx in range(3):
            phase = (ky % stride) * stride + (kx % stride)
            off = (ky // stride) * pw + (kx // stride)
            tap = xph_ref[phase, off:off + ho * pw, :]
            acc = acc + jnp.dot(tap, w_ref[ky * 3 + kx],
                                preferred_element_type=jnp.float32)
    o_ref[...] = _lrelu(acc + b_ref[...]).astype(o_ref.dtype)


# ----------------------------------------------------------------------------
# Wrappers
# ----------------------------------------------------------------------------
def _fused_bottleneck(x_nhwc, w1, s1, b1, w2, s2, b2):
    """x_nhwc: (N,H,W,Cin) bf16. w1:(depth,Cin,1,1), w2:(oup,depth,3,3)."""
    n, h, w, cin = x_nhwc.shape
    depth = w1.shape[0]
    oup = w2.shape[0]
    ph, pw = h + 3, w + 2            # +1 halo all around, +1 extra bottom row
    mp = ph * pw                     # so every tap slice stays in-bounds

    xp = jnp.pad(x_nhwc, ((0, 0), (1, 2), (1, 1), (0, 0)))
    xf = xp.reshape(n, mp, cin)

    mask = jnp.zeros((ph, pw), jnp.float32).at[1:h + 1, 1:w + 1].set(1.0)
    mask = mask.reshape(mp, 1)

    # Fold BN scale into the weights; bf16 matmul operands, f32 bias.
    w1m = (w1.reshape(depth, cin).T * s1[None, :]).astype(jnp.bfloat16)
    w2m = (jnp.transpose(w2, (2, 3, 1, 0)).reshape(9, depth, oup)
           * s2[None, None, :]).astype(jnp.bfloat16)
    b1m = b1.reshape(1, depth).astype(jnp.float32)
    b2m = b2.reshape(1, oup).astype(jnp.float32)

    out_flat = pl.pallas_call(
        functools.partial(_fused_bottleneck_kernel, h=h, w=w),
        out_shape=jax.ShapeDtypeStruct((n, h * pw, oup), jnp.float32),
        grid_spec=pltpu.PrefetchScalarGridSpec(
            num_scalar_prefetch=0,
            grid=(n,),
            in_specs=[
                pl.BlockSpec((None, mp, cin), lambda i: (i, 0, 0)),
                pl.BlockSpec((mp, 1), lambda i: (0, 0)),
                pl.BlockSpec((cin, depth), lambda i: (0, 0)),
                pl.BlockSpec((1, depth), lambda i: (0, 0)),
                pl.BlockSpec((9, depth, oup), lambda i: (0, 0, 0)),
                pl.BlockSpec((1, oup), lambda i: (0, 0)),
            ],
            out_specs=pl.BlockSpec((None, h * pw, oup), lambda i: (i, 0, 0)),
            scratch_shapes=[pltpu.VMEM((mp, depth), jnp.bfloat16)],
        ),
        compiler_params=pltpu.CompilerParams(
            dimension_semantics=("parallel",),
            vmem_limit_bytes=_VMEM_LIMIT),
    )(xf, mask, w1m, b1m, w2m, b2m)

    return out_flat.reshape(n, h, pw, oup)[:, :, :w, :]


def _conv3x3_bn_lrelu(x_nhwc, w, scale, bias, stride):
    """Single 3x3 conv (pad 1, given stride) + folded BN + LeakyReLU."""
    n, h, w_sp, cin = x_nhwc.shape
    oup = w.shape[0]
    k, pad, s = 3, 1, stride
    ho = (h + 2 * pad - k) // s + 1
    wo = (w_sp + 2 * pad - k) // s + 1
    omax = (k - 1) // s                 # max per-phase tap offset
    ph = ho + omax + 1                  # +1 row so tap slices stay in-bounds
    pw = wo + omax

    extra_h = max(0, s * ph - (h + 2 * pad))
    extra_w = max(0, s * pw - (w_sp + 2 * pad))
    xp = jnp.pad(x_nhwc, ((0, 0), (pad, pad + extra_h),
                          (pad, pad + extra_w), (0, 0)))
    xp = xp[:, :s * ph, :s * pw, :]
    # Phase-split on the stride (identity for stride==1), flatten rows/phase.
    xph = (xp.reshape(n, ph, s, pw, s, cin)
             .transpose(0, 2, 4, 1, 3, 5)
             .reshape(n, s * s, ph * pw, cin))

    wm = (jnp.transpose(w, (2, 3, 1, 0)).reshape(9, cin, oup)
          * scale[None, None, :]).astype(jnp.bfloat16)
    bm = bias.reshape(1, oup).astype(jnp.float32)

    out_flat = pl.pallas_call(
        functools.partial(_conv3x3_bn_lrelu_kernel, stride=s, ho=ho, pw=pw),
        out_shape=jax.ShapeDtypeStruct((n, ho * pw, oup), jnp.float32),
        grid_spec=pltpu.PrefetchScalarGridSpec(
            num_scalar_prefetch=0,
            grid=(n,),
            in_specs=[
                pl.BlockSpec((None, s * s, ph * pw, cin),
                             lambda i: (i, 0, 0, 0)),
                pl.BlockSpec((9, cin, oup), lambda i: (0, 0, 0)),
                pl.BlockSpec((1, oup), lambda i: (0, 0)),
            ],
            out_specs=pl.BlockSpec((None, ho * pw, oup), lambda i: (i, 0, 0)),
        ),
        compiler_params=pltpu.CompilerParams(
            dimension_semantics=("parallel",),
            vmem_limit_bytes=_VMEM_LIMIT),
    )(xph, wm, bm)

    return out_flat.reshape(n, ho, pw, oup)[:, :, :wo, :]


def conv_block_forward(x_nchw, params, *, inp, oup, stride, expand_ratio=0.5):
    """Matches _conv_block(inp, oup, stride, expand_ratio).forward (eval)."""
    x = jnp.transpose(x_nchw, (0, 2, 3, 1)).astype(jnp.bfloat16)   # NHWC bf16

    if stride == 1 and inp == oup:
        s1, b1 = _bn_fold(params["g1"], params["b1"], params["m1"], params["v1"])
        s2, b2 = _bn_fold(params["g2"], params["b2"], params["m2"], params["v2"])
        out = _fused_bottleneck(x, params["w1"], s1, b1, params["w2"], s2, b2)
    else:
        s1, b1 = _bn_fold(params["g1"], params["b1"], params["m1"], params["v1"])
        out = _conv3x3_bn_lrelu(x, params["w1"], s1, b1, stride)

    return jnp.transpose(out, (0, 3, 1, 2))                        # NCHW


# ----------------------------------------------------------------------------
# Pure-JAX f32 reference (lax conv) for correctness check
# ----------------------------------------------------------------------------
def _ref_conv(x, w, stride, pad):
    return jax.lax.conv_general_dilated(
        x, w, window_strides=(stride, stride),
        padding=((pad, pad), (pad, pad)),
        dimension_numbers=("NCHW", "OIHW", "NCHW"))


def _ref_bn_lrelu(x, g, b, m, v, eps=1e-5):
    y = (x - m[None, :, None, None]) / jnp.sqrt(v[None, :, None, None] + eps)
    y = y * g[None, :, None, None] + b[None, :, None, None]
    return jnp.where(y > 0, y, 0.1 * y)


def _ref_forward(x, p, *, inp, oup, stride):
    if stride == 1 and inp == oup:
        y = _ref_conv(x, p["w1"], 1, 0)
        y = _ref_bn_lrelu(y, p["g1"], p["b1"], p["m1"], p["v1"])
        y = _ref_conv(y, p["w2"], stride, 1)
        return _ref_bn_lrelu(y, p["g2"], p["b2"], p["m2"], p["v2"])
    y = _ref_conv(x, p["w1"], stride, 1)
    return _ref_bn_lrelu(y, p["g1"], p["b1"], p["m1"], p["v1"])


def _make_single_conv_params(key, inp, oup):
    ks = jax.random.split(key, 6)
    return {
        "w1": 0.2 * jax.random.normal(ks[1], (oup, inp, 3, 3), jnp.float32),
        "g1": 1.0 + 0.1 * jax.random.normal(ks[2], (oup,), jnp.float32),
        "b1": 0.1 * jax.random.normal(ks[3], (oup,), jnp.float32),
        "m1": 0.1 * jax.random.normal(ks[4], (oup,), jnp.float32),
        "v1": jax.random.uniform(ks[5], (oup,), jnp.float32, 0.5, 1.5),
    }


# ----------------------------------------------------------------------------
if __name__ == "__main__":
    N, H, W = 2, 16, 16

    # ---- Case 1: bottleneck path (stride == 1 and inp == oup) ----
    inp = oup = 8
    depth = int(oup * 0.5)
    ks = jax.random.split(jax.random.PRNGKey(0), 12)
    x = jax.random.normal(ks[0], (N, inp, H, W), jnp.float32)
    params = {
        "w1": 0.2 * jax.random.normal(ks[1], (depth, inp, 1, 1), jnp.float32),
        "g1": 1.0 + 0.1 * jax.random.normal(ks[2], (depth,), jnp.float32),
        "b1": 0.1 * jax.random.normal(ks[3], (depth,), jnp.float32),
        "m1": 0.1 * jax.random.normal(ks[4], (depth,), jnp.float32),
        "v1": jax.random.uniform(ks[5], (depth,), jnp.float32, 0.5, 1.5),
        "w2": 0.2 * jax.random.normal(ks[6], (oup, depth, 3, 3), jnp.float32),
        "g2": 1.0 + 0.1 * jax.random.normal(ks[7], (oup,), jnp.float32),
        "b2": 0.1 * jax.random.normal(ks[8], (oup,), jnp.float32),
        "m2": 0.1 * jax.random.normal(ks[9], (oup,), jnp.float32),
        "v2": jax.random.uniform(ks[10], (oup,), jnp.float32, 0.5, 1.5),
    }
    out = jax.block_until_ready(
        conv_block_forward(x, params, inp=inp, oup=oup, stride=1))
    ref = jax.block_until_ready(
        _ref_forward(x, params, inp=inp, oup=oup, stride=1))
    assert out.shape == (N, oup, H, W), out.shape
    # bf16 matmul operands (f32 accumulate) vs. f32 reference -> looser tol.
    assert jnp.allclose(out, ref, atol=5e-2, rtol=5e-2), \
        float(jnp.max(jnp.abs(out - ref)))

    # ---- Case 2: downsample path (single 3x3 conv, stride 2) ----
    inp2, oup2, stride2 = 8, 16, 2
    x2 = jax.random.normal(jax.random.PRNGKey(1), (N, inp2, H, W), jnp.float32)
    params2 = _make_single_conv_params(jax.random.PRNGKey(2), inp2, oup2)
    out2 = jax.block_until_ready(
        conv_block_forward(x2, params2, inp=inp2, oup=oup2, stride=stride2))
    ref2 = jax.block_until_ready(
        _ref_forward(x2, params2, inp=inp2, oup=oup2, stride=stride2))
    assert out2.shape == (N, oup2, H // 2, W // 2), out2.shape
    assert jnp.allclose(out2, ref2, atol=5e-2, rtol=5e-2), \
        float(jnp.max(jnp.abs(out2 - ref2)))

    # ---- Case 3: stride 1 but inp != oup (single 3x3 conv branch) ----
    inp3, oup3, stride3 = 8, 16, 1
    x3 = jax.random.normal(jax.random.PRNGKey(3), (N, inp3, H, W), jnp.float32)
    params3 = _make_single_conv_params(jax.random.PRNGKey(4), inp3, oup3)
    out3 = jax.block_until_ready(
        conv_block_forward(x3, params3, inp=inp3, oup=oup3, stride=stride3))
    ref3 = jax.block_until_ready(
        _ref_forward(x3, params3, inp=inp3, oup=oup3, stride=stride3))
    assert out3.shape == (N, oup3, H, W), out3.shape
    assert jnp.allclose(out3, ref3, atol=5e-2, rtol=5e-2), \
        float(jnp.max(jnp.abs(out3 - ref3)))

    print("KERNEL_OK")
</pallas_src>

<mosaic_0001>
module attributes {stable_mosaic.version = 11 : i64} {
  func.func @_fused_bottleneck_kernel(%arg0: i32, %arg1: memref<1x342x8xbf16, #tpu.memory_space<vmem>>, %arg2: memref<342x1xf32, #tpu.memory_space<vmem>>, %arg3: memref<8x4xbf16, #tpu.memory_space<vmem>>, %arg4: memref<1x4xf32, #tpu.memory_space<vmem>>, %arg5: memref<9x4x8xbf16, #tpu.memory_space<vmem>>, %arg6: memref<1x8xf32, #tpu.memory_space<vmem>>, %arg7: memref<1x288x8xf32, #tpu.memory_space<vmem>>, %arg8: memref<342x4xbf16, #tpu.memory_space<vmem>>) attributes {dimension_semantics = [#tpu.dimension_semantics<parallel>], iteration_bounds = array<i64: 2>, scalar_prefetch = 0 : i64, scratch_operands = 1 : i64, tpu.core_type = #tpu.core_type<tc>, window_params = [{transform_indices = @transform_0, window_bounds = array<i64: 1, 342, 8>}, {pipeline_mode = #tpu.pipeline_mode<synchronous>, transform_indices = @transform_1, window_bounds = array<i64: 342, 1>}, {pipeline_mode = #tpu.pipeline_mode<synchronous>, transform_indices = @transform_2, window_bounds = array<i64: 8, 4>}, {pipeline_mode = #tpu.pipeline_mode<synchronous>, transform_indices = @transform_3, window_bounds = array<i64: 1, 4>}, {pipeline_mode = #tpu.pipeline_mode<synchronous>, transform_indices = @transform_4, window_bounds = array<i64: 9, 4, 8>}, {pipeline_mode = #tpu.pipeline_mode<synchronous>, transform_indices = @transform_5, window_bounds = array<i64: 1, 8>}, {transform_indices = @transform_6, window_bounds = array<i64: 1, 288, 8>}]} {
    %c0 = arith.constant 0 : index
    %c0_0 = arith.constant 0 : index
    %c0_1 = arith.constant 0 : index
    %0 = vector.load %arg1[%c0, %c0_0, %c0_1] : memref<1x342x8xbf16, #tpu.memory_space<vmem>>, vector<1x342x8xbf16>
    %1 = vector.shape_cast %0 : vector<1x342x8xbf16> to vector<342x8xbf16>
    %c0_2 = arith.constant 0 : index
    %c0_3 = arith.constant 0 : index
    %2 = vector.load %arg3[%c0_2, %c0_3] : memref<8x4xbf16, #tpu.memory_space<vmem>>, vector<8x4xbf16>
    %cst = arith.constant dense<0.000000e+00> : vector<342x4xf32>
    %3 = tpu.matmul %1, %2, %cst {dimension_numbers = #tpu.dot_dimension_numbers<[1], [0], [0], [1], [0, 0, 1, 1], [], []>} : vector<342x8xbf16>, vector<8x4xbf16>, vector<342x4xf32> -> vector<342x4xf32>
    %c0_4 = arith.constant 0 : index
    %c0_5 = arith.constant 0 : index
    %4 = vector.load %arg4[%c0_4, %c0_5] : memref<1x4xf32, #tpu.memory_space<vmem>>, vector<1x4xf32>
    %5 = vector.broadcast %4 : vector<1x4xf32> to vector<342x4xf32>
    %6 = arith.addf %3, %5 : vector<342x4xf32>
    %cst_6 = arith.constant 0.000000e+00 : f32
    %7 = vector.broadcast %cst_6 : f32 to vector<342x4xf32>
    %8 = arith.cmpf ogt, %6, %7 : vector<342x4xf32>
    %cst_7 = arith.constant 1.000000e-01 : f32
    %9 = vector.broadcast %cst_7 : f32 to vector<342x4xf32>
    %10 = arith.mulf %9, %6 : vector<342x4xf32>
    %11 = arith.select %8, %6, %10 : vector<342x4xi1>, vector<342x4xf32>
    %c0_8 = arith.constant 0 : index
    %c0_9 = arith.constant 0 : index
    %12 = vector.load %arg2[%c0_8, %c0_9] : memref<342x1xf32, #tpu.memory_space<vmem>>, vector<342x1xf32>
    %13 = vector.broadcast %12 : vector<342x1xf32> to vector<342x4xf32>
    %14 = arith.mulf %11, %13 : vector<342x4xf32>
    %15 = arith.truncf %14 : vector<342x4xf32> to vector<342x4xbf16>
    %c0_10 = arith.constant 0 : index
    %c0_11 = arith.constant 0 : index
    %16 = vector.load %arg8[%c0_10, %c0_11] : memref<342x4xbf16, #tpu.memory_space<vmem>>, vector<342x4xbf16>
    tpu.vector_store %arg8[%c0_10, %c0_11], %15 {strides = array<i32>} : memref<342x4xbf16, #tpu.memory_space<vmem>>, vector<342x4xbf16>,
    %cst_12 = arith.constant 0.000000e+00 : f32
    %17 = vector.broadcast %cst_12 : f32 to vector<288x8xf32>
    %c0_13 = arith.constant 0 : index
    %c0_14 = arith.constant 0 : index
    %18 = vector.load %arg8[%c0_13, %c0_14] : memref<342x4xbf16, #tpu.memory_space<vmem>>, vector<288x4xbf16>
    %c0_15 = arith.constant 0 : index
    %c0_16 = arith.constant 0 : index
    %c0_17 = arith.constant 0 : index
    %19 = vector.load %arg5[%c0_15, %c0_16, %c0_17] : memref<9x4x8xbf16, #tpu.memory_space<vmem>>, vector<1x4x8xbf16>
    %20 = vector.shape_cast %19 : vector<1x4x8xbf16> to vector<4x8xbf16>
    %cst_18 = arith.constant dense<0.000000e+00> : vector<288x8xf32>
    %21 = tpu.matmul %18, %20, %cst_18 {dimension_numbers = #tpu.dot_dimension_numbers<[1], [0], [0], [1], [0, 0, 1, 1], [], []>} : vector<288x4xbf16>, vector<4x8xbf16>, vector<288x8xf32> -> vector<288x8xf32>
    %22 = arith.addf %17, %21 : vector<288x8xf32>
    %c1 = arith.constant 1 : index
    %c0_19 = arith.constant 0 : index
    %23 = vector.load %arg8[%c1, %c0_19] : memref<342x4xbf16, #tpu.memory_space<vmem>>, vector<288x4xbf16>
    %c1_20 = arith.constant 1 : index
    %c0_21 = arith.constant 0 : index
    %c0_22 = arith.constant 0 : index
    %24 = vector.load %arg5[%c1_20, %c0_21, %c0_22] : memref<9x4x8xbf16, #tpu.memory_space<vmem>>, vector<1x4x8xbf16>
    %25 = vector.shape_cast %24 : vector<1x4x8xbf16> to vector<4x8xbf16>
    %cst_23 = arith.constant dense<0.000000e+00> : vector<288x8xf32>
    %26 = tpu.matmul %23, %25, %cst_23 {dimension_numbers = #tpu.dot_dimension_numbers<[1], [0], [0], [1], [0, 0, 1, 1], [], []>} : vector<288x4xbf16>, vector<4x8xbf16>, vector<288x8xf32> -> vector<288x8xf32>
    %27 = arith.addf %22, %26 : vector<288x8xf32>
    %c2 = arith.constant 2 : index
    %c0_24 = arith.constant 0 : index
    %28 = vector.load %arg8[%c2, %c0_24] : memref<342x4xbf16, #tpu.memory_space<vmem>>, vector<288x4xbf16>
    %c2_25 = arith.constant 2 : index
    %c0_26 = arith.constant 0 : index
    %c0_27 = arith.constant 0 : index
    %29 = vector.load %arg5[%c2_25, %c0_26, %c0_27] : memref<9x4x8xbf16, #tpu.memory_space<vmem>>, vector<1x4x8xbf16>
    %30 = vector.shape_cast %29 : vector<1x4x8xbf16> to vector<4x8xbf16>
    %cst_28 = arith.constant dense<0.000000e+00> : vector<288x8xf32>
    %31 = tpu.matmul %28, %30, %cst_28 {dimension_numbers = #tpu.dot_dimension_numbers<[1], [0], [0], [1], [0, 0, 1, 1], [], []>} : vector<288x4xbf16>, vector<4x8xbf16>, vector<288x8xf32> -> vector<288x8xf32>
    %32 = arith.addf %27, %31 : vector<288x8xf32>
    %c18 = arith.constant 18 : index
    %c0_29 = arith.constant 0 : index
    %33 = vector.load %arg8[%c18, %c0_29] : memref<342x4xbf16, #tpu.memory_space<vmem>>, vector<288x4xbf16>
    %c3 = arith.constant 3 : index
    %c0_30 = arith.constant 0 : index
    %c0_31 = arith.constant 0 : index
    %34 = vector.load %arg5[%c3, %c0_30, %c0_31] : memref<9x4x8xbf16, #tpu.memory_space<vmem>>, vector<1x4x8xbf16>
    %35 = vector.shape_cast %34 : vector<1x4x8xbf16> to vector<4x8xbf16>
    %cst_32 = arith.constant dense<0.000000e+00> : vector<288x8xf32>
    %36 = tpu.matmul %33, %35, %cst_32 {dimension_numbers = #tpu.dot_dimension_numbers<[1], [0], [0], [1], [0, 0, 1, 1], [], []>} : vector<288x4xbf16>, vector<4x8xbf16>, vector<288x8xf32> -> vector<288x8xf32>
    %37 = arith.addf %32, %36 : vector<288x8xf32>
    %c19 = arith.constant 19 : index
    %c0_33 = arith.constant 0 : index
    %38 = vector.load %arg8[%c19, %c0_33] : memref<342x4xbf16, #tpu.memory_space<vmem>>, vector<288x4xbf16>
    %c4 = arith.constant 4 : index
    %c0_34 = arith.constant 0 : index
    %c0_35 = arith.constant 0 : index
    %39 = vector.load %arg5[%c4, %c0_34, %c0_35] : memref<9x4x8xbf16, #tpu.memory_space<vmem>>, vector<1x4x8xbf16>
    %40 = vector.shape_cast %39 : vector<1x4x8xbf16> to vector<4x8xbf16>
    %cst_36 = arith.constant dense<0.000000e+00> : vector<288x8xf32>
    %41 = tpu.matmul %38, %40, %cst_36 {dimension_numbers = #tpu.dot_dimension_numbers<[1], [0], [0], [1], [0, 0, 1, 1], [], []>} : vector<288x4xbf16>, vector<4x8xbf16>, vector<288x8xf32> -> vector<288x8xf32>
    %42 = arith.addf %37, %41 : vector<288x8xf32>
    %c20 = arith.constant 20 : index
    %c0_37 = arith.constant 0 : index
    %43 = vector.load %arg8[%c20, %c0_37] : memref<342x4xbf16, #tpu.memory_space<vmem>>, vector<288x4xbf16>
    %c5 = arith.constant 5 : index
    %c0_38 = arith.constant 0 : index
    %c0_39 = arith.constant 0 : index
    %44 = vector.load %arg5[%c5, %c0_38, %c0_39] : memref<9x4x8xbf16, #tpu.memory_space<vmem>>, vector<1x4x8xbf16>
    %45 = vector.shape_cast %44 : vector<1x4x8xbf16> to vector<4x8xbf16>
    %cst_40 = arith.constant dense<0.000000e+00> : vector<288x8xf32>
    %46 = tpu.matmul %43, %45, %cst_40 {dimension_numbers = #tpu.dot_dimension_numbers<[1], [0], [0], [1], [0, 0, 1, 1], [], []>} : vector<288x4xbf16>, vector<4x8xbf16>, vector<288x8xf32> -> vector<288x8xf32>
    %47 = arith.addf %42, %46 : vector<288x8xf32>
    %c36 = arith.constant 36 : index
    %c0_41 = arith.constant 0 : index
    %48 = vector.load %arg8[%c36, %c0_41] : memref<342x4xbf16, #tpu.memory_space<vmem>>, vector<288x4xbf16>
    %c6 = arith.constant 6 : index
    %c0_42 = arith.constant 0 : index
    %c0_43 = arith.constant 0 : index
    %49 = vector.load %arg5[%c6, %c0_42, %c0_43] : memref<9x4x8xbf16, #tpu.memory_space<vmem>>, vector<1x4x8xbf16>
    %50 = vector.shape_cast %49 : vector<1x4x8xbf16> to vector<4x8xbf16>
    %cst_44 = arith.constant dense<0.000000e+00> : vector<288x8xf32>
    %51 = tpu.matmul %48, %50, %cst_44 {dimension_numbers = #tpu.dot_dimension_numbers<[1], [0], [0], [1], [0, 0, 1, 1], [], []>} : vector<288x4xbf16>, vector<4x8xbf16>, vector<288x8xf32> -> vector<288x8xf32>
    %52 = arith.addf %47, %51 : vector<288x8xf32>
    %c37 = arith.constant 37 : index
    %c0_45 = arith.constant 0 : index
    %53 = vector.load %arg8[%c37, %c0_45] : memref<342x4xbf16, #tpu.memory_space<vmem>>, vector<288x4xbf16>
    %c7 = arith.constant 7 : index
    %c0_46 = arith.constant 0 : index
    %c0_47 = arith.constant 0 : index
    %54 = vector.load %arg5[%c7, %c0_46, %c0_47] : memref<9x4x8xbf16, #tpu.memory_space<vmem>>, vector<1x4x8xbf16>
    %55 = vector.shape_cast %54 : vector<1x4x8xbf16> to vector<4x8xbf16>
    %cst_48 = arith.constant dense<0.000000e+00> : vector<288x8xf32>
    %56 = tpu.matmul %53, %55, %cst_48 {dimension_numbers = #tpu.dot_dimension_numbers<[1], [0], [0], [1], [0, 0, 1, 1], [], []>} : vector<288x4xbf16>, vector<4x8xbf16>, vector<288x8xf32> -> vector<288x8xf32>
    %57 = arith.addf %52, %56 : vector<288x8xf32>
    %c38 = arith.constant 38 : index
    %c0_49 = arith.constant 0 : index
    %58 = vector.load %arg8[%c38, %c0_49] : memref<342x4xbf16, #tpu.memory_space<vmem>>, vector<288x4xbf16>
    %c8 = arith.constant 8 : index
    %c0_50 = arith.constant 0 : index
    %c0_51 = arith.constant 0 : index
    %59 = vector.load %arg5[%c8, %c0_50, %c0_51] : memref<9x4x8xbf16, #tpu.memory_space<vmem>>, vector<1x4x8xbf16>
    %60 = vector.shape_cast %59 : vector<1x4x8xbf16> to vector<4x8xbf16>
    %cst_52 = arith.constant dense<0.000000e+00> : vector<288x8xf32>
    %61 = tpu.matmul %58, %60, %cst_52 {dimension_numbers = #tpu.dot_dimension_numbers<[1], [0], [0], [1], [0, 0, 1, 1], [], []>} : vector<288x4xbf16>, vector<4x8xbf16>, vector<288x8xf32> -> vector<288x8xf32>
    %62 = arith.addf %57, %61 : vector<288x8xf32>
    %c0_53 = arith.constant 0 : index
    %c0_54 = arith.constant 0 : index
    %63 = vector.load %arg6[%c0_53, %c0_54] : memref<1x8xf32, #tpu.memory_space<vmem>>, vector<1x8xf32>
    %64 = vector.broadcast %63 : vector<1x8xf32> to vector<288x8xf32>
    %65 = arith.addf %62, %64 : vector<288x8xf32>
    %cst_55 = arith.constant 0.000000e+00 : f32
    %66 = vector.broadcast %cst_55 : f32 to vector<288x8xf32>
    %67 = arith.cmpf ogt, %65, %66 : vector<288x8xf32>
    %cst_56 = arith.constant 1.000000e-01 : f32
    %68 = vector.broadcast %cst_56 : f32 to vector<288x8xf32>
    %69 = arith.mulf %68, %65 : vector<288x8xf32>
    %70 = arith.select %67, %65, %69 : vector<288x8xi1>, vector<288x8xf32>
    %c0_57 = arith.constant 0 : index
    %c0_58 = arith.constant 0 : index
    %c0_59 = arith.constant 0 : index
    %71 = vector.load %arg7[%c0_57, %c0_58, %c0_59] : memref<1x288x8xf32, #tpu.memory_space<vmem>>, vector<1x288x8xf32>
    %72 = vector.shape_cast %71 : vector<1x288x8xf32> to vector<288x8xf32>
    %73 = vector.shape_cast %70 : vector<288x8xf32> to vector<1x288x8xf32>
    tpu.vector_store %arg7[%c0_57, %c0_58, %c0_59], %73 {strides = array<i32>} : memref<1x288x8xf32, #tpu.memory_space<vmem>>, vector<1x288x8xf32>,
    return
  }
  func.func @transform_0(%arg0: i32) -> (i32, i32, i32) {
    %c0_i32 = arith.constant 0 : i32
    %c0_i32_0 = arith.constant 0 : i32
    %c0_i32_1 = arith.constant 0 : i32
    return %arg0, %c0_i32, %c0_i32_0 : i32, i32, i32
  }
  func.func @transform_1(%arg0: i32) -> (i32, i32) {
    %c0_i32 = arith.constant 0 : i32
    %c0_i32_0 = arith.constant 0 : i32
    %c0_i32_1 = arith.constant 0 : i32
    return %c0_i32, %c0_i32_0 : i32, i32
  }
  func.func @transform_2(%arg0: i32) -> (i32, i32) {
    %c0_i32 = arith.constant 0 : i32
    %c0_i32_0 = arith.constant 0 : i32
    %c0_i32_1 = arith.constant 0 : i32
    return %c0_i32, %c0_i32_0 : i32, i32
  }
  func.func @transform_3(%arg0: i32) -> (i32, i32) {
    %c0_i32 = arith.constant 0 : i32
    %c0_i32_0 = arith.constant 0 : i32
    %c0_i32_1 = arith.constant 0 : i32
    return %c0_i32, %c0_i32_0 : i32, i32
  }
  func.func @transform_4(%arg0: i32) -> (i32, i32, i32) {
    %c0_i32 = arith.constant 0 : i32
    %c0_i32_0 = arith.constant 0 : i32
    %c0_i32_1 = arith.constant 0 : i32
    %c0_i32_2 = arith.constant 0 : i32
    return %c0_i32, %c0_i32_0, %c0_i32_1 : i32, i32, i32
  }
  func.func @transform_5(%arg0: i32) -> (i32, i32) {
    %c0_i32 = arith.constant 0 : i32
    %c0_i32_0 = arith.constant 0 : i32
    %c0_i32_1 = arith.constant 0 : i32
    return %c0_i32, %c0_i32_0 : i32, i32
  }
  func.func @transform_6(%arg0: i32) -> (i32, i32, i32) {
    %c0_i32 = arith.constant 0 : i32
    %c0_i32_0 = arith.constant 0 : i32
    %c0_i32_1 = arith.constant 0 : i32
    return %arg0, %c0_i32, %c0_i32_0 : i32, i32, i32
  }
}

</mosaic_0001>

<bundles_post_ra>
// kernel: tpu_custom_call.1
= control target key start
LH: loop header
LB: loop body
LE: loop exit
PB: predicated region body
PF: predicated region fallthrough
CT: control target
= control target key end

     0   :  { %s6145_s21 = smov 0   ;;  %s8505_s0 = inlined_call_operand.vmem [shape: bf16[2,342,8], index: 0, kind: input, shape index: {}]   ;;  %s8506_s1 = inlined_call_operand.vmem [shape: f32[342,1], index: 1, kind: input, shape index: {}]   ;;  %s8507_s2 = inlined_call_operand.vmem [shape: bf16[8,4], index: 2, kind: input, shape index: {}]   ;;  %s8508_s3 = inlined_call_operand.vmem [shape: f32[1,4], index: 3, kind: input, shape index: {}]   ;;  %s8509_s4 = inlined_call_operand.vmem [shape: bf16[9,4,8], index: 4, kind: input, shape index: {}]   ;;  %s8510_s5 = inlined_call_operand.vmem [shape: f32[1,8], index: 5, kind: input, shape index: {}]   ;;  %s8511_s6 = inlined_call_operand.vmem [shape: f32[2,288,8], index: 6, kind: output, shape index: {}]  }
   0x1 LB: > { %s5029_s22 = sadd.s32 4294967295, %s6107_s21   ;;  %p5033_p0 = scmp.ge.s32.totalorder %s6107_s21, 1  ;;  %s6107_s21 = sphi %s6145_s21, %s16_s21  }
   0x2   : > { %p212_p1 = scmp.lt.s32.totalorder %s6107_s21, 3 }
   0x4   : > { %p213_p2 = pnand %p5033_p0, %p212_p1 }
   0x6   : > { %216 = sbr.rel (%p213_p2) target bundleno = 828 (0x33c), region = 44 }
   0xb   : > { %v820_v0 = vld [vmem:[%s8506_s1] sm:$0xff]  ;;  %vm479_vm0 = vcmask 1043456   ;;  %p242_p3 = scmp.lt.s32.totalorder %s5029_s22, 1  ;;  %v6109_v2 = vmov 0   ;;  %v822_v4 = vld [vmem:[%s8506_s1 + $0x10] sm:$0xff]  ;;  %v821_v5 = vld [vmem:[%s8506_s1 + $0x8] sm:$0xff] }
   0xc   : > { %v296_v1 = vld [vmem:[%s8507_s2] sm:$0xf]  ;;  %6008 = vset.pattern.permute.xlu0 %v6109_v2  ;;  %6009 = vset.pattern.permute.xlu1 %v6109_v2  ;;  %vm412_vm1 = vcmask 64512   ;;  %v823_v6 = vld [vmem:[%s8506_s1 + $0x18] sm:$0xff]  ;;  %v825_v10 = vld [vmem:[%s8506_s1 + $0x28] sm:$0xff]  ;;  %vm1676_vm2 = vcmask 1041408  }
   0xd   : > { %5986 = vmatprep.subr.msk.bf16.mxu0 %vm479_vm0, %v296_v1  ;;  %v481_v3 = vsel %vm479_vm0, %v296_v1, 0  ;;  %865 = vperm.xlu0 %6008, %v820_v0   ;;  %s8858_s22 = smov (!%p242_p3, %s5029_s22), 1  ;;  %v824_v7 = vld [vmem:[%s8506_s1 + $0x20] sm:$0xff]  ;;  %v826_v12 = vld [vmem:[%s8506_s1 + $0x30] sm:$0xff]  ;;  %v827_v15 = vld [vmem:[%s8506_s1 + $0x38] sm:$0xff]  ;;  %vm1294_vm4 = vcmask 27648  }
   0xe   : > { %5987 = vmatprep.subr.msk.bf16.mxu1 %vm479_vm0, %v296_v1  ;;  %5597 = vmatpush3.bf16.msra.mxu0 %v481_v3  ;;  %s5997_s7 = smul.u32 172, %s8858_s22  ;;  %v828_v16 = vld [vmem:[%s8506_s1 + $0x40] sm:$0xff]  ;;  %v829_v19 = vld [vmem:[%s8506_s1 + $0x48] sm:$0xff]  ;;  %v830_v20 = vld [vmem:[%s8506_s1 + $0x50] sm:$0xff]  ;;  %vm2079_vm13 = vcmask 1046528   ;;  %vm1621_vm15 = vcmask 31744  }
   0xf   : > { %5985 = vmatpush3.bf16.msra.mxu1 %v481_v3  ;;  %875 = vperm.xlu1 %6009, %v822_v4   ;;  %v831_v21 = vld [vmem:[%s8506_s1 + $0x58] sm:$0xff]  ;;  %v832_v23 = vld [vmem:[%s8506_s1 + $0x60] sm:$0xff]  ;;  %v833_v25 = vld [vmem:[%s8506_s1 + $0x68] sm:$0xff] }
  0x10   : > { %s6171_s10 = scalar_lea.vmem %s8505_s0, %s5997_s7  ;;  %v834_v26 = vld [vmem:[%s8506_s1 + $0x70] sm:$0xff]  ;;  %v835_v27 = vld [vmem:[%s8506_s1 + $0x78] sm:$0xff]  ;;  %v836_v28 = vld [vmem:[%s8506_s1 + $0x80] sm:$0xff]  ;;  %s5998_s7 = smul.u32 288, %s8858_s22 }
  0x11   : > { %870 = vperm.xlu0 %6008, %v821_v5   ;;  %v6010_v8 = vld [vmem:[%s6171_s10] sm:$0xff]   ;;  %v6012_v11 = vld [vmem:[%s6171_s10 + $0x8] sm:$0xff]   ;;  %v6014_v14 = vld [vmem:[%s6171_s10 + $0x10] sm:$0xff]  }
  0x12   : > { %v6011_v9 = vld [vmem:[%s6171_s10 + $0xa0] sm:$0xff]   ;;  %5598 = vmatprep.mubr.msk.bf16.mxu0 %vm412_vm1, %v6010_v8  ;;  %v6013_v13 = vld [vmem:[%s6171_s10 + $0xa8] ss:$0 sps:$4 sm:$0x77]   ;;  %v6015_v17 = vld [vmem:[%s6171_s10 + $0x18] sm:$0xff]   ;;  %s8279_s9 = scalar_lea.vmem %s8511_s6, %s5998_s7 }
  0x13   : > { %880 = vperm.xlu1 %6009, %v823_v6   ;;  %5638 = vmatprep.mubr.msk.bf16.mxu1 %vm412_vm1, %v6011_v9  ;;  %v6016_v18 = vld [vmem:[%s6171_s10 + $0x20] sm:$0xff]   ;;  %v6017_v22 = vld [vmem:[%s6171_s10 + $0x28] sm:$0xff]   ;;  %v6018_v24 = vld [vmem:[%s6171_s10 + $0x30] sm:$0xff]  }
  0x14   : > { %5599 = vmatmul.mubr.msk.bf16.vlgmr.msra.gmra.mxu0 %vm412_vm1, %v6012_v11  ;;  %5639 = vmatmul.mubr.msk.bf16.vlgmr.msra.gmra.mxu1 %vm412_vm1, %v6013_v13  ;;  %v6019_v29 = vld [vmem:[%s6171_s10 + $0x38] sm:$0xff]   ;;  %v6020_v30 = vld [vmem:[%s6171_s10 + $0x40] sm:$0xff]   ;;  %v837_v31 = vld [vmem:[%s8506_s1 + $0x88] sm:$0xff] }
  0x15   : > { %885 = vperm.xlu0 %6008, %v824_v7   ;;  %5602 = vmatprep.mubr.msk.bf16.mxu0 %vm412_vm1, %v6014_v14  ;;  %v838_v32 = vld [vmem:[%s8506_s1 + $0x90] sm:$0xff]  ;;  %v839_v33 = vld [vmem:[%s8506_s1 + $0x98] sm:$0xff]  ;;  %v6021_v34 = vld [vmem:[%s6171_s10 + $0x48] sm:$0xff]  }
  0x16   : > { %v840_v35 = vld [vmem:[%s8506_s1 + $0xa0] sm:$0xff]  ;;  %v6022_v36 = vld [vmem:[%s6171_s10 + $0x50] sm:$0xff]   ;;  %v841_v37 = vld [vmem:[%s8506_s1 + $0xa8] sm:$0xff] }
  0x17   : > { %890 = vperm.xlu1 %6009, %v825_v10   ;;  %v842_v38 = vld [vmem:[%s8506_s1 + $0xb0] sm:$0xff]  ;;  %v843_v39 = vld [vmem:[%s8506_s1 + $0xb8] sm:$0xff]  ;;  %v844_v41 = vld [vmem:[%s8506_s1 + $0xc0] sm:$0xff] }
  0x18   : > { %v6023_v40 = vld [vmem:[%s6171_s10 + $0x58] sm:$0xff]   ;;  %v6024_v42 = vld [vmem:[%s6171_s10 + $0x60] sm:$0xff]   ;;  %v845_v43 = vld [vmem:[%s8506_s1 + $0xc8] sm:$0xff] }
  0x19   : > { %895 = vperm.xlu0 %6008, %v826_v12   ;;  %v846_v44 = vld [vmem:[%s8506_s1 + $0xd0] sm:$0xff]  ;;  %v847_v45 = vld [vmem:[%s8506_s1 + $0xd8] sm:$0xff]  ;;  %v6025_v46 = vld [vmem:[%s6171_s10 + $0x68] sm:$0xff]  }
  0x1a   : > { %v848_v47 = vld [vmem:[%s8506_s1 + $0xe0] sm:$0xff]  ;;  %v6026_v48 = vld [vmem:[%s6171_s10 + $0x70] sm:$0xff]   ;;  %v849_v49 = vld [vmem:[%s8506_s1 + $0xe8] sm:$0xff] }
  0x1b   : > { %900 = vperm.xlu1 %6009, %v827_v15   ;;  %v850_v50 = vld [vmem:[%s8506_s1 + $0xf0] sm:$0xff]  ;;  %v851_v51 = vld [vmem:[%s8506_s1 + $0xf8] sm:$0xff]  ;;  %v852_v53 = vld [vmem:[%s8506_s1 + $0x100] sm:$0xff] }
  0x1c   : > { %5603 = vmatmul.mubr.msk.bf16.gmra.mxu0 %vm412_vm1, %v6015_v17  ;;  %v6027_v52 = vld [vmem:[%s6171_s10 + $0x78] sm:$0xff]   ;;  %v6028_v54 = vld [vmem:[%s6171_s10 + $0x80] sm:$0xff]   ;;  %v853_v55 = vld [vmem:[%s8506_s1 + $0x108] sm:$0xff] }
  0x1d   : > { %905 = vperm.xlu0 %6008, %v828_v16   ;;  %5606 = vmatprep.mubr.msk.bf16.mxu0 %vm412_vm1, %v6016_v18  ;;  %v854_v56 = vld [vmem:[%s8506_s1 + $0x110] sm:$0xff]  ;;  %v855_v57 = vld [vmem:[%s8506_s1 + $0x118] sm:$0xff]  ;;  %v6029_v58 = vld [vmem:[%s6171_s10 + $0x88] sm:$0xff]  }
  0x1e   : > { %v856_v59 = vld [vmem:[%s8506_s1 + $0x120] sm:$0xff]  ;;  %v6030_v60 = vld [vmem:[%s6171_s10 + $0x90] sm:$0xff]   ;;  %v857_v61 = vld [vmem:[%s8506_s1 + $0x128] sm:$0xff] }
  0x1f   : > { %910 = vperm.xlu1 %6009, %v829_v19   ;;  %v858_v62 = vld [vmem:[%s8506_s1 + $0x130] sm:$0xff]  ;;  %v859_v63 = vld [vmem:[%s8506_s1 + $0x138] sm:$0xff]  ;;  %v860_v1 = vld [vmem:[%s8506_s1 + $0x140] sm:$0xff] }
  0x20   : > { %v6031_v0 = vld [vmem:[%s6171_s10 + $0x98] sm:$0xff]   ;;  %v861_v2 = vld [vmem:[%s8506_s1 + $0x148] sm:$0xff]  ;;  %v862_v3 = vld [vmem:[%s8506_s1 + $0x150] sm:$0x3f] }
  0x21   : > { %915 = vperm.xlu0 %6008, %v830_v20   ;;  %v5180_v4 = vld [vmem:[%s8509_s4 + $0x4] sm:$0x3]  ;;  %v5124_v5 = vld [vmem:[%s8509_s4 + $0x2] sm:$0x3]  ;;  %v6350_v8 = vld [vmem:[%s8509_s4] sm:$0x3] }
  0x22   : > { %5990 = vmatprep.subr.msk.bf16.mxu0 %vm1676_vm2, %v5180_v4  ;;  %5988 = vmatprep.subr.msk.bf16.mxu1 %vm1676_vm2, %v5124_v5  ;;  %v1678_v6 = vsel %vm1676_vm2, %v5124_v5, 0  ;;  %v2172_v7 = vsel %vm1676_vm2, %v5180_v4, 0 }
  0x23   : > { %920 = vperm.xlu1 %6009, %v831_v21   ;;  %5643 = vmatpush3.bf16.msra.mxu1 %v1678_v6 }
  0x24   : > { %5607 = vmatmul.mubr.msk.bf16.gmra.mxu0 %vm412_vm1, %v6017_v22  ;;  %5989 = vmatprep.subr.msk.bf16.mxu1 %vm1676_vm2, %v6350_v8 }
  0x25   : > { %925 = vperm.xlu0 %6008, %v832_v23   ;;  %5610 = vmatprep.mubr.msk.bf16.mxu0 %vm412_vm1, %v6018_v24 }
  0x26   : > { %5719 = vmatpush3.bf16.msra.mxu0 %v2172_v7 }
  0x27   : > { %930 = vperm.xlu1 %6009, %v833_v25  }
  0x29   : > { %935 = vperm.xlu0 %6008, %v834_v26  }
  0x2b   : > { %940 = vperm.xlu1 %6009, %v835_v27  }
  0x2c   : > { %5611 = vmatmul.mubr.msk.bf16.gmra.mxu0 %vm412_vm1, %v6019_v29 }
  0x2d   : > { %945 = vperm.xlu0 %6008, %v836_v28   ;;  %5614 = vmatprep.mubr.msk.bf16.mxu0 %vm412_vm1, %v6020_v30 }
  0x2f   : > { %950 = vperm.xlu1 %6009, %v837_v31  }
  0x31   : > { %955 = vperm.xlu0 %6008, %v838_v32  }
  0x33   : > { %960 = vperm.xlu1 %6009, %v839_v33  }
  0x34   : > { %5615 = vmatmul.mubr.msk.bf16.gmra.mxu0 %vm412_vm1, %v6021_v34 }
  0x35   : > { %965 = vperm.xlu0 %6008, %v840_v35   ;;  %5618 = vmatprep.mubr.msk.bf16.mxu0 %vm412_vm1, %v6022_v36 }
  0x37   : > { %970 = vperm.xlu1 %6009, %v841_v37  }
  0x39   : > { %975 = vperm.xlu0 %6008, %v842_v38  }
  0x3b   : > { %980 = vperm.xlu1 %6009, %v843_v39  }
  0x3c   : > { %5619 = vmatmul.mubr.msk.bf16.gmra.mxu0 %vm412_vm1, %v6023_v40 }
  0x3d   : > { %985 = vperm.xlu0 %6008, %v844_v41   ;;  %5622 = vmatprep.mubr.msk.bf16.mxu0 %vm412_vm1, %v6024_v42 }
  0x3f   : > { %990 = vperm.xlu1 %6009, %v845_v43  }
  0x41   : > { %995 = vperm.xlu0 %6008, %v846_v44   ;;  %v6425_v44 = vld [vmem:[%s8509_s4 + $0x8] sm:$0x3] }
  0x42   : > { %5992 = vmatprep.subr.msk.bf16.mxu0 %vm1676_vm2, %v6425_v44 }
  0x43   : > { %1000 = vperm.xlu1 %6009, %v847_v45  }
  0x44   : > { %5623 = vmatmul.mubr.msk.bf16.gmra.mxu0 %vm412_vm1, %v6025_v46 }
  0x45   : > { %1005 = vperm.xlu0 %6008, %v848_v47   ;;  %5626 = vmatprep.mubr.msk.bf16.mxu0 %vm412_vm1, %v6026_v48  ;;  %v6436_v47 = vld [vmem:[%s8508_s3] ss:$0 sm:$0xff] }
  0x47   : > { %1010 = vperm.xlu1 %6009, %v849_v49  }
  0x49   : > { %1015 = vperm.xlu0 %6008, %v850_v50  }
  0x4b   : > { %1020 = vperm.xlu1 %6009, %v851_v51  }
  0x4c   : > { %5627 = vmatmul.mubr.msk.bf16.gmra.mxu0 %vm412_vm1, %v6027_v52 }
  0x4d   : > { %1025 = vperm.xlu0 %6008, %v852_v53   ;;  %5630 = vmatprep.mubr.msk.bf16.mxu0 %vm412_vm1, %v6028_v54 }
  0x4f   : > { %1030 = vperm.xlu1 %6009, %v853_v55  }
  0x51   : > { %1035 = vperm.xlu0 %6008, %v854_v56  }
  0x53   : > { %1040 = vperm.xlu1 %6009, %v855_v57  }
  0x54   : > { %5631 = vmatmul.mubr.msk.bf16.gmra.mxu0 %vm412_vm1, %v6029_v58 }
  0x55   : > { %1045 = vperm.xlu0 %6008, %v856_v59   ;;  %5634 = vmatprep.mubr.msk.bf16.mxu0 %vm412_vm1, %v6030_v60 }
  0x57   : > { %1050 = vperm.xlu1 %6009, %v857_v61  }
  0x59   : > { %1055 = vperm.xlu0 %6008, %v858_v62  }
  0x5b   : > { %1060 = vperm.xlu1 %6009, %v859_v63  }
  0x5c   : > { %5635 = vmatmul.mubr.msk.bf16.gmra.mxu0 %vm412_vm1, %v6031_v0 }
  0x5d   : > { %1065 = vperm.xlu0 %6008, %v860_v1  }
  0x5f   : > { %1070 = vperm.xlu1 %6009, %v861_v2  }
  0x61   : > { %1075 = vperm.xlu0 %6008, %v862_v3  }
  0x88   : > { %v6354_v9 = vpop.permute.xlu0 %865 }
  0x8a   : > { %v876_v10 = vpop.permute.xlu1 %875 }
  0x8c   : > { %v6356_v11 = vpop.permute.xlu0 %870 }
  0x8e   : > { %v6358_v12 = vpop.permute.xlu1 %880 }
  0x90   : > { %v6360_v13 = vpop.permute.xlu0 %885 }
  0x92   : > { %v6362_v14 = vpop.permute.xlu1 %890 }
  0x94   : > { %v6364_v15 = vpop.permute.xlu0 %895 }
  0x96   : > { %v6366_v16 = vpop.permute.xlu1 %900 }
  0x98   : > { %v6368_v17 = vpop.permute.xlu0 %905 }
  0x9a   : > { %v6370_v18 = vpop.permute.xlu1 %910 }
  0x9c   : > { %v6372_v19 = vpop.permute.xlu0 %915 }
  0x9e   : > { %v6374_v20 = vpop.permute.xlu1 %920 }
  0xa0   : > { %v6376_v21 = vpop.permute.xlu0 %925 }
  0xa2   : > { %v6378_v22 = vpop.permute.xlu1 %930 }
  0xa4   : > { %v6380_v23 = vpop.permute.xlu0 %935 }
  0xa6   : > { %v6382_v24 = vpop.permute.xlu1 %940 }
  0xa8   : > { %v6384_v25 = vpop.permute.xlu0 %945 }
  0xaa   : > { %v6386_v26 = vpop.permute.xlu1 %950 }
  0xac   : > { %v6388_v27 = vpop.permute.xlu0 %955 }
  0xae   : > { %v6390_v28 = vpop.permute.xlu1 %960 }
  0xb0   : > { %v6392_v29 = vpop.permute.xlu0 %965 }
  0xb2   : > { %v6394_v30 = vpop.permute.xlu1 %970 }
  0xb4   : > { %v6396_v31 = vpop.permute.xlu0 %975 }
  0xb6   : > { %v6398_v32 = vpop.permute.xlu1 %980 }
  0xb8   : > { %v6400_v33 = vpop.permute.xlu0 %985 }
  0xba   : > { %v6402_v34 = vpop.permute.xlu1 %990 }
  0xbc   : > { %v6404_v35 = vpop.permute.xlu0 %995 }
  0xbe   : > { %v6406_v36 = vpop.permute.xlu1 %1000 }
  0xc0   : > { %v6408_v37 = vpop.permute.xlu0 %1005 }
  0xc2   : > { %v6410_v38 = vpop.permute.xlu1 %1010 }
  0xc4   : > { %v6412_v39 = vpop.permute.xlu0 %1015 }
  0xc6   : > { %v6414_v40 = vpop.permute.xlu1 %1020 }
  0xc8   : > { %v6416_v41 = vpop.permute.xlu0 %1025 }
  0xca   : > { %v6418_v42 = vpop.permute.xlu1 %1030 }
  0xcc   : > { %v6420_v43 = vpop.permute.xlu0 %1035 }
  0xce   : > { %v6429_v45 = vpop.permute.xlu1 %1040 }
  0xd0   : > { %v6431_v46 = vpop.permute.xlu0 %1045 }
  0xd2   : > { %v6440_v49 = vpop.permute.xlu1 %1050 }
  0xd4   : > { %v6438_v48 = vpop.permute.xlu0 %1055  ;;  %v5600_v50 = vpop.f32.mrf.mxu0 }
  0xd5   : > { %v526_v51 = vadd.f32 %v5600_v50, %v6436_v47  ;;  %v5640_v52 = vpop.f32.mrf.mxu1 }
  0xd6   : > { %v517_v53 = vpop.f32.mrf.mxu0  ;;  %v6446_v0 = vpop.permute.xlu1 %1060 }
  0xd7   : > { %vm693_vm3 = vcmp.gt.f32.partialorder %v526_v51, 0.0  ;;  %v736_v54 = vmul.f32 0.1, %v526_v51  ;;  %v518_v55 = vadd.f32 %v6436_v47, %v517_v53  ;;  %v677_v56 = vpop.f32.mrf.mxu1 }
  0xd8   : > { %v678_v57 = vadd.f32 %v6436_v47, %v677_v56  ;;  %v5601_v58 = vpop.f32.mrf.mxu0  ;;  %v1066_v59 = vpop.permute.xlu0 %1065 }
  0xd9   : > { %v779_v60 = vsel %vm693_vm3, %v526_v51, %v736_v54  ;;  %vm691_vm5 = vcmp.gt.f32.partialorder %v518_v55, 0.0  ;;  %v734_v61 = vmul.f32 0.1, %v518_v55  ;;  %v529_v62 = vadd.f32 %v5601_v58, %v6436_v47  ;;  %v5641_v63 = vpop.f32.mrf.mxu1 }
  0xda   : > { %v1080_v1 = vmul.f32 %v876_v10, %v779_v60  ;;  %v774_v2 = vmul.f32 0.1, %v678_v57  ;;  %v520_v3 = vpop.f32.mrf.mxu0  ;;  %vm731_vm6 = vcmp.gt.f32.partialorder %v678_v57, 0.0 }
  0xdb   : > { %v777_v4 = vsel %vm691_vm5, %v518_v55, %v734_v61  ;;  %vm694_vm7 = vcmp.gt.f32.partialorder %v529_v62, 0.0  ;;  %v737_v5 = vmul.f32 0.1, %v529_v62  ;;  %v521_v6 = vadd.f32 %v6436_v47, %v520_v3  ;;  %v680_v7 = vpop.f32.mrf.mxu1 }
  0xdc   : > { %v5361_v50 = vpack.c.bf16 %v1080_v1, %v1080_v1  ;;  %v1078_v51 = vmul.f32 %v6354_v9, %v777_v4  ;;  %v817_v52 = vsel %vm731_vm6, %v678_v57, %v774_v2  ;;  %v5604_v53 = vpop.f32.mrf.mxu0  ;;  %v1076_v63 = vpop.permute.xlu0 %1075  ;;  %vm1472_vm5 = vsmask.f32 7424 }
  0xdd   : > { %v780_v54 = vsel %vm694_vm7, %v529_v62, %v737_v5  ;;  %vm692_vm8 = vcmp.gt.f32.partialorder %v521_v6, 0.0  ;;  %v735_v56 = vmul.f32 0.1, %v521_v6  ;;  %v1118_v58 = vmul.f32 %v1066_v59, %v817_v52  ;;  %v1071_v9 = vpop.permute.xlu1 %1070 }
  0xde   : > { %1297 = vst.msk [vmem:[#allocation2 + $0x8] sm:$0xf] %vm1294_vm4, %v5361_v50  ;;  %v5359_v10 = vpack.c.bf16 %v1078_v51, %v1078_v51  ;;  %v1081_v60 = vmul.f32 %v6358_v12, %v780_v54  ;;  %v542_v55 = vadd.f32 %v5604_v53, %v6436_v47  ;;  %v533_v61 = vpop.f32.mrf.mxu0 }
  0xdf   : > { %v778_v3 = vsel %vm692_vm8, %v521_v6, %v735_v56  ;;  %v5399_v7 = vpack.c.bf16 %v1118_v58, %v1118_v58  ;;  %v534_v1 = vadd.f32 %v6436_v47, %v533_v61 }
  0xe0   : > { %1295 = vst.msk [vmem:[#allocation2] sm:$0xf] %vm1294_vm4, %v5359_v10  ;;  %v5362_v57 = vpack.c.bf16 %v1081_v60, %v1081_v60  ;;  %v1079_v62 = vmul.f32 %v6356_v11, %v778_v3  ;;  %vm697_vm9 = vcmp.gt.f32.partialorder %v542_v55, 0.0  ;;  %v740_v59 = vmul.f32 0.1, %v542_v55  ;;  %v5605_v2 = vpop.f32.mrf.mxu0 }
  0xe1   : > { %1335 = vst.msk [vmem:[#allocation2 + $0xa0] sm:$0xf] %vm1294_vm4, %v5399_v7  ;;  %vm695_vm10 = vcmp.gt.f32.partialorder %v534_v1, 0.0  ;;  %v738_v12 = vmul.f32 0.1, %v534_v1  ;;  %v545_v6 = vadd.f32 %v5605_v2, %v6436_v47 }
  0xe2   : > { %1298 = vst.msk [vmem:[#allocation2 + $0xc] sm:$0xf] %vm1294_vm4, %v5362_v57  ;;  %v5360_v4 = vpack.c.bf16 %v1079_v62, %v1079_v62  ;;  %v783_v5 = vsel %vm697_vm9, %v542_v55, %v740_v59  ;;  %v536_v50 = vpop.f32.mrf.mxu0  ;;  %v6471_v57 = vsel %vm1676_vm2, %v6350_v8, 0 }
  0xe3   : > { %v1084_v51 = vmul.f32 %v6364_v15, %v783_v5  ;;  %v781_v52 = vsel %vm695_vm10, %v534_v1, %v738_v12  ;;  %v537_v53 = vadd.f32 %v6436_v47, %v536_v50  ;;  %vm698_vm11 = vcmp.gt.f32.partialorder %v545_v6, 0.0 }
  0xe4   : > { %1296 = vst.msk [vmem:[#allocation2 + $0x4] sm:$0xf] %vm1294_vm4, %v5360_v4  ;;  %v1082_v11 = vmul.f32 %v6360_v13, %v781_v52  ;;  %v741_v54 = vmul.f32 0.1, %v545_v6  ;;  %v5608_v56 = vpop.f32.mrf.mxu0  ;;  %v6478_v4 = vsel %vm1676_vm2, %v6425_v44, 0 }
  0xe5   : > { %v5365_v58 = vpack.c.bf16 %v1084_v51, %v1084_v51  ;;  %vm696_vm12 = vcmp.gt.f32.partialorder %v537_v53, 0.0  ;;  %v739_v10 = vmul.f32 0.1, %v537_v53  ;;  %v558_v60 = vadd.f32 %v5608_v56, %v6436_v47 }
  0xe6   : > { %v5363_v55 = vpack.c.bf16 %v1082_v11, %v1082_v11  ;;  %v784_v61 = vsel %vm698_vm11, %v545_v6, %v741_v54  ;;  %v549_v63 = vpop.f32.mrf.mxu0 }
  0xe7   : > { %1301 = vst.msk [vmem:[#allocation2 + $0x18] sm:$0xf] %vm1294_vm4, %v5365_v58  ;;  %v1085_v15 = vmul.f32 %v6366_v16, %v784_v61  ;;  %v782_v3 = vsel %vm696_vm12, %v537_v53, %v739_v10  ;;  %vm701_vm14 = vcmp.gt.f32.partialorder %v558_v60, 0.0  ;;  %v744_v7 = vmul.f32 0.1, %v558_v60 }
  0xe8   : > { %1299 = vst.msk [vmem:[#allocation2 + $0x10] sm:$0xf] %vm1294_vm4, %v5363_v55  ;;  %v1083_v13 = vmul.f32 %v6362_v14, %v782_v3  ;;  %v550_v1 = vadd.f32 %v6436_v47, %v549_v63  ;;  %v5609_v9 = vpop.f32.mrf.mxu0  ;;  %v1339_v16 = vld [vmem:[#allocation2] sm:$0xf] }
  0xe9   : > { %v5366_v62 = vpack.c.bf16 %v1085_v15, %v1085_v15  ;;  %v787_v59 = vsel %vm701_vm14, %v558_v60, %v744_v7  ;;  %v561_v2 = vadd.f32 %v5609_v9, %v6436_v47  ;;  %v6474_v12 = vld [vmem:[#allocation2 + $0x8] sm:$0xff]   ;;  %v2073_v51 = vld [vmem:[#allocation2] sm:$0xe] }
  0xea   : > { %v5364_v14 = vpack.c.bf16 %v1083_v13, %v1083_v13  ;;  %v1088_v5 = vmul.f32 %v6372_v19, %v787_v59  ;;  %vm699_vm0 = vcmp.gt.f32.partialorder %v550_v1, 0.0  ;;  %v742_v6 = vmul.f32 0.1, %v550_v1  ;;  %v552_v50 = vpop.f32.mrf.mxu0 }
  0xeb   : > { %1302 = vst.msk [vmem:[#allocation2 + $0x1c] sm:$0xf] %vm1294_vm4, %v5366_v62  ;;  %vm702_vm3 = vcmp.gt.f32.partialorder %v561_v2, 0.0  ;;  %v745_v8 = vmul.f32 0.1, %v561_v2  ;;  %v553_v52 = vadd.f32 %v6436_v47, %v552_v50  ;;  %v2081_v11 = vrot.slane %v6474_v12, 1 }
  0xec   : > { %v1340_v53 = vld [vmem:[#allocation2 + $0x4] sm:$0xf]  ;;  %1300 = vst.msk [vmem:[#allocation2 + $0x14] sm:$0xf] %vm1294_vm4, %v5364_v14  ;;  %v5369_v44 = vpack.c.bf16 %v1088_v5, %v1088_v5  ;;  %v785_v54 = vsel %vm699_vm0, %v550_v1, %v742_v6  ;;  %v5612_v56 = vpop.f32.mrf.mxu0 }
  0xed   : > { %v6485_v58 = vcombine.low %v1339_v16, %v1340_v53  ;;  %v5181_v19 = vcombine.low %v2073_v51, %v1340_v53  ;;  %v1086_v10 = vmul.f32 %v6368_v17, %v785_v54  ;;  %v788_v60 = vsel %vm702_vm3, %v561_v2, %v745_v8 }
  0xee   : > { %vm700_vm6 = vcmp.gt.f32.partialorder %v553_v52, 0.0  ;;  %v743_v55 = vmul.f32 0.1, %v553_v52  ;;  %1305 = vst.msk [vmem:[#allocation2 + $0x28] sm:$0xf] %vm1294_vm4, %v5369_v44  ;;  %v1089_v61 = vmul.f32 %v6374_v20, %v788_v60  ;;  %v574_v63 = vadd.f32 %v5612_v56, %v6436_v47  ;;  %v565_v15 = vpop.f32.mrf.mxu0 }
  0xef   : > { %v2080_v3 = vrot.slane %v5181_v19, 1  ;;  %v1474_v7 = vshrl.u32 %v6485_v58, 16  ;;  %v5367_v13 = vpack.c.bf16 %v1086_v10, %v1086_v10  ;;  %v566_v9 = vadd.f32 %v6436_v47, %v565_v15 }
  0xf0   : > { %v786_v1 = vsel %vm700_vm6, %v553_v52, %v743_v55  ;;  %v1476_v62 = vshll.u32 %v6485_v58, 16  ;;  %v5370_v17 = vpack.c.bf16 %v1089_v61, %v1089_v61  ;;  %vm705_vm7 = vcmp.gt.f32.partialorder %v574_v63, 0.0  ;;  %v5613_v16 = vpop.f32.mrf.mxu0 }
  0xf1   : > { %v1087_v59 = vmul.f32 %v6370_v18, %v786_v1  ;;  %v748_v2 = vmul.f32 0.1, %v574_v63  ;;  %1303 = vst.msk [vmem:[#allocation2 + $0x20] sm:$0xf] %vm1294_vm4, %v5367_v13  ;;  %vm703_vm8 = vcmp.gt.f32.partialorder %v566_v9, 0.0  ;;  %v577_v14 = vadd.f32 %v5613_v16, %v6436_v47 }
  0xf2   : > { %v746_v20 = vmul.f32 0.1, %v566_v9  ;;  %v2082_v5 = vsel %vm2079_vm13, %v2080_v3, %v2081_v11  ;;  %1306 = vst.msk [vmem:[#allocation2 + $0x2c] sm:$0xf] %vm1294_vm4, %v5370_v17  ;;  %v568_v18 = vpop.f32.mrf.mxu0  ;;  %v1478_v51 = vrot.slane %v1476_v62, 1  ;;  %v1481_v8 = vshll.u32 %v6474_v12, 16 }
  0xf3   : > { %v5368_v6 = vpack.c.bf16 %v1087_v59, %v1087_v59  ;;  %v791_v50 = vsel %vm705_vm7, %v574_v63, %v748_v2  ;;  %5720 = vmatprep.mubr.msk.bf16.mxu0 %vm1621_vm15, %v2082_v5  ;;  %vm706_vm9 = vcmp.gt.f32.partialorder %v577_v14, 0.0  ;;  %v749_v44 = vmul.f32 0.1, %v577_v14  ;;  %v6507_v55 = vld [vmem:[#allocation2 + $0x10] sm:$0xff]   ;;  %v6511_v3 = vld [vmem:[#allocation2 + $0x18] sm:$0xff]  }
  0xf4   : > { %v1092_v52 = vmul.f32 %v6380_v23, %v791_v50  ;;  %v789_v53 = vsel %vm703_vm8, %v566_v9, %v746_v20  ;;  %v569_v56 = vadd.f32 %v6436_v47, %v568_v18  ;;  %v5616_v19 = vpop.f32.mrf.mxu0  ;;  %v1479_v10 = vor.u32 %v1478_v51, %v1474_v7 }
  0xf5   : > { %1304 = vst.msk [vmem:[#allocation2 + $0x24] sm:$0xf] %vm1294_vm4, %v5368_v6  ;;  %v1090_v54 = vmul.f32 %v6376_v21, %v789_v53  ;;  %v1483_v60 = vrot.slane %v1481_v8, 1  ;;  %v792_v63 = vsel %vm706_vm9, %v577_v14, %v749_v44  ;;  %v590_v15 = vadd.f32 %v5616_v19, %v6436_v47 }
  0xf6   : > { %v5373_v61 = vpack.c.bf16 %v1092_v52, %v1092_v52  ;;  %v1485_v23 = vshrl.u32 %v6474_v12, 16  ;;  %v1093_v1 = vmul.f32 %v6382_v24, %v792_v63  ;;  %vm704_vm10 = vcmp.gt.f32.partialorder %v569_v56, 0.0  ;;  %v581_v9 = vpop.f32.mrf.mxu0 }
  0xf7   : > { %v5371_v13 = vpack.c.bf16 %v1090_v54, %v1090_v54  ;;  %v747_v21 = vmul.f32 0.1, %v569_v56  ;;  %vm709_vm11 = vcmp.gt.f32.partialorder %v590_v15, 0.0  ;;  %v752_v7 = vmul.f32 0.1, %v590_v15 }
  0xf8   : > { %1309 = vst.msk [vmem:[#allocation2 + $0x38] sm:$0xf] %vm1294_vm4, %v5373_v61  ;;  %v1484_v62 = vsel %vm1472_vm5, %v1479_v10, %v1483_v60  ;;  %v1487_v17 = vor.u32 %v1485_v23, %v1483_v60  ;;  %v5374_v59 = vpack.c.bf16 %v1093_v1, %v1093_v1  ;;  %v582_v16 = vadd.f32 %v6436_v47, %v581_v9  ;;  %v5617_v20 = vpop.f32.mrf.mxu0 }
  0xf9   : > { %1307 = vst.msk [vmem:[#allocation2 + $0x30] sm:$0xf] %vm1294_vm4, %v5371_v13  ;;  %v790_v2 = vsel %vm704_vm10, %v569_v56, %v747_v21  ;;  %5644 = vmatprep.mubr.msk.bf16.mxu1 %vm1621_vm15, %v1484_v62  ;;  %v2083_v24 = vrot.slane %v6507_v55, 1  ;;  %v795_v5 = vsel %vm709_vm11, %v590_v15, %v752_v7  ;;  %v593_v6 = vadd.f32 %v5617_v20, %v6436_v47  ;;  %v6551_v62 = vld [vmem:[#allocation2 + $0x28] sm:$0xff]  }
  0xfa   : > { %v1091_v14 = vmul.f32 %v6378_v22, %v790_v2  ;;  %v2085_v50 = vrot.slane %v6511_v3, 1  ;;  %1310 = vst.msk [vmem:[#allocation2 + $0x3c] sm:$0xf] %vm1294_vm4, %v5374_v59  ;;  %v1096_v18 = vmul.f32 %v6388_v27, %v795_v5  ;;  %vm707_vm12 = vcmp.gt.f32.partialorder %v582_v16, 0.0  ;;  %v584_v52 = vpop.f32.mrf.mxu0 }
  0xfb   : > { %v750_v51 = vmul.f32 0.1, %v582_v16  ;;  %v2084_v8 = vsel %vm2079_vm13, %v2081_v11, %v2083_v24  ;;  %vm710_vm14 = vcmp.gt.f32.partialorder %v593_v6, 0.0  ;;  %v753_v44 = vmul.f32 0.1, %v593_v6 }
  0xfc   : > { %v5372_v53 = vpack.c.bf16 %v1091_v14, %v1091_v14  ;;  %5721 = vmatmul.mubr.msk.bf16.vlgmr.msra.gmra.mxu0 %vm1621_vm15, %v2084_v8  ;;  %v585_v22 = vadd.f32 %v6436_v47, %v584_v52  ;;  %v5377_v54 = vpack.c.bf16 %v1096_v18, %v1096_v18  ;;  %v2086_v27 = vsel %vm2079_vm13, %v2083_v24, %v2085_v50  ;;  %v5620_v10 = vpop.f32.mrf.mxu0  ;;  %v6538_v61 = vld [vmem:[#allocation2 + $0x20] sm:$0xff]  }
  0xfd   : > { %v793_v56 = vsel %vm707_vm12, %v582_v16, %v750_v51  ;;  %v1489_v19 = vshll.u32 %v6507_v55, 16  ;;  %5795 = vmatpush3.bf16.msra.mxu0 %v6478_v4  ;;  %v796_v11 = vsel %vm710_vm14, %v593_v6, %v753_v44  ;;  %5724 = vmatprep.mubr.msk.bf16.mxu0 %vm1621_vm15, %v2086_v27  ;;  %v606_v23 = vadd.f32 %v5620_v10, %v6436_v47 }
  0xfe   : > { %1308 = vst.msk [vmem:[#allocation2 + $0x34] sm:$0xf] %vm1294_vm4, %v5372_v53  ;;  %v1094_v12 = vmul.f32 %v6384_v25, %v793_v56  ;;  %vm708_vm0 = vcmp.gt.f32.partialorder %v585_v22, 0.0  ;;  %v751_v60 = vmul.f32 0.1, %v585_v22  ;;  %v1097_v63 = vmul.f32 %v6390_v28, %v796_v11  ;;  %v597_v13 = vpop.f32.mrf.mxu0 }
  0xff   : > { %1313 = vst.msk [vmem:[#allocation2 + $0x48] sm:$0xf] %vm1294_vm4, %v5377_v54  ;;  %v1491_v15 = vrot.slane %v1489_v19, 1  ;;  %v1493_v4 = vshrl.u32 %v6507_v55, 16  ;;  %v6547_v25 = vld [vmem:[%s8509_s4 + $0x6] sm:$0x3]  ;;  %v598_v7 = vadd.f32 %v6436_v47, %v597_v13 }
 0x100   : > { %v5375_v1 = vpack.c.bf16 %v1094_v12, %v1094_v12  ;;  %v794_v21 = vsel %vm708_vm0, %v585_v22, %v751_v60  ;;  %v1497_v9 = vshll.u32 %v6511_v3, 16  ;;  %v5378_v28 = vpack.c.bf16 %v1097_v63, %v1097_v63  ;;  %v5621_v55 = vpop.f32.mrf.mxu0 }
 0x101   : > { %v1095_v59 = vmul.f32 %v6386_v26, %v794_v21  ;;  %v1492_v2 = vsel %vm1472_vm5, %v1487_v17, %v1491_v15  ;;  %vm713_vm3 = vcmp.gt.f32.partialorder %v606_v23, 0.0  ;;  %v756_v16 = vmul.f32 0.1, %v606_v23 }
 0x102   : > { %1311 = vst.msk [vmem:[#allocation2 + $0x40] sm:$0xf] %vm1294_vm4, %v5375_v1  ;;  %5645 = vmatmul.mubr.msk.bf16.vlgmr.msra.gmra.mxu1 %vm1621_vm15, %v1492_v2  ;;  %v1495_v20 = vor.u32 %v1493_v4, %v1491_v15  ;;  %v1499_v24 = vrot.slane %v1497_v9, 1  ;;  %vm711_vm6 = vcmp.gt.f32.partialorder %v598_v7, 0.0  ;;  %1314 = vst.msk [vmem:[#allocation2 + $0x4c] sm:$0xf] %vm1294_vm4, %v5378_v28  ;;  %v609_v26 = vadd.f32 %v5621_v55, %v6436_v47  ;;  %v600_v6 = vpop.f32.mrf.mxu0 }
 0x103   : > { %v5376_v14 = vpack.c.bf16 %v1095_v59, %v1095_v59  ;;  %5681 = vmatpush3.bf16.msra.mxu1 %v6471_v57  ;;  %v754_v5 = vmul.f32 0.1, %v598_v7  ;;  %v2087_v17 = vrot.slane %v6538_v61, 1  ;;  %v799_v18 = vsel %vm713_vm3, %v606_v23, %v756_v16  ;;  %v6592_v55 = vld [vmem:[#allocation2 + $0x38] sm:$0xff]  }
 0x104   : > { %v1500_v51 = vsel %vm1472_vm5, %v1495_v20, %v1499_v24  ;;  %v601_v8 = vadd.f32 %v6436_v47, %v600_v6  ;;  %v2089_v52 = vrot.slane %v6551_v62, 1  ;;  %5991 = vmatprep.subr.msk.bf16.mxu1 %vm1676_vm2, %v6547_v25  ;;  %v1100_v57 = vmul.f32 %v6396_v31, %v799_v18  ;;  %v5624_v22 = vpop.f32.mrf.mxu0 }
 0x105   : > { %1312 = vst.msk [vmem:[#allocation2 + $0x44] sm:$0xf] %vm1294_vm4, %v5376_v14  ;;  %5648 = vmatprep.mubr.msk.bf16.mxu1 %vm1621_vm15, %v1500_v51  ;;  %v797_v53 = vsel %vm711_vm6, %v598_v7, %v754_v5  ;;  %vm714_vm7 = vcmp.gt.f32.partialorder %v609_v26, 0.0  ;;  %v757_v44 = vmul.f32 0.1, %v609_v26  ;;  %v2088_v56 = vsel %vm2079_vm13, %v2085_v50, %v2087_v17  ;;  %v6589_v7 = vld [vmem:[#allocation2 + $0x30] sm:$0xff]  }
 0x106   : > { %v1098_v54 = vmul.f32 %v6392_v29, %v797_v53  ;;  %vm712_vm8 = vcmp.gt.f32.partialorder %v601_v8, 0.0  ;;  %v755_v27 = vmul.f32 0.1, %v601_v8  ;;  %v5381_v19 = vpack.c.bf16 %v1100_v57, %v1100_v57  ;;  %5725 = vmatmul.mubr.msk.bf16.gmra.mxu0 %vm1621_vm15, %v2088_v56  ;;  %v613_v11 = vpop.f32.mrf.mxu0 }
 0x107   : > { %v800_v10 = vsel %vm714_vm7, %v609_v26, %v757_v44  ;;  %v2090_v31 = vsel %vm2079_vm13, %v2087_v17, %v2089_v52  ;;  %v1501_v12 = vshrl.u32 %v6511_v3, 16  ;;  %v1505_v50 = vshll.u32 %v6538_v61, 16 }
 0x108   : > { %v5379_v60 = vpack.c.bf16 %v1098_v54, %v1098_v54  ;;  %v1101_v29 = vmul.f32 %v6398_v32, %v800_v10  ;;  %v798_v63 = vsel %vm712_vm8, %v601_v8, %v755_v27  ;;  %5728 = vmatprep.mubr.msk.bf16.mxu0 %vm1621_vm15, %v2090_v31  ;;  %1317 = vst.msk [vmem:[#allocation2 + $0x58] sm:$0xf] %vm1294_vm4, %v5381_v19  ;;  %v1509_v13 = vshrl.u32 %v6538_v61, 16  ;;  %v5625_v1 = vpop.f32.mrf.mxu0 }
 0x109   : > { %v1099_v15 = vmul.f32 %v6394_v30, %v798_v63  ;;  %v1503_v23 = vor.u32 %v1501_v12, %v1499_v24  ;;  %v622_v4 = vadd.f32 %v5624_v22, %v6436_v47  ;;  %v1507_v21 = vrot.slane %v1505_v50, 1 }
 0x10a   : > { %1315 = vst.msk [vmem:[#allocation2 + $0x50] sm:$0xf] %vm1294_vm4, %v5379_v60  ;;  %v5382_v3 = vpack.c.bf16 %v1101_v29, %v1101_v29  ;;  %v1513_v32 = vshll.u32 %v6551_v62, 16  ;;  %v614_v9 = vadd.f32 %v6436_v47, %v613_v11  ;;  %v625_v30 = vadd.f32 %v5625_v1, %v6436_v47  ;;  %v616_v2 = vpop.f32.mrf.mxu0 }
 0x10b   : > { %v5380_v28 = vpack.c.bf16 %v1099_v15, %v1099_v15  ;;  %vm717_vm9 = vcmp.gt.f32.partialorder %v622_v4, 0.0  ;;  %v760_v59 = vmul.f32 0.1, %v622_v4  ;;  %v1508_v61 = vsel %vm1472_vm5, %v1503_v23, %v1507_v21 }
 0x10c   : > { %1318 = vst.msk [vmem:[#allocation2 + $0x5c] sm:$0xf] %vm1294_vm4, %v5382_v3  ;;  %v1511_v16 = vor.u32 %v1509_v13, %v1507_v21  ;;  %v1515_v20 = vrot.slane %v1513_v32, 1  ;;  %vm715_vm10 = vcmp.gt.f32.partialorder %v614_v9, 0.0  ;;  %5649 = vmatmul.mubr.msk.bf16.gmra.mxu1 %vm1621_vm15, %v1508_v61  ;;  %v758_v14 = vmul.f32 0.1, %v614_v9  ;;  %v5628_v26 = vpop.f32.mrf.mxu0 }
 0x10d   : > { %1316 = vst.msk [vmem:[#allocation2 + $0x54] sm:$0xf] %vm1294_vm4, %v5380_v28  ;;  %v803_v24 = vsel %vm717_vm9, %v622_v4, %v760_v59  ;;  %vm718_vm11 = vcmp.gt.f32.partialorder %v625_v30, 0.0  ;;  %v761_v5 = vmul.f32 0.1, %v625_v30  ;;  %v2091_v18 = vrot.slane %v6589_v7, 1 }
 0x10e   : > { %v1104_v17 = vmul.f32 %v6404_v35, %v803_v24  ;;  %v1516_v6 = vsel %vm1472_vm5, %v1511_v16, %v1515_v20  ;;  %v617_v51 = vadd.f32 %v6436_v47, %v616_v2  ;;  %v801_v8 = vsel %vm715_vm10, %v614_v9, %v758_v14  ;;  %v629_v22 = vpop.f32.mrf.mxu0  ;;  %v6621_v50 = vld [vmem:[#allocation2 + $0x40] sm:$0xff]   ;;  %v6627_v32 = vld [vmem:[#allocation2 + $0x48] sm:$0xff]  }
 0x10f   : > { %5652 = vmatprep.mubr.msk.bf16.mxu1 %vm1621_vm15, %v1516_v6  ;;  %v804_v57 = vsel %vm718_vm11, %v625_v30, %v761_v5  ;;  %v2093_v53 = vrot.slane %v6592_v55, 1  ;;  %v1517_v44 = vshrl.u32 %v6551_v62, 16  ;;  %v1102_v56 = vmul.f32 %v6400_v33, %v801_v8 }
 0x110   : > { %v5385_v54 = vpack.c.bf16 %v1104_v17, %v1104_v17  ;;  %v1105_v35 = vmul.f32 %v6406_v36, %v804_v57  ;;  %v2092_v27 = vsel %vm2079_vm13, %v2089_v52, %v2091_v18  ;;  %vm716_vm12 = vcmp.gt.f32.partialorder %v617_v51, 0.0  ;;  %v5629_v12 = vpop.f32.mrf.mxu0 }
 0x111   : > { %5729 = vmatmul.mubr.msk.bf16.gmra.mxu0 %vm1621_vm15, %v2092_v27  ;;  %v759_v19 = vmul.f32 0.1, %v617_v51  ;;  %v2094_v10 = vsel %vm2079_vm13, %v2091_v18, %v2093_v53  ;;  %v1519_v31 = vor.u32 %v1517_v44, %v1515_v20  ;;  %v5383_v11 = vpack.c.bf16 %v1102_v56, %v1102_v56 }
 0x112   : > { %1321 = vst.msk [vmem:[#allocation2 + $0x68] sm:$0xf] %vm1294_vm4, %v5385_v54  ;;  %v5386_v33 = vpack.c.bf16 %v1105_v35, %v1105_v35  ;;  %5732 = vmatprep.mubr.msk.bf16.mxu0 %vm1621_vm15, %v2094_v10  ;;  %v1521_v36 = vshll.u32 %v6589_v7, 16  ;;  %v638_v62 = vadd.f32 %v5628_v26, %v6436_v47  ;;  %v1525_v60 = vshrl.u32 %v6589_v7, 16  ;;  %v632_v15 = vpop.f32.mrf.mxu0 }
 0x113   : > { %v802_v52 = vsel %vm716_vm12, %v617_v51, %v759_v19  ;;  %v1529_v29 = vshll.u32 %v6592_v55, 16  ;;  %v630_v63 = vadd.f32 %v6436_v47, %v629_v22  ;;  %1319 = vst.msk [vmem:[#allocation2 + $0x60] sm:$0xf] %vm1294_vm4, %v5383_v11  ;;  %v641_v21 = vadd.f32 %v5629_v12, %v6436_v47  ;;  %v6660_v10 = vld [vmem:[#allocation2 + $0x58] sm:$0xff]  }
 0x114   : > { %1322 = vst.msk [vmem:[#allocation2 + $0x6c] sm:$0xf] %vm1294_vm4, %v5386_v33  ;;  %v1103_v23 = vmul.f32 %v6402_v34, %v802_v52  ;;  %v1523_v4 = vrot.slane %v1521_v36, 1  ;;  %vm721_vm14 = vcmp.gt.f32.partialorder %v638_v62, 0.0  ;;  %v764_v13 = vmul.f32 0.1, %v638_v62  ;;  %v5632_v9 = vpop.f32.mrf.mxu0 }
 0x115   : > { %v1531_v1 = vrot.slane %v1529_v29, 1  ;;  %vm719_vm0 = vcmp.gt.f32.partialorder %v630_v63, 0.0  ;;  %v762_v3 = vmul.f32 0.1, %v630_v63  ;;  %v6633_v34 = vld [vmem:[%s8509_s4 + $0xc] sm:$0x3]  ;;  %v633_v17 = vadd.f32 %v6436_v47, %v632_v15 }
 0x116   : > { %v5384_v28 = vpack.c.bf16 %v1103_v23, %v1103_v23  ;;  %v1524_v59 = vsel %vm1472_vm5, %v1519_v31, %v1523_v4  ;;  %v807_v30 = vsel %vm721_vm14, %v638_v62, %v764_v13  ;;  %v1527_v2 = vor.u32 %v1525_v60, %v1523_v4  ;;  %v645_v24 = vpop.f32.mrf.mxu0  ;;  %5994 = vmatprep.subr.msk.bf16.mxu0 %vm1676_vm2, %v6633_v34  ;;  %v6664_v36 = vld [vmem:[#allocation2 + $0x50] sm:$0xff]  }
 0x117   : > { %5653 = vmatmul.mubr.msk.bf16.gmra.mxu1 %vm1621_vm15, %v1524_v59  ;;  %v1108_v61 = vmul.f32 %v6412_v39, %v807_v30  ;;  %v805_v16 = vsel %vm719_vm0, %v630_v63, %v762_v3  ;;  %vm722_vm3 = vcmp.gt.f32.partialorder %v641_v21, 0.0  ;;  %v765_v20 = vmul.f32 0.1, %v641_v21 }
 0x118   : > { %1320 = vst.msk [vmem:[#allocation2 + $0x64] sm:$0xf] %vm1294_vm4, %v5384_v28  ;;  %v1532_v14 = vsel %vm1472_vm5, %v1527_v2, %v1531_v1  ;;  %v1106_v5 = vmul.f32 %v6408_v37, %v805_v16  ;;  %v2095_v26 = vrot.slane %v6621_v50, 1  ;;  %v2097_v18 = vrot.slane %v6627_v32, 1  ;;  %v5633_v8 = vpop.f32.mrf.mxu0 }
 0x119   : > { %v5389_v6 = vpack.c.bf16 %v1108_v61, %v1108_v61  ;;  %5656 = vmatprep.mubr.msk.bf16.mxu1 %vm1621_vm15, %v1532_v14  ;;  %v808_v39 = vsel %vm722_vm3, %v641_v21, %v765_v20  ;;  %v1533_v51 = vshrl.u32 %v6592_v55, 16  ;;  %vm720_vm6 = vcmp.gt.f32.partialorder %v633_v17, 0.0 }
 0x11a   : > { %v5387_v57 = vpack.c.bf16 %v1106_v5, %v1106_v5  ;;  %v1109_v44 = vmul.f32 %v6414_v40, %v808_v39  ;;  %v2096_v37 = vsel %vm2079_vm13, %v2093_v53, %v2095_v26  ;;  %v763_v22 = vmul.f32 0.1, %v633_v17  ;;  %v648_v27 = vpop.f32.mrf.mxu0 }
 0x11b   : > { %1325 = vst.msk [vmem:[#allocation2 + $0x78] sm:$0xf] %vm1294_vm4, %v5389_v6  ;;  %5733 = vmatmul.mubr.msk.bf16.gmra.mxu0 %vm1621_vm15, %v2096_v37  ;;  %v2098_v54 = vsel %vm2079_vm13, %v2095_v26, %v2097_v18  ;;  %v1535_v56 = vor.u32 %v1533_v51, %v1531_v1  ;;  %v1537_v35 = vshll.u32 %v6621_v50, 16  ;;  %v654_v40 = vadd.f32 %v5632_v9, %v6436_v47  ;;  %v6094_v6 = vld [vmem:[%s8508_s3] ss:$0 sm:$0xff] }
 0x11c   : > { %1323 = vst.msk [vmem:[#allocation2 + $0x70] sm:$0xf] %vm1294_vm4, %v5387_v57  ;;  %v5390_v19 = vpack.c.bf16 %v1109_v44, %v1109_v44  ;;  %5736 = vmatprep.mubr.msk.bf16.mxu0 %vm1621_vm15, %v2098_v54  ;;  %v1541_v55 = vshrl.u32 %v6621_v50, 16  ;;  %v1545_v53 = vshll.u32 %v6627_v32, 16  ;;  %v806_v31 = vsel %vm720_vm6, %v633_v17, %v763_v22  ;;  %v5636_v62 = vpop.f32.mrf.mxu0 }
 0x11d   : > { %v1539_v12 = vrot.slane %v1537_v35, 1  ;;  %v646_v11 = vadd.f32 %v6436_v47, %v645_v24  ;;  %v657_v33 = vadd.f32 %v5633_v8, %v6436_v47  ;;  %v1107_v52 = vmul.f32 %v6410_v38, %v806_v31 }
 0x11e   : > { %1326 = vst.msk [vmem:[#allocation2 + $0x7c] sm:$0xf] %vm1294_vm4, %v5390_v19  ;;  %vm725_vm7 = vcmp.gt.f32.partialorder %v654_v40, 0.0  ;;  %v768_v60 = vmul.f32 0.1, %v654_v40  ;;  %v1547_v29 = vrot.slane %v1545_v53, 1  ;;  %v661_v3 = vpop.f32.mrf.mxu0  ;;  %v649_v2 = vadd.f32 %v6436_v47, %v648_v27 }
 0x11f   : > { %v1540_v63 = vsel %vm1472_vm5, %v1535_v56, %v1539_v12  ;;  %v1543_v15 = vor.u32 %v1541_v55, %v1539_v12  ;;  %vm723_vm8 = vcmp.gt.f32.partialorder %v646_v11, 0.0  ;;  %v766_v23 = vmul.f32 0.1, %v646_v11  ;;  %v6692_v44 = vld [vmem:[#allocation2 + $0x60] sm:$0xff]  }
 0x120   : > { %v5388_v4 = vpack.c.bf16 %v1107_v52, %v1107_v52  ;;  %5657 = vmatmul.mubr.msk.bf16.gmra.mxu1 %vm1621_vm15, %v1540_v63  ;;  %v811_v13 = vsel %vm725_vm7, %v654_v40, %v768_v60  ;;  %vm726_vm9 = vcmp.gt.f32.partialorder %v657_v33, 0.0  ;;  %v769_v1 = vmul.f32 0.1, %v657_v33  ;;  %v6696_v40 = vld [vmem:[#allocation2 + $0x68] sm:$0xff]  }
 0x121   : > { %v1112_v21 = vmul.f32 %v6420_v43, %v811_v13  ;;  %v1548_v9 = vsel %vm1472_vm5, %v1543_v15, %v1547_v29  ;;  %v809_v38 = vsel %vm723_vm8, %v646_v11, %v766_v23  ;;  %v2099_v28 = vrot.slane %v6664_v36, 1 }
 0x122   : > { %1324 = vst.msk [vmem:[#allocation2 + $0x74] sm:$0xf] %vm1294_vm4, %v5388_v4  ;;  %5660 = vmatprep.mubr.msk.bf16.mxu1 %vm1621_vm15, %v1548_v9  ;;  %v1110_v59 = vmul.f32 %v6416_v41, %v809_v38  ;;  %v812_v30 = vsel %vm726_vm9, %v657_v33, %v769_v1  ;;  %v2101_v61 = vrot.slane %v6660_v10, 1  ;;  %v1549_v24 = vshrl.u32 %v6627_v32, 16  ;;  %v5637_v41 = vpop.f32.mrf.mxu0 }
 0x123   : > { %v5393_v16 = vpack.c.bf16 %v1112_v21, %v1112_v21  ;;  %v1113_v20 = vmul.f32 %v6429_v45, %v812_v30  ;;  %v2100_v43 = vsel %vm2079_vm13, %v2097_v18, %v2099_v28  ;;  %vm724_vm10 = vcmp.gt.f32.partialorder %v649_v2, 0.0 }
 0x124   : > { %v5391_v14 = vpack.c.bf16 %v1110_v59, %v1110_v59  ;;  %5737 = vmatmul.mubr.msk.bf16.gmra.mxu0 %vm1621_vm15, %v2100_v43  ;;  %v767_v5 = vmul.f32 0.1, %v649_v2  ;;  %v2102_v26 = vsel %vm2079_vm13, %v2099_v28, %v2101_v61  ;;  %v1551_v17 = vor.u32 %v1549_v24, %v1547_v29  ;;  %v664_v19 = vpop.f32.mrf.mxu0 }
 0x125   : > { %1329 = vst.msk [vmem:[#allocation2 + $0x88] sm:$0xf] %vm1294_vm4, %v5393_v16  ;;  %v5394_v47 = vpack.c.bf16 %v1113_v20, %v1113_v20  ;;  %5740 = vmatprep.mubr.msk.bf16.mxu0 %vm1621_vm15, %v2102_v26  ;;  %v1553_v45 = vshll.u32 %v6664_v36, 16  ;;  %v670_v39 = vadd.f32 %v6094_v6, %v5636_v62  ;;  %v1557_v51 = vshrl.u32 %v6664_v36, 16 }
 0x126   : > { %1327 = vst.msk [vmem:[#allocation2 + $0x80] sm:$0xf] %vm1294_vm4, %v5391_v14  ;;  %v810_v18 = vsel %vm724_vm10, %v649_v2, %v767_v5  ;;  %v1561_v8 = vshll.u32 %v6660_v10, 16  ;;  %v662_v57 = vadd.f32 %v6094_v6, %v661_v3  ;;  %v673_v27 = vadd.f32 %v6094_v6, %v5637_v41  ;;  %v6711_v3 = vld [vmem:[#allocation2 + $0x78] sm:$0xff]  }
 0x127   : > { %1330 = vst.msk [vmem:[#allocation2 + $0x8c] sm:$0xf] %vm1294_vm4, %v5394_v47  ;;  %v1111_v37 = vmul.f32 %v6418_v42, %v810_v18  ;;  %v1555_v22 = vrot.slane %v1553_v45, 1  ;;  %vm729_vm11 = vcmp.gt.f32.partialorder %v670_v39, 0.0  ;;  %v772_v54 = vmul.f32 0.1, %v670_v39 }
 0x128   : > { %v1563_v56 = vrot.slane %v1561_v8, 1  ;;  %vm727_vm12 = vcmp.gt.f32.partialorder %v662_v57, 0.0  ;;  %v770_v35 = vmul.f32 0.1, %v662_v57  ;;  %vm730_vm14 = vcmp.gt.f32.partialorder %v673_v27, 0.0 }
 0x129   : > { %v5392_v55 = vpack.c.bf16 %v1111_v37, %v1111_v37  ;;  %v1556_v53 = vsel %vm1472_vm5, %v1551_v17, %v1555_v22  ;;  %v815_v31 = vsel %vm729_vm11, %v670_v39, %v772_v54  ;;  %v1559_v12 = vor.u32 %v1557_v51, %v1555_v22  ;;  %v6705_v63 = vld [vmem:[#allocation2 + $0x70] sm:$0xff]   ;;  %v2387_v8 = vld [vmem:[#allocation2 + $0x8] sm:$0xe] }
 0x12a   : > { %5661 = vmatmul.mubr.msk.bf16.gmra.mxu1 %vm1621_vm15, %v1556_v53  ;;  %v1116_v11 = vmul.f32 %v6438_v48, %v815_v31  ;;  %v813_v42 = vsel %vm727_vm12, %v662_v57, %v770_v35  ;;  %v773_v33 = vmul.f32 0.1, %v673_v27  ;;  %v2103_v60 = vrot.slane %v6692_v44, 1  ;;  %v6737_v57 = vld [vmem:[#allocation2 + $0xc] sm:$0xf]  ;;  %v6742_v54 = vld [vmem:[#allocation2 + $0x10] sm:$0xff]  }
 0x12b   : > { %1328 = vst.msk [vmem:[#allocation2 + $0x84] sm:$0xf] %vm1294_vm4, %v5392_v55  ;;  %v1564_v62 = vsel %vm1472_vm5, %v1559_v12, %v1563_v56  ;;  %v1114_v52 = vmul.f32 %v6431_v46, %v813_v42  ;;  %v665_v29 = vadd.f32 %v6094_v6, %v664_v19  ;;  %v2105_v48 = vrot.slane %v6696_v40, 1 }
 0x12c   : > { %v5397_v15 = vpack.c.bf16 %v1116_v11, %v1116_v11  ;;  %5664 = vmatprep.mubr.msk.bf16.mxu1 %vm1621_vm15, %v1564_v62  ;;  %v816_v23 = vsel %vm730_vm14, %v673_v27, %v773_v33  ;;  %v2104_v1 = vsel %vm2079_vm13, %v2101_v61, %v2103_v60  ;;  %v1565_v9 = vshrl.u32 %v6660_v10, 16 }
 0x12d   : > { %v5395_v4 = vpack.c.bf16 %v1114_v52, %v1114_v52  ;;  %v1117_v13 = vmul.f32 %v6446_v0, %v816_v23  ;;  %vm728_vm0 = vcmp.gt.f32.partialorder %v665_v29, 0.0  ;;  %5741 = vmatmul.mubr.msk.bf16.gmra.mxu0 %vm1621_vm15, %v2104_v1  ;;  %v771_v46 = vmul.f32 0.1, %v665_v29  ;;  %v6763_v23 = vld [vmem:[#allocation2 + $0x18] sm:$0xff]  }
 0x12e   : > { %1333 = vst.msk [vmem:[#allocation2 + $0x98] sm:$0xf] %vm1294_vm4, %v5397_v15  ;;  %v2106_v21 = vsel %vm2079_vm13, %v2103_v60, %v2105_v48  ;;  %v1569_v38 = vshll.u32 %v6692_v44, 16  ;;  %v1577_v0 = vshll.u32 %v6696_v40, 16  ;;  %v2107_v59 = vrot.slane %v6705_v63, 1  ;;  %v6745_v35 = vld [vmem:[#allocation2 + $0x88] sm:$0xff]  }
 0x12f   : > { %1331 = vst.msk [vmem:[#allocation2 + $0x90] sm:$0xf] %vm1294_vm4, %v5395_v4  ;;  %v5398_v28 = vpack.c.bf16 %v1117_v13, %v1117_v13  ;;  %5744 = vmatprep.mubr.msk.bf16.mxu0 %vm1621_vm15, %v2106_v21  ;;  %v814_v30 = vsel %vm728_vm0, %v665_v29, %v771_v46  ;;  %v1567_v2 = vor.u32 %v1565_v9, %v1563_v56  ;;  %v1573_v16 = vshrl.u32 %v6692_v44, 16  ;;  %v6768_v21 = vld [vmem:[#allocation2 + $0x20] sm:$0xff]  }
 0x130   : > { %v1571_v61 = vrot.slane %v1569_v38, 1  ;;  %v1115_v20 = vmul.f32 %v6440_v49, %v814_v30  ;;  %v2109_v43 = vrot.slane %v6711_v3, 1  ;;  %v1585_v24 = vshll.u32 %v6705_v63, 16 }
 0x131   : > { %1334 = vst.msk [vmem:[#allocation2 + $0x9c] sm:$0xf] %vm1294_vm4, %v5398_v28  ;;  %v1579_v26 = vrot.slane %v1577_v0, 1  ;;  %v2108_v41 = vsel %vm2079_vm13, %v2105_v48, %v2107_v59  ;;  %v1589_v6 = vshrl.u32 %v6705_v63, 16  ;;  %v1593_v49 = vshll.u32 %v6711_v3, 16 }
 0x132   : > { %v1572_v14 = vsel %vm1472_vm5, %v1567_v2, %v1571_v61  ;;  %v1575_v5 = vor.u32 %v1573_v16, %v1571_v61  ;;  %v6729_v47 = vld [vmem:[#allocation2 + $0x80] sm:$0xff]   ;;  %v5396_v17 = vpack.c.bf16 %v1115_v20, %v1115_v20  ;;  %v1587_v45 = vrot.slane %v1585_v24, 1 }
 0x133   : > { %5665 = vmatmul.mubr.msk.bf16.gmra.mxu1 %vm1621_vm15, %v1572_v14  ;;  %v2110_v18 = vsel %vm2079_vm13, %v2107_v59, %v2109_v43  ;;  %v1581_v51 = vshrl.u32 %v6696_v40, 16  ;;  %v1601_v22 = vshll.u32 %v6729_v47, 16  ;;  %v1595_v27 = vrot.slane %v1593_v49, 1 }
 0x134   : > { %v1580_v39 = vsel %vm1472_vm5, %v1575_v5, %v1579_v26  ;;  %1332 = vst.msk [vmem:[#allocation2 + $0x94] sm:$0xf] %vm1294_vm4, %v5396_v17  ;;  %v1591_v37 = vor.u32 %v1589_v6, %v1587_v45  ;;  %v2111_v19 = vrot.slane %v6729_v47, 1  ;;  %v6750_v55 = vcombine.low %v2387_v8, %v6737_v57  ;;  %v6778_v5 = vld [vmem:[#allocation2 + $0x28] sm:$0xff]   ;;  %v6781_v17 = vld [vmem:[#allocation2 + $0x30] sm:$0xff]   ;;  %v6784_v6 = vld [vmem:[#allocation2 + $0x38] sm:$0xff]  }
 0x135   : > { %5668 = vmatprep.mubr.msk.bf16.mxu1 %vm1621_vm15, %v1580_v39  ;;  %5745 = vmatmul.mubr.msk.bf16.gmra.mxu0 %vm1621_vm15, %v2108_v41  ;;  %v1583_v56 = vor.u32 %v1581_v51, %v1579_v26  ;;  %v1603_v12 = vrot.slane %v1601_v22, 1  ;;  %v2113_v11 = vrot.slane %v6745_v35, 1  ;;  %v1597_v42 = vshrl.u32 %v6711_v3, 16 }
 0x136   : > { %5748 = vmatprep.mubr.msk.bf16.mxu0 %vm1621_vm15, %v2110_v18  ;;  %v1596_v31 = vsel %vm1472_vm5, %v1591_v37, %v1595_v27  ;;  %v2842_v33 = vshrl.u32 %v6742_v54, 16  ;;  %v2845_v62 = vshll.u32 %v6742_v54, 16  ;;  %v2112_v52 = vsel %vm2079_vm13, %v2109_v43, %v2111_v19  ;;  %v6051_v4 = vld [vmem:[#allocation2 + $0x90] ss:$0 sps:$4 sm:$0x11]  }
 0x137   : > { %v1588_v53 = vsel %vm1472_vm5, %v1583_v56, %v1587_v45  ;;  %v1605_v60 = vshrl.u32 %v6729_v47, 16  ;;  %v1609_v29 = vshll.u32 %v6745_v35, 16  ;;  %v2834_v15 = vshrl.u32 %v6750_v55, 16 }
 0x138   : > { %v2114_v48 = vsel %vm2079_vm13, %v2111_v19, %v2113_v11  ;;  %v2837_v13 = vshll.u32 %v6750_v55, 16  ;;  %v1599_v1 = vor.u32 %v1597_v42, %v1595_v27  ;;  %v2844_v9 = vrot.slane %v2842_v33, 1  ;;  %v6790_v27 = vld [vmem:[#allocation2 + $0x40] sm:$0xff]   ;;  %v6799_v33 = vld [vmem:[#allocation2 + $0x50] sm:$0xff]  }
 0x139   : > { %v1607_v46 = vor.u32 %v1605_v60, %v1603_v12  ;;  %v2847_v38 = vrot.slane %v2845_v62, 2  ;;  %v1611_v0 = vrot.slane %v1609_v29, 1  ;;  %v2836_v59 = vrot.slane %v2834_v15, 1  ;;  %v6802_v60 = vld [vmem:[#allocation2 + $0x48] sm:$0xff]   ;;  %v6804_v29 = vld [vmem:[#allocation2 + $0x60] sm:$0xff]  }
 0x13a   : > { %v1604_v28 = vsel %vm1472_vm5, %v1599_v1, %v1603_v12  ;;  %v2839_v30 = vrot.slane %v2837_v13, 2  ;;  %v1617_v2 = vshll.u32 %v6051_v4, 16  ;;  %v2851_v61 = vshrl.u32 %v6763_v23, 16  ;;  %v6808_v1 = vld [vmem:[#allocation2 + $0x58] sm:$0xff]  }
 0x13b   : > { %5669 = vmatmul.mubr.msk.bf16.gmra.mxu1 %vm1621_vm15, %v1588_v53  ;;  %v2854_v16 = vshll.u32 %v6763_v23, 16  ;;  %v1612_v20 = vsel %vm1472_vm5, %v1607_v46, %v1611_v0  ;;  %v2115_v43 = vrot.slane %v6051_v4, 1  ;;  %v1613_v24 = vshrl.u32 %v6745_v35, 16 }
 0x13c   : > { %5672 = vmatprep.mubr.msk.bf16.mxu1 %vm1621_vm15, %v1596_v31  ;;  %v2860_v14 = vshrl.u32 %v6768_v21, 16  ;;  %v2848_v26 = vor.u32 %v2847_v38, %v2844_v9  ;;  %v2863_v41 = vshll.u32 %v6768_v21, 16  ;;  %vm2832_vm4 = vsmask.f32 6400 }
 0x13d   : > { %5749 = vmatmul.mubr.msk.bf16.gmra.mxu0 %vm1621_vm15, %v2112_v52  ;;  %v1615_v45 = vor.u32 %v1613_v24, %v1611_v0  ;;  %v2840_v49 = vor.u32 %v2839_v30, %v2836_v59  ;;  %v1619_v39 = vrot.slane %v1617_v2, 1  ;;  %v2853_v18 = vrot.slane %v2851_v61, 1  ;;  %v6814_v61 = vld [vmem:[#allocation2 + $0x68] sm:$0xff]  }
 0x13e   : > { %5752 = vmatprep.mubr.msk.bf16.mxu0 %vm1621_vm15, %v2114_v48  ;;  %v2856_v51 = vrot.slane %v2854_v16, 2  ;;  %v2116_v8 = vsel %vm2079_vm13, %v2113_v11, %v2115_v43  ;;  %v2862_v37 = vrot.slane %v2860_v14, 1  ;;  %v2869_v22 = vshrl.u32 %v6778_v5, 16 }
 0x13f   : > { %v2872_v56 = vshll.u32 %v6778_v5, 16  ;;  %v2849_v19 = vsel %vm2832_vm4, %v2840_v49, %v2848_v26  ;;  %v2865_v53 = vrot.slane %v2863_v41, 2  ;;  %v2878_v31 = vshrl.u32 %v6781_v17, 16 }
 0x140   : > { %v2881_v12 = vshll.u32 %v6781_v17, 16  ;;  %v2887_v11 = vshrl.u32 %v6784_v6, 16  ;;  %v2890_v42 = vshll.u32 %v6784_v6, 16  ;;  %v1620_v62 = vsel %vm1472_vm5, %v1615_v45, %v1619_v39 }
 0x141   : > { %v2857_v52 = vor.u32 %v2856_v51, %v2853_v18  ;;  %v2871_v15 = vrot.slane %v2869_v22, 1  ;;  %v2874_v48 = vrot.slane %v2872_v56, 2  ;;  %v2896_v4 = vshrl.u32 %v6790_v27, 16 }
 0x142   : > { %v2899_v13 = vshll.u32 %v6790_v27, 16  ;;  %v2866_v9 = vor.u32 %v2865_v53, %v2862_v37  ;;  %v2880_v38 = vrot.slane %v2878_v31, 1  ;;  %v2889_v0 = vrot.slane %v2887_v11, 1 }
 0x143   : > { %5673 = vmatmul.mubr.msk.bf16.gmra.mxu1 %vm1621_vm15, %v1604_v28  ;;  %v2858_v46 = vsel %vm2832_vm4, %v2848_v26, %v2857_v52  ;;  %v2883_v28 = vrot.slane %v2881_v12, 2  ;;  %v2892_v59 = vrot.slane %v2890_v42, 2  ;;  %v2914_v30 = vshrl.u32 %v6799_v33, 16  ;;  %v6831_v12 = vld [vmem:[#allocation2 + $0x70] sm:$0xff]  }
 0x144   : > { %5676 = vmatprep.mubr.msk.bf16.mxu1 %vm1621_vm15, %v1612_v20  ;;  %v2917_v2 = vshll.u32 %v6799_v33, 16  ;;  %v2905_v16 = vshrl.u32 %v6802_v60, 16  ;;  %v2908_v20 = vshll.u32 %v6802_v60, 16  ;;  %v2932_v43 = vshrl.u32 %v6804_v29, 16 }
 0x145   : > { %5753 = vmatmul.mubr.msk.bf16.gmra.mxu0 %vm1621_vm15, %v2116_v8  ;;  %v2935_v24 = vshll.u32 %v6804_v29, 16  ;;  %v2898_v14 = vrot.slane %v2896_v4, 1  ;;  %v2901_v26 = vrot.slane %v2899_v13, 2  ;;  %v2923_v41 = vshrl.u32 %v6808_v1, 16  ;;  %v6837_v4 = vld [vmem:[#allocation2 + $0x80] sm:$0xff]  }
 0x146   : > { %5796 = vmatprep.mubr.msk.bf16.mxu0 %vm1621_vm15, %v2849_v19  ;;  %v2926_v45 = vshll.u32 %v6808_v1, 16  ;;  %v2867_v49 = vsel %vm2832_vm4, %v2857_v52, %v2866_v9  ;;  %v2875_v39 = vor.u32 %v2874_v48, %v2871_v15  ;;  %v2884_v18 = vor.u32 %v2883_v28, %v2880_v38  ;;  %v6833_v52 = vld [vmem:[#allocation2 + $0x78] sm:$0xff]   ;;  %v6842_v13 = vld [vmem:[%s8509_s4 + $0xa] sm:$0x3] }
 0x147   : > { %v2916_v51 = vrot.slane %v2914_v30, 1  ;;  %v2919_v8 = vrot.slane %v2917_v2, 2  ;;  %v2941_v37 = vshrl.u32 %v6814_v61, 16  ;;  %v2944_v22 = vshll.u32 %v6814_v61, 16  ;;  %8515 = vst [vmem:[#allocation3_spill] sm:$0xff] %v6842_v13  ;;  %v6096_v30 = vld [vmem:[#allocation2 + $0x10] sm:$0xff]  }
 0x148   : > { %v2907_v56 = vrot.slane %v2905_v16, 1  ;;  %v2910_v19 = vrot.slane %v2908_v20, 2  ;;  %v2934_v53 = vrot.slane %v2932_v43, 1  ;;  %v2937_v31 = vrot.slane %v2935_v24, 2 }
 0x149   : > { %v2893_v11 = vor.u32 %v2892_v59, %v2889_v0  ;;  %v2902_v42 = vor.u32 %v2901_v26, %v2898_v14  ;;  %v2876_v15 = vsel %vm2832_vm4, %v2866_v9, %v2875_v39  ;;  %v2885_v48 = vsel %vm2832_vm4, %v2875_v39, %v2884_v18 }
 0x14a   : > { %v2920_v28 = vor.u32 %v2919_v8, %v2916_v51  ;;  %v2943_v0 = vrot.slane %v2941_v37, 1  ;;  %v2946_v59 = vrot.slane %v2944_v22, 2  ;;  %v2911_v9 = vor.u32 %v2910_v19, %v2907_v56 }
 0x14b   : > { %5677 = vmatmul.mubr.msk.bf16.gmra.mxu1 %vm1621_vm15, %v1620_v62  ;;  %v2925_v62 = vrot.slane %v2923_v41, 1  ;;  %v2894_v38 = vsel %vm2832_vm4, %v2884_v18, %v2893_v11  ;;  %v2938_v2 = vor.u32 %v2937_v31, %v2934_v53  ;;  %v2950_v16 = vshrl.u32 %v6831_v12, 16 }
 0x14c   : > { %5682 = vmatprep.mubr.msk.bf16.mxu1 %vm1621_vm15, %v6485_v58  ;;  %v2611_v58 = vsel %vm1676_vm2, %v6547_v25, 0  ;;  %v2928_v25 = vrot.slane %v2926_v45, 2  ;;  %v2953_v20 = vshll.u32 %v6831_v12, 16  ;;  %v2903_v43 = vsel %vm2832_vm4, %v2893_v11, %v2902_v42 }
 0x14d   : > { %5797 = vmatmul.mubr.msk.bf16.vlgmr.msra.gmra.mxu0 %vm1621_vm15, %v2858_v46  ;;  %v6095_v46 = vld [vmem:[#allocation2 + $0x8] sm:$0xff]   ;;  %v2959_v14 = vshrl.u32 %v6833_v52, 16  ;;  %v2962_v26 = vshll.u32 %v6833_v52, 16  ;;  %v6856_v41 = vsel %vm2832_vm4, %v2902_v42, %v2911_v9  ;;  %v2968_v45 = vshrl.u32 %v6837_v4, 16 }
 0x14e   : > { %5800 = vmatprep.mubr.msk.bf16.mxu0 %vm1621_vm15, %v2867_v49  ;;  %v2929_v24 = vor.u32 %v2928_v25, %v2925_v62  ;;  %v6859_v49 = vld [vmem:[#allocation2 + $0x88] sm:$0xff]   ;;  %v2520_v39 = vrot.slane %v6742_v54, 1  ;;  %v6865_v18 = vsel %vm2832_vm4, %v2911_v9, %v2920_v28  ;;  %v2947_v8 = vor.u32 %v2946_v59, %v2943_v0  ;;  %v6883_v62 = vld [vmem:[#allocation2 + $0x98] ss:$0 sps:$4 sm:$0x33]  }
 0x14f   : > { %v3811_v37 = vsel %vm1676_vm2, %v6633_v34, 0  ;;  %v2952_v56 = vrot.slane %v2950_v16, 1  ;;  %v2955_v19 = vrot.slane %v2953_v20, 2  ;;  %v2961_v11 = vrot.slane %v2959_v14, 1 }
 0x150   : > { %v6868_v51 = vsel %vm2832_vm4, %v2920_v28, %v2929_v24  ;;  %v6873_v22 = vsel %vm2832_vm4, %v2929_v24, %v2938_v2  ;;  %5871 = vmatpush3.bf16.msra.mxu0 %v3811_v37  ;;  %v6881_v31 = vsel %vm2832_vm4, %v2938_v2, %v2947_v8  ;;  %v2964_v42 = vrot.slane %v2962_v26, 2  ;;  %v6097_v28 = vld [vmem:[#allocation2 + $0x18] sm:$0xff]   ;;  %v6098_v2 = vld [vmem:[#allocation2 + $0x20] sm:$0xff]   ;;  %v6905_v26 = vld [vmem:[%s8509_s4 + $0x10] sm:$0x3] }
 0x151   : > { %v2522_v34 = vrot.slane %v6763_v23, 1  ;;  %v2970_v25 = vrot.slane %v2968_v45, 1  ;;  %v2980_v0 = vshll.u32 %v6859_v49, 16  ;;  %v2528_v9 = vrot.slane %v6781_v17, 1  ;;  %5996 = vmatprep.subr.msk.bf16.mxu0 %vm1676_vm2, %v6905_v26 }
 0x152   : > { %v2956_v16 = vor.u32 %v2955_v19, %v2952_v56  ;;  %v2965_v45 = vor.u32 %v2964_v42, %v2961_v11  ;;  %v2530_v37 = vrot.slane %v6784_v6, 1  ;;  %vm3279_vm5 = vcmask 1045504   ;;  %v3588_v42 = vld [vmem:[#allocation2 + $0x14] sm:$0xf] }
 0x153   : > { %5683 = vmatmul.mubr.msk.bf16.vlgmr.msra.gmra.mxu1 %vm1621_vm15, %v6095_v46  ;;  %v2524_v46 = vrot.slane %v6768_v21, 1  ;;  %v6892_v59 = vsel %vm2079_vm13, %v2520_v39, %v2522_v34  ;;  %v2982_v11 = vrot.slane %v2980_v0, 2  ;;  %v6932_v0 = vld [vmem:[#allocation2 + $0x18] sm:$0xff]   ;;  %vm4479_vm3 = vcmask 1044480  }
 0x154   : > { %5757 = vmatpush3.bf16.msra.mxu1 %v2611_v58  ;;  %5686 = vmatprep.mubr.msk.bf16.mxu1 %vm1621_vm15, %v6096_v30  ;;  %v2519_v58 = vrot.slane %v6750_v55, 1  ;;  %v6875_v55 = vld [vmem:[#allocation2 + $0x90] sm:$0xff]   ;;  %8516 = vst [vmem:[#allocation4_spill] sm:$0xff] %v6892_v59  ;;  %v2526_v30 = vrot.slane %v6778_v5, 1  ;;  %v6099_v59 = vld [vmem:[#allocation2 + $0x28] sm:$0xff]  }
 0x155   : > { %5993 = vmatprep.subr.msk.bf16.mxu1 %vm1676_vm2, %v6842_v13  ;;  %5801 = vmatmul.mubr.msk.bf16.gmra.mxu0 %vm1621_vm15, %v2876_v15  ;;  %v2971_v15 = vshll.u32 %v6837_v4, 16  ;;  %v2986_v20 = vshrl.u32 %v6875_v55, 16  ;;  %v2989_v24 = vshll.u32 %v6875_v55, 16  ;;  %v6900_v14 = vsel %vm2079_vm13, %v2522_v34, %v2524_v46 }
 0x156   : > { %5804 = vmatprep.mubr.msk.bf16.mxu0 %vm1621_vm15, %v2885_v48  ;;  %v6878_v53 = vsel %vm2079_vm13, %v2519_v58, %v2520_v39  ;;  %v2977_v48 = vshrl.u32 %v6859_v49, 16  ;;  %8517 = vst [vmem:[#allocation5_spill] sm:$0xff] %v6900_v14  ;;  %v6908_v58 = vsel %vm2079_vm13, %v2524_v46, %v2526_v30  ;;  %v6911_v39 = vsel %vm2079_vm13, %v2526_v30, %v2528_v9 }
 0x157   : > { %8518 = vst [vmem:[#allocation6_spill] sm:$0xff] %v6908_v58  ;;  %8519 = vst [vmem:[#allocation7_spill] sm:$0xff] %v6911_v39  ;;  %v2973_v56 = vrot.slane %v2971_v15, 2  ;;  %v2995_v34 = vshrl.u32 %v6883_v62, 16  ;;  %v6921_v46 = vsel %vm2079_vm13, %v2528_v9, %v2530_v37  ;;  %v2534_v30 = vrot.slane %v6802_v60, 1 }
 0x158   : > { %v2979_v19 = vrot.slane %v2977_v48, 1  ;;  %8520 = vst [vmem:[#allocation8_spill] sm:$0xff] %v6921_v46  ;;  %v2988_v39 = vrot.slane %v2986_v20, 1  ;;  %v2998_v15 = vshll.u32 %v6883_v62, 16  ;;  %v6930_v58 = vsel %vm2832_vm4, %v2947_v8, %v2956_v16 }
 0x159   : > { %v2538_v20 = vrot.slane %v6808_v1, 1  ;;  %v2974_v14 = vor.u32 %v2973_v56, %v2970_v25  ;;  %v2540_v8 = vrot.slane %v6804_v29, 1  ;;  %v3720_v13 = vrot.slane %v6932_v0, 2 }
 0x15a   : > { %v2983_v25 = vor.u32 %v2982_v11, %v2979_v19  ;;  %v3000_v56 = vrot.slane %v2998_v15, 2  ;;  %v2548_v11 = vrot.slane %v6837_v4, 1  ;;  %vm4032_vm6 = vsmask.f32 5376 }
 0x15b   : > { %5687 = vmatmul.mubr.msk.bf16.gmra.mxu1 %vm1621_vm15, %v6097_v28  ;;  %v2532_v28 = vrot.slane %v6790_v27, 1 }
 0x15c   : > { %5690 = vmatprep.mubr.msk.bf16.mxu1 %vm1621_vm15, %v6098_v2  ;;  %v2536_v2 = vrot.slane %v6799_v33, 1 }
 0x15d   : > { %5805 = vmatmul.mubr.msk.bf16.gmra.mxu0 %vm1621_vm15, %v2894_v38  ;;  %v2991_v38 = vrot.slane %v2989_v24, 2  ;;  %v6927_v48 = vsel %vm2079_vm13, %v2530_v37, %v2532_v28  ;;  %v6935_v9 = vsel %vm2079_vm13, %v2532_v28, %v2534_v30  ;;  %v6942_v24 = vsel %vm2832_vm4, %v2956_v16, %v2965_v45 }
 0x15e   : > { %5808 = vmatprep.mubr.msk.bf16.mxu0 %vm1621_vm15, %v2903_v43  ;;  %8521 = vst [vmem:[#allocation9_spill] sm:$0xff] %v6927_v48  ;;  %v3587_v43 = vld [vmem:[#allocation2 + $0x10] sm:$0xc]  ;;  %8522 = vst [vmem:[#allocation10_spill] sm:$0xff] %v6935_v9  ;;  %v6938_v46 = vsel %vm2079_vm13, %v2534_v30, %v2536_v2  ;;  %v6946_v48 = vld [vmem:[#allocation2 + $0x20] sm:$0xff]   ;;  %v2997_v28 = vrot.slane %v2995_v34, 1  ;;  %v6951_v9 = vsel %vm2079_vm13, %v2536_v2, %v2538_v20 }
 0x15f   : > { %8523 = vst [vmem:[#allocation11_spill] sm:$0xff] %v6938_v46  ;;  %v6944_v37 = vcombine.low %v3587_v43, %v3588_v42  ;;  %8524 = vst [vmem:[#allocation12_spill] sm:$0xff] %v6951_v9  ;;  %v2542_v30 = vrot.slane %v6814_v61, 1  ;;  %v2544_v46 = vrot.slane %v6831_v12, 1  ;;  %v2992_v16 = vor.u32 %v2991_v38, %v2988_v39 }
 0x160   : > { %v6958_v43 = vsel %vm2079_vm13, %v2538_v20, %v2540_v8  ;;  %v2546_v9 = vrot.slane %v6833_v52, 1  ;;  %v3722_v19 = vrot.slane %v6946_v48, 2  ;;  %v6981_v38 = vsel %vm2832_vm4, %v2974_v14, %v2983_v25  ;;  %v4473_v20 = vld [vmem:[#allocation2 + $0x10] sm:$0x8] }
 0x161   : > { %v6964_v34 = vsel %vm2079_vm13, %v2540_v8, %v2542_v30  ;;  %v6967_v2 = vsel %vm2079_vm13, %v2542_v30, %v2544_v46  ;;  %v3719_v39 = vrot.slane %v6944_v37, 2  ;;  %v6989_v8 = vsel %vm2832_vm4, %v2983_v25, %v2992_v16 }
 0x162   : > { %8525 = vst [vmem:[#allocation13_spill] sm:$0xff] %v6964_v34  ;;  %8526 = vst [vmem:[#allocation14_spill] sm:$0xff] %v6967_v2  ;;  %v6984_v15 = vsel %vm2079_vm13, %v2544_v46, %v2546_v9  ;;  %v3001_v30 = vor.u32 %v3000_v56, %v2997_v28  ;;  %v6992_v2 = vsel %vm2079_vm13, %v2546_v9, %v2548_v11  ;;  %v7009_v9 = vld [vmem:[#allocation2 + $0x30] sm:$0xff]   ;;  %v4481_v56 = vrot.slane %v6932_v0, 3 }
 0x163   : > { %5691 = vmatmul.mubr.msk.bf16.gmra.mxu1 %vm1621_vm15, %v6099_v59  ;;  %v6961_v59 = vld [vmem:[#allocation2 + $0x28] sm:$0xff]   ;;  %8527 = vst [vmem:[#allocation15_spill] sm:$0xff] %v6984_v15  ;;  %v5337_v34 = vcombine.low %v4473_v20, %v3588_v42  ;;  %v7004_v15 = vsel %vm3279_vm5, %v3719_v39, %v3720_v13  ;;  %v7007_v28 = vsel %vm3279_vm5, %v3720_v13, %v3722_v19  ;;  %v7011_v42 = vld [vmem:[#allocation2 + $0x38] sm:$0xff]   ;;  %v4483_v13 = vrot.slane %v6946_v48, 3 }
 0x164   : > { %5694 = vmatprep.mubr.msk.bf16.mxu1 %vm1621_vm15, %v6589_v7  ;;  %v6973_v7 = vsel %vm2832_vm4, %v2965_v45, %v2974_v14  ;;  %v8513_v45 = vrot.slane %v6875_v55, 1  ;;  %v6100_v20 = vld [vmem:[#allocation2 + $0x38] sm:$0xff]  }
 0x165   : > { %5809 = vmatmul.mubr.msk.bf16.gmra.mxu0 %vm1621_vm15, %v6856_v41  ;;  %v2550_v41 = vrot.slane %v6859_v49, 1  ;;  %v4480_v25 = vrot.slane %v5337_v34, 3 }
 0x166   : > { %5812 = vmatprep.mubr.msk.bf16.mxu0 %vm1621_vm15, %v6865_v18  ;;  %v8514_v18 = vrot.slane %v6961_v59, 2 }
 0x167   : > { %v6996_v14 = vsel %vm2079_vm13, %v2548_v11, %v2550_v41  ;;  %v7001_v46 = vsel %vm2079_vm13, %v2550_v41, %v8513_v45  ;;  %v3273_v11 = vld [vmem:[#allocation2 + $0x8] sm:$0xc]  ;;  %v7016_v41 = vsel %vm2832_vm4, %v2992_v16, %v3001_v30  ;;  %v3281_v45 = vrot.slane %v6742_v54, 2 }
 0x168   : > { %8528 = vst [vmem:[#allocation16_spill] sm:$0xff] %v6996_v14  ;;  %8529 = vst [vmem:[#allocation17_spill] sm:$0xff] %v7001_v46  ;;  %v5259_v39 = vcombine.low %v3273_v11, %v6737_v57  ;;  %v7026_v34 = vsel %vm3279_vm5, %v3722_v19, %v8514_v18  ;;  %v7028_v46 = vld [vmem:[#allocation2 + $0x40] sm:$0xff]   ;;  %v7033_v16 = vsel %vm4479_vm3, %v4480_v25, %v4481_v56  ;;  %v4485_v57 = vrot.slane %v6961_v59, 3  ;;  %v7047_v18 = vld [vmem:[#allocation2 + $0x50] sm:$0xff]  }
 0x169   : > { %8530 = vst [vmem:[#allocation18_spill] sm:$0xff] %v7033_v16  ;;  %v3283_v54 = vrot.slane %v6763_v23, 2  ;;  %v7042_v11 = vsel %vm4479_vm3, %v4481_v56, %v4483_v13  ;;  %v3285_v19 = vrot.slane %v6768_v21, 2  ;;  %v7049_v25 = vld [vmem:[#allocation2 + $0x58] sm:$0xff]   ;;  %v4489_v56 = vrot.slane %v7011_v42, 3 }
 0x16a   : > { %v3280_v30 = vrot.slane %v5259_v39, 2  ;;  %8531 = vst [vmem:[#allocation19_spill] sm:$0xff] %v7042_v11  ;;  %v7052_v16 = vsel %vm4479_vm3, %v4483_v13, %v4485_v57  ;;  %v3287_v39 = vrot.slane %v6778_v5, 2  ;;  %v3289_v13 = vrot.slane %v6781_v17, 2 }
 0x16b   : > { %5695 = vmatmul.mubr.msk.bf16.gmra.mxu1 %vm1621_vm15, %v6100_v20  ;;  %v7030_v20 = vld [vmem:[#allocation2 + $0x48] sm:$0xff]   ;;  %8532 = vst [vmem:[#allocation20_spill] sm:$0xff] %v7052_v16  ;;  %v7055_v23 = vsel %vm3279_vm5, %v3281_v45, %v3283_v54  ;;  %v7069_v16 = vld [vmem:[#allocation2 + $0x60] sm:$0xff]   ;;  %v3291_v17 = vrot.slane %v6784_v6, 2 }
 0x16c   : > { %5698 = vmatprep.mubr.msk.bf16.mxu1 %vm1621_vm15, %v6621_v50  ;;  %v7039_v50 = vsel %vm1676_vm2, %v6905_v26, 0  ;;  %8533 = vst [vmem:[#allocation21_spill] sm:$0xff] %v7055_v23  ;;  %v4487_v26 = vrot.slane %v7009_v9, 3  ;;  %v7062_v21 = vsel %vm3279_vm5, %v3280_v30, %v3281_v45  ;;  %v7071_v23 = vld [vmem:[#allocation2 + $0x68] sm:$0xff]   ;;  %v4493_v45 = vrot.slane %v7030_v20, 3 }
 0x16d   : > { %5813 = vmatmul.mubr.msk.bf16.gmra.mxu0 %vm1621_vm15, %v6868_v51  ;;  %v7065_v51 = vsel %vm3279_vm5, %v3283_v54, %v3285_v19  ;;  %v7082_v54 = vsel %vm3279_vm5, %v3285_v19, %v3287_v39  ;;  %v7085_v5 = vsel %vm3279_vm5, %v3287_v39, %v3289_v13  ;;  %v3293_v30 = vrot.slane %v6790_v27, 2 }
 0x16e   : > { %5816 = vmatprep.mubr.msk.bf16.mxu0 %vm1621_vm15, %v6873_v22  ;;  %8534 = vst [vmem:[#allocation22_spill] sm:$0xff] %v7065_v51  ;;  %v7074_v11 = vsel %vm4479_vm3, %v4485_v57, %v4487_v26  ;;  %v7077_v14 = vsel %vm4479_vm3, %v4487_v26, %v4489_v56  ;;  %v4491_v22 = vrot.slane %v7028_v46, 3  ;;  %8536 = vst [vmem:[#allocation24_spill] sm:$0xff] %v7082_v54  ;;  %v7089_v51 = vld [vmem:[#allocation2 + $0x70] sm:$0xff]   ;;  %v7091_v57 = vld [vmem:[#allocation2 + $0x78] sm:$0xff]   ;;  %v4495_v19 = vrot.slane %v7047_v18, 3 }
 0x16f   : > { %8535 = vst [vmem:[#allocation23_spill] sm:$0xff] %v7077_v14  ;;  %v4497_v54 = vrot.slane %v7049_v25, 3  ;;  %v7104_v6 = vsel %vm3279_vm5, %v3289_v13, %v3291_v17  ;;  %v7107_v27 = vsel %vm3279_vm5, %v3291_v17, %v3293_v30  ;;  %v3295_v39 = vrot.slane %v6802_v60, 2 }
 0x170   : > { %v7094_v26 = vsel %vm4479_vm3, %v4489_v56, %v4491_v22  ;;  %v7097_v14 = vsel %vm4479_vm3, %v4491_v22, %v4493_v45  ;;  %8539 = vst [vmem:[#allocation27_spill] sm:$0xff] %v7107_v27  ;;  %v3297_v56 = vrot.slane %v6799_v33, 2  ;;  %v7113_v22 = vld [vmem:[#allocation2 + $0x80] sm:$0xff]   ;;  %v4499_v13 = vrot.slane %v7069_v16, 3 }
 0x171   : > { %8537 = vst [vmem:[#allocation25_spill] sm:$0xff] %v7094_v26  ;;  %8538 = vst [vmem:[#allocation26_spill] sm:$0xff] %v7097_v14  ;;  %v7115_v14 = vld [vmem:[#allocation2 + $0x88] sm:$0xff]   ;;  %v7118_v26 = vsel %vm4479_vm3, %v4493_v45, %v4495_v19  ;;  %v4501_v17 = vrot.slane %v7071_v23, 3  ;;  %v7126_v60 = vsel %vm3279_vm5, %v3293_v30, %v3295_v39  ;;  %v3301_v27 = vrot.slane %v6804_v29, 2  ;;  %v7135_v45 = vld [vmem:[#allocation2 + $0x90] sm:$0xff]  }
 0x172   : > { %8541 = vst [vmem:[#allocation29_spill] sm:$0xff] %v7126_v60  ;;  %v7129_v33 = vsel %vm3279_vm5, %v3295_v39, %v3297_v56  ;;  %v4503_v39 = vrot.slane %v7089_v51, 3  ;;  %v7165_v60 = vld [vmem:[#allocation2 + $0xa0] ss:$0 sps:$4 sm:$0x77]  }
 0x173   : > { %5699 = vmatmul.mubr.msk.bf16.gmra.mxu1 %vm1621_vm15, %v6627_v32  ;;  %v7121_v32 = vsel %vm4479_vm3, %v4495_v19, %v4497_v54  ;;  %8542 = vst [vmem:[#allocation30_spill] sm:$0xff] %v7129_v33  ;;  %v7137_v19 = vld [vmem:[#allocation2 + $0x98] sm:$0xff]   ;;  %v7143_v30 = vsel %vm4479_vm3, %v4499_v13, %v4501_v17  ;;  %v4505_v33 = vrot.slane %v7091_v57, 3 }
 0x174   : > { %5702 = vmatprep.mubr.msk.bf16.mxu1 %vm1621_vm15, %v6664_v36  ;;  %8540 = vst [vmem:[#allocation28_spill] sm:$0xff] %v7121_v32  ;;  %v3299_v36 = vrot.slane %v6808_v1, 2  ;;  %v7140_v32 = vsel %vm4479_vm3, %v4497_v54, %v4499_v13  ;;  %8544 = vst [vmem:[#allocation32_spill] sm:$0xff] %v7143_v30  ;;  %v3305_v54 = vrot.slane %v6831_v12, 2  ;;  %v7158_v13 = vsel %vm4479_vm3, %v4501_v17, %v4503_v39 }
 0x175   : > { %5817 = vmatmul.mubr.msk.bf16.gmra.mxu0 %vm1621_vm15, %v6881_v31  ;;  %8543 = vst [vmem:[#allocation31_spill] sm:$0xff] %v7140_v32  ;;  %v3303_v31 = vrot.slane %v6814_v61, 2  ;;  %8545 = vst [vmem:[#allocation33_spill] sm:$0xff] %v7158_v13  ;;  %v7161_v30 = vsel %vm4479_vm3, %v4503_v39, %v4505_v33  ;;  %v4507_v32 = vrot.slane %v7113_v22, 3  ;;  %v3307_v61 = vrot.slane %v6833_v52, 2 }
 0x176   : > { %5820 = vmatprep.mubr.msk.bf16.mxu0 %vm1621_vm15, %v6930_v58  ;;  %v7150_v29 = vsel %vm3279_vm5, %v3297_v56, %v3299_v36  ;;  %v7153_v1 = vsel %vm3279_vm5, %v3299_v36, %v3301_v27  ;;  %8546 = vst [vmem:[#allocation34_spill] sm:$0xff] %v7161_v30  ;;  %v4509_v58 = vrot.slane %v7115_v14, 3  ;;  %v3309_v12 = vrot.slane %v6837_v4, 2 }
 0x177   : > { %v7168_v56 = vsel %vm3279_vm5, %v3301_v27, %v3303_v31  ;;  %v7171_v36 = vsel %vm3279_vm5, %v3303_v31, %v3305_v54  ;;  %v7176_v17 = vsel %vm4479_vm3, %v4505_v33, %v4507_v32  ;;  %v4511_v30 = vrot.slane %v7135_v45, 3 }
 0x178   : > { %v7179_v39 = vsel %vm4479_vm3, %v4507_v32, %v4509_v58  ;;  %v4513_v13 = vrot.slane %v7137_v19, 3  ;;  %v7186_v27 = vsel %vm3279_vm5, %v3305_v54, %v3307_v61  ;;  %v7189_v52 = vsel %vm3279_vm5, %v3307_v61, %v3309_v12 }
 0x179   : > { %8547 = vst [vmem:[#allocation35_spill] sm:$0xff] %v7189_v52  ;;  %v3311_v4 = vrot.slane %v6859_v49, 2  ;;  %v3313_v33 = vrot.slane %v6875_v55, 2  ;;  %v7196_v32 = vsel %vm4479_vm3, %v4509_v58, %v4511_v30  ;;  %v3315_v54 = vrot.slane %v6883_v62, 2 }
 0x17a   : > { %8548 = vst [vmem:[#allocation36_spill] sm:$0xff] %v7196_v32  ;;  %v7199_v31 = vsel %vm4479_vm3, %v4511_v30, %v4513_v13  ;;  %v4034_v52 = vshrl.u32 %v6944_v37, 16  ;;  %v4037_v62 = vshll.u32 %v6944_v37, 16  ;;  %v4042_v58 = vshrl.u32 %v6932_v0, 16 }
 0x17b   : > { %5703 = vmatmul.mubr.msk.bf16.gmra.mxu1 %vm1621_vm15, %v6660_v10  ;;  %8549 = vst [vmem:[#allocation37_spill] sm:$0xff] %v7199_v31  ;;  %v4515_v10 = vrot.slane %v7165_v60, 3  ;;  %v7204_v61 = vsel %vm3279_vm5, %v3309_v12, %v3311_v4  ;;  %v7207_v49 = vsel %vm3279_vm5, %v3311_v4, %v3313_v33  ;;  %v7216_v30 = vsel %vm3279_vm5, %v3313_v33, %v3315_v54 }
 0x17c   : > { %5706 = vmatprep.mubr.msk.bf16.mxu1 %vm1621_vm15, %v6692_v44  ;;  %8550 = vst [vmem:[#allocation38_spill] sm:$0xff] %v7204_v61  ;;  %8551 = vst [vmem:[#allocation39_spill] sm:$0xff] %v7207_v49  ;;  %v4036_v12 = vrot.slane %v4034_v52, 2  ;;  %v4045_v4 = vshll.u32 %v6932_v0, 16  ;;  %v4051_v49 = vshrl.u32 %v6946_v48, 16  ;;  %v4039_v61 = vrot.slane %v4037_v62, 3 }
 0x17d   : > { %5821 = vmatmul.mubr.msk.bf16.gmra.mxu0 %vm1621_vm15, %v6942_v24  ;;  %v7213_v44 = vsel %vm4479_vm3, %v4513_v13, %v4515_v10  ;;  %8553 = vst [vmem:[#allocation41_spill] sm:$0xff] %v7216_v30  ;;  %v4054_v24 = vshll.u32 %v6946_v48, 16  ;;  %v4044_v13 = vrot.slane %v4042_v58, 2  ;;  %v4060_v10 = vshrl.u32 %v6961_v59, 16 }
 0x17e   : > { %8552 = vst [vmem:[#allocation40_spill] sm:$0xff] %v7213_v44  ;;  %5824 = vmatprep.mubr.msk.bf16.mxu0 %vm1621_vm15, %v6973_v7  ;;  %v4063_v33 = vshll.u32 %v6961_v59, 16  ;;  %v4047_v54 = vrot.slane %v4045_v4, 3  ;;  %v4053_v37 = vrot.slane %v4051_v49, 2  ;;  %v4069_v44 = vshrl.u32 %v7009_v9, 16 }
 0x17f   : > { %v4056_v30 = vrot.slane %v4054_v24, 3  ;;  %v4040_v31 = vor.u32 %v4039_v61, %v4036_v12  ;;  %v4062_v7 = vrot.slane %v4060_v10, 2  ;;  %v4072_v0 = vshll.u32 %v7009_v9, 16 }
 0x180   : > { %v4065_v52 = vrot.slane %v4063_v33, 3  ;;  %v4048_v48 = vor.u32 %v4047_v54, %v4044_v13  ;;  %v4071_v58 = vrot.slane %v4069_v44, 2  ;;  %v4078_v32 = vshrl.u32 %v7011_v42, 16 }
 0x181   : > { %v4057_v62 = vor.u32 %v4056_v30, %v4053_v37  ;;  %v4074_v4 = vrot.slane %v4072_v0, 3  ;;  %v4081_v24 = vshll.u32 %v7011_v42, 16  ;;  %v4087_v61 = vshrl.u32 %v7028_v46, 16 }
 0x182   : > { %v4066_v49 = vor.u32 %v4065_v52, %v4062_v7  ;;  %v7237_v12 = vsel %vm4032_vm6, %v4040_v31, %v4048_v48  ;;  %v4090_v44 = vshll.u32 %v7028_v46, 16  ;;  %v4096_v54 = vshrl.u32 %v7030_v20, 16 }
 0x183   : > { %5707 = vmatmul.mubr.msk.bf16.gmra.mxu1 %vm1621_vm15, %v6696_v40  ;;  %v7240_v10 = vsel %vm4032_vm6, %v4048_v48, %v4057_v62  ;;  %v4080_v40 = vrot.slane %v4078_v32, 2  ;;  %v4075_v30 = vor.u32 %v4074_v4, %v4071_v58  ;;  %v4083_v13 = vrot.slane %v4081_v24, 3 }
 0x184   : > { %5710 = vmatprep.mubr.msk.bf16.mxu1 %vm1621_vm15, %v6705_v63  ;;  %v7246_v63 = vsel %vm4032_vm6, %v4057_v62, %v4066_v49  ;;  %v4089_v33 = vrot.slane %v4087_v61, 2  ;;  %v4092_v31 = vrot.slane %v4090_v44, 3  ;;  %v4099_v37 = vshll.u32 %v7030_v20, 16 }
 0x185   : > { %5825 = vmatmul.mubr.msk.bf16.gmra.mxu0 %vm1621_vm15, %v6981_v38  ;;  %v4105_v32 = vshrl.u32 %v7047_v18, 16  ;;  %v7254_v7 = vsel %vm4032_vm6, %v4066_v49, %v4075_v30  ;;  %v4084_v38 = vor.u32 %v4083_v13, %v4080_v40  ;;  %v4108_v52 = vshll.u32 %v7047_v18, 16 }
 0x186   : > { %5828 = vmatprep.mubr.msk.bf16.mxu0 %vm1621_vm15, %v6989_v8  ;;  %v4114_v0 = vshrl.u32 %v7049_v25, 16  ;;  %v4093_v48 = vor.u32 %v4092_v31, %v4089_v33  ;;  %v4098_v62 = vrot.slane %v4096_v54, 2  ;;  %v4101_v58 = vrot.slane %v4099_v37, 3 }
 0x187   : > { %v4107_v4 = vrot.slane %v4105_v32, 2  ;;  %v7259_v8 = vsel %vm4032_vm6, %v4075_v30, %v4084_v38  ;;  %v4110_v24 = vrot.slane %v4108_v52, 3  ;;  %v4117_v44 = vshll.u32 %v7049_v25, 16 }
 0x188   : > { %v4116_v61 = vrot.slane %v4114_v0, 2  ;;  %v7265_v49 = vsel %vm4032_vm6, %v4084_v38, %v4093_v48  ;;  %v4102_v40 = vor.u32 %v4101_v58, %v4098_v62  ;;  %v4123_v13 = vshrl.u32 %v7069_v16, 16 }
 0x189   : > { %v4126_v33 = vshll.u32 %v7069_v16, 16  ;;  %v4111_v30 = vor.u32 %v4110_v24, %v4107_v4  ;;  %v4119_v31 = vrot.slane %v4117_v44, 3  ;;  %v4132_v54 = vshrl.u32 %v7071_v23, 16 }
 0x18a   : > { %v4135_v37 = vshll.u32 %v7071_v23, 16  ;;  %v7274_v32 = vsel %vm4032_vm6, %v4093_v48, %v4102_v40  ;;  %v4141_v52 = vshrl.u32 %v7089_v51, 16  ;;  %v4144_v48 = vshll.u32 %v7089_v51, 16 }
 0x18b   : > { %5711 = vmatmul.mubr.msk.bf16.gmra.mxu1 %vm1621_vm15, %v6711_v3  ;;  %v4125_v3 = vrot.slane %v4123_v13, 2  ;;  %v4128_v38 = vrot.slane %v4126_v33, 3  ;;  %v7280_v0 = vsel %vm4032_vm6, %v4102_v40, %v4111_v30  ;;  %v4134_v62 = vrot.slane %v4132_v54, 2 }
 0x18c   : > { %5714 = vmatprep.mubr.msk.bf16.mxu1 %vm1621_vm15, %v6729_v47  ;;  %v4120_v47 = vor.u32 %v4119_v31, %v4116_v61  ;;  %v4137_v58 = vrot.slane %v4135_v37, 3  ;;  %v4143_v24 = vrot.slane %v4141_v52, 2  ;;  %v4150_v44 = vshrl.u32 %v7091_v57, 16 }
 0x18d   : > { %5829 = vmatmul.mubr.msk.bf16.gmra.mxu0 %vm1621_vm15, %v7016_v41  ;;  %v4129_v4 = vor.u32 %v4128_v38, %v4125_v3  ;;  %v4153_v41 = vshll.u32 %v7091_v57, 16  ;;  %v4159_v40 = vshrl.u32 %v7113_v22, 16  ;;  %v4146_v31 = vrot.slane %v4144_v48, 3 }
 0x18e   : > { %5872 = vmatprep.mubr.msk.bf16.mxu0 %vm1621_vm15, %v7004_v15  ;;  %v7287_v13 = vsel %vm4032_vm6, %v4111_v30, %v4120_v47  ;;  %v4138_v33 = vor.u32 %v4137_v58, %v4134_v62  ;;  %v4152_v54 = vrot.slane %v4150_v44, 2  ;;  %v4162_v15 = vshll.u32 %v7113_v22, 16 }
 0x18f   : > { %v7292_v61 = vsel %vm4032_vm6, %v4120_v47, %v4129_v4  ;;  %v4155_v3 = vrot.slane %v4153_v41, 3  ;;  %v4161_v38 = vrot.slane %v4159_v40, 2  ;;  %v4168_v30 = vshrl.u32 %v7115_v14, 16 }
 0x190   : > { %v7296_v37 = vsel %vm4032_vm6, %v4129_v4, %v4138_v33  ;;  %v4147_v52 = vor.u32 %v4146_v31, %v4143_v24  ;;  %v4164_v62 = vrot.slane %v4162_v15, 3  ;;  %v4171_v58 = vshll.u32 %v7115_v14, 16 }
 0x191   : > { %8554 = vst [vmem:[#allocation42_spill] sm:$0xff] %v7296_v37  ;;  %v4177_v47 = vshrl.u32 %v7135_v45, 16  ;;  %v4156_v48 = vor.u32 %v4155_v3, %v4152_v54  ;;  %v4170_v44 = vrot.slane %v4168_v30, 2  ;;  %v4180_v4 = vshll.u32 %v7135_v45, 16  ;;  %v8555_v30 = vld [vmem:[#allocation3_spill] sm:$0xff] }
 0x192   : > { %v4186_v41 = vshrl.u32 %v7137_v19, 16  ;;  %v7308_v40 = vsel %vm4032_vm6, %v4138_v33, %v4147_v52  ;;  %v4165_v37 = vor.u32 %v4164_v62, %v4161_v38  ;;  %v4189_v54 = vshll.u32 %v7137_v19, 16 }
 0x193   : > { %5715 = vmatmul.mubr.msk.bf16.gmra.mxu1 %vm1621_vm15, %v6745_v35  ;;  %v4173_v35 = vrot.slane %v4171_v58, 3  ;;  %v4179_v24 = vrot.slane %v4177_v47, 2  ;;  %v7313_v31 = vsel %vm4032_vm6, %v4147_v52, %v4156_v48  ;;  %v4182_v15 = vrot.slane %v4180_v4, 3 }
 0x194   : > { %5758 = vmatprep.mubr.msk.bf16.mxu1 %vm1621_vm15, %v6878_v53  ;;  %v4188_v53 = vrot.slane %v4186_v41, 2  ;;  %v7320_v33 = vsel %vm4032_vm6, %v4156_v48, %v4165_v37  ;;  %v4195_v38 = vshrl.u32 %v7165_v60, 16  ;;  %v3372_v52 = vsel %vm1676_vm2, %v8555_v30, 0  ;;  %v7333_v48 = vld [vmem:[%s8509_s4 + $0xe] sm:$0x3]  ;;  %v8556_v41 = vld [vmem:[#allocation4_spill] sm:$0xff] }
 0x195   : > { %5873 = vmatmul.mubr.msk.bf16.vlgmr.msra.gmra.mxu0 %vm1621_vm15, %v7007_v28  ;;  %v4174_v3 = vor.u32 %v4173_v35, %v4170_v44  ;;  %v4198_v28 = vshll.u32 %v7165_v60, 16  ;;  %v4183_v62 = vor.u32 %v4182_v15, %v4179_v24  ;;  %v4191_v58 = vrot.slane %v4189_v54, 3 }
 0x196   : > { %5876 = vmatprep.mubr.msk.bf16.mxu0 %vm1621_vm15, %v7026_v34  ;;  %5947 = vmatpush3.bf16.msra.mxu0 %v7039_v50  ;;  %v3726_v47 = vrot.slane %v7009_v9, 2  ;;  %v4197_v34 = vrot.slane %v4195_v38, 2  ;;  %v8557_v9 = vld [vmem:[#allocation5_spill] sm:$0xff]  ;;  %v8558_v15 = vrot.slane %v6961_v59, 2  ;;  %v8559_v38 = vld [vmem:[#allocation6_spill] sm:$0xff]  ;;  %v8560_v59 = vld [vmem:[#allocation7_spill] sm:$0xff] }
 0x197   : > { %v7328_v4 = vsel %vm4032_vm6, %v4165_v37, %v4174_v3  ;;  %v4200_v50 = vrot.slane %v4198_v28, 3  ;;  %v7336_v44 = vsel %vm4032_vm6, %v4174_v3, %v4183_v62  ;;  %v4192_v60 = vor.u32 %v4191_v58, %v4188_v53  ;;  %v8561_v58 = vld [vmem:[#allocation8_spill] sm:$0xff] }
 0x198   : > { %v3728_v37 = vrot.slane %v7011_v42, 2  ;;  %v3727_v54 = vsel %vm3279_vm5, %v8558_v15, %v3726_v47  ;;  %v3730_v42 = vrot.slane %v7028_v46, 2  ;;  %v3732_v28 = vrot.slane %v7030_v20, 2  ;;  %v8562_v46 = vld [vmem:[#allocation9_spill] sm:$0xff] }
 0x199   : > { %v4201_v35 = vor.u32 %v4200_v50, %v4197_v34  ;;  %v7344_v24 = vsel %vm4032_vm6, %v4183_v62, %v4192_v60  ;;  %v3734_v62 = vrot.slane %v7047_v18, 2  ;;  %v3738_v50 = vrot.slane %v7069_v16, 2  ;;  %v8564_v18 = vld [vmem:[#allocation11_spill] sm:$0xff] }
 0x19a   : > { %v3729_v3 = vsel %vm3279_vm5, %v3726_v47, %v3728_v37  ;;  %v3731_v30 = vsel %vm3279_vm5, %v3728_v37, %v3730_v42  ;;  %v3736_v47 = vrot.slane %v7049_v25, 2  ;;  %v8565_v37 = vld [vmem:[#allocation12_spill] sm:$0xff]  ;;  %v3744_v16 = vrot.slane %v7091_v57, 2 }
 0x19b   : > { %5759 = vmatmul.mubr.msk.bf16.vlgmr.msra.gmra.mxu1 %vm1621_vm15, %v8556_v41  ;;  %v7352_v53 = vsel %vm4032_vm6, %v4192_v60, %v4201_v35  ;;  %v3735_v20 = vsel %vm3279_vm5, %v3732_v28, %v3734_v62  ;;  %v8563_v60 = vld [vmem:[#allocation10_spill] sm:$0xff]  ;;  %v3740_v41 = vrot.slane %v7071_v23, 2 }
 0x19c   : > { %5833 = vmatpush3.bf16.msra.mxu1 %v3372_v52  ;;  %5762 = vmatprep.mubr.msk.bf16.mxu1 %vm1621_vm15, %v8557_v9  ;;  %v3733_v52 = vsel %vm3279_vm5, %v3730_v42, %v3732_v28  ;;  %v3737_v34 = vsel %vm3279_vm5, %v3734_v62, %v3736_v47  ;;  %v3739_v25 = vsel %vm3279_vm5, %v3736_v47, %v3738_v50  ;;  %v3742_v9 = vrot.slane %v7089_v51, 2 }
 0x19d   : > { %5995 = vmatprep.subr.msk.bf16.mxu1 %vm1676_vm2, %v7333_v48  ;;  %5877 = vmatmul.mubr.msk.bf16.gmra.mxu0 %vm1621_vm15, %v3727_v54  ;;  %v3741_v35 = vsel %vm3279_vm5, %v3738_v50, %v3740_v41  ;;  %v3746_v42 = vrot.slane %v7113_v22, 2  ;;  %v3748_v28 = vrot.slane %v7115_v14, 2  ;;  %v3750_v47 = vrot.slane %v7135_v45, 2  ;;  %v8568_v14 = vld [vmem:[#allocation15_spill] sm:$0xff] }
 0x19e   : > { %5880 = vmatprep.mubr.msk.bf16.mxu0 %vm1621_vm15, %v3729_v3  ;;  %v3743_v23 = vsel %vm3279_vm5, %v3740_v41, %v3742_v9  ;;  %v3745_v54 = vsel %vm3279_vm5, %v3742_v9, %v3744_v16  ;;  %v3752_v50 = vrot.slane %v7137_v19, 2  ;;  %v8569_v19 = vld [vmem:[#allocation16_spill] sm:$0xff] }
 0x19f   : > { %v3749_v22 = vsel %vm3279_vm5, %v3746_v42, %v3748_v28 }
 0x1a0   : > { %v3753_v45 = vsel %vm3279_vm5, %v3750_v47, %v3752_v50 }
 0x1a3   : > { %5763 = vmatmul.mubr.msk.bf16.gmra.mxu1 %vm1621_vm15, %v8559_v38 }
 0x1a4   : > { %5766 = vmatprep.mubr.msk.bf16.mxu1 %vm1621_vm15, %v8560_v59  ;;  %v8567_v59 = vld [vmem:[#allocation14_spill] sm:$0xff] }
 0x1a5   : > { %5881 = vmatmul.mubr.msk.bf16.gmra.mxu0 %vm1621_vm15, %v3731_v30 }
 0x1a6   : > { %5884 = vmatprep.mubr.msk.bf16.mxu0 %vm1621_vm15, %v3733_v52  ;;  %v3747_v52 = vsel %vm3279_vm5, %v3744_v16, %v3746_v42  ;;  %v6091_v42 = vld [vmem:[#allocation2 + $0x98] ss:$0 sps:$4 sm:$0x11]  }
 0x1ab   : > { %5767 = vmatmul.mubr.msk.bf16.gmra.mxu1 %vm1621_vm15, %v8561_v58 }
 0x1ac   : > { %5770 = vmatprep.mubr.msk.bf16.mxu1 %vm1621_vm15, %v8562_v46 }
 0x1ad   : > { %5885 = vmatmul.mubr.msk.bf16.gmra.mxu0 %vm1621_vm15, %v3735_v20 }
 0x1ae   : > { %5888 = vmatprep.mubr.msk.bf16.mxu0 %vm1621_vm15, %v3737_v34 }
 0x1b3   : > { %5771 = vmatmul.mubr.msk.bf16.gmra.mxu1 %vm1621_vm15, %v8563_v60  ;;  %v3751_v60 = vsel %vm3279_vm5, %v3748_v28, %v3750_v47  ;;  %v8571_v28 = vld [vmem:[#allocation18_spill] sm:$0xff]  ;;  %v2554_v47 = vrot.slane %v6091_v42, 1  ;;  %v8576_v42 = vld [vmem:[#allocation20_spill] sm:$0xff] }
 0x1b4   : > { %5774 = vmatprep.mubr.msk.bf16.mxu1 %vm1621_vm15, %v8564_v18 }
 0x1b5   : > { %5889 = vmatmul.mubr.msk.bf16.gmra.mxu0 %vm1621_vm15, %v3739_v25 }
 0x1b6   : > { %5892 = vmatprep.mubr.msk.bf16.mxu0 %vm1621_vm15, %v3741_v35  ;;  %v6089_v35 = vld [vmem:[#allocation2 + $0xa0] ss:$0 sps:$4 sm:$0x33]  }
 0x1b7   : > { %v3754_v16 = vrot.slane %v6089_v35, 2 }
 0x1bb   : > { %5775 = vmatmul.mubr.msk.bf16.gmra.mxu1 %vm1621_vm15, %v8565_v37 }
 0x1bc   : > { %5778 = vmatprep.mubr.msk.bf16.mxu1 %vm1621_vm15, %v6958_v43  ;;  %v7393_v15 = vpop.f32.mrf.mxu0  ;;  %v8566_v43 = vld [vmem:[#allocation13_spill] sm:$0xff] }
 0x1bd   : > { %5893 = vmatmul.mubr.msk.bf16.gmra.mxu0 %vm1621_vm15, %v3743_v23 }
 0x1be   : > { %v7398_v3 = vpop.f32.mrf.mxu0  ;;  %5896 = vmatprep.mubr.msk.bf16.mxu0 %vm1621_vm15, %v3745_v54  ;;  %v8570_v54 = vld [vmem:[#allocation17_spill] sm:$0xff] }
 0x1c0   : > { %v7401_v51 = vpop.f32.mrf.mxu0 }
 0x1c2   : > { %v7404_v38 = vpop.f32.mrf.mxu1  ;;  %v7408_v57 = vpop.f32.mrf.mxu0 }
 0x1c3   : > { %5779 = vmatmul.mubr.msk.bf16.gmra.mxu1 %vm1621_vm15, %v8566_v43  ;;  %v3755_v43 = vsel %vm3279_vm5, %v3752_v50, %v3754_v16 }
 0x1c4   : > { %5782 = vmatprep.mubr.msk.bf16.mxu1 %vm1621_vm15, %v8567_v59  ;;  %v7413_v30 = vpop.f32.mrf.mxu1 }
 0x1c5   : > { %5897 = vmatmul.mubr.msk.bf16.gmra.mxu0 %vm1621_vm15, %v3747_v52 }
 0x1c6   : > { %v7418_v62 = vpop.f32.mrf.mxu1  ;;  %5900 = vmatprep.mubr.msk.bf16.mxu0 %vm1621_vm15, %v3749_v22  ;;  %v7421_v58 = vpop.f32.mrf.mxu0 }
 0x1c8   : > { %v7423_v46 = vpop.f32.mrf.mxu1  ;;  %v7426_v20 = vpop.f32.mrf.mxu0 }
 0x1ca   : > { %v7430_v34 = vpop.f32.mrf.mxu0 }
 0x1cb   : > { %5783 = vmatmul.mubr.msk.bf16.gmra.mxu1 %vm1621_vm15, %v8568_v14 }
 0x1cc   : > { %5786 = vmatprep.mubr.msk.bf16.mxu1 %vm1621_vm15, %v6992_v2  ;;  %v7436_v18 = vpop.f32.mrf.mxu1  ;;  %v7438_v41 = vpop.f32.mrf.mxu0 }
 0x1cd   : > { %5901 = vmatmul.mubr.msk.bf16.gmra.mxu0 %vm1621_vm15, %v3751_v60  ;;  %v8572_v60 = vrot.slane %v6875_v55, 1 }
 0x1ce   : > { %5904 = vmatprep.mubr.msk.bf16.mxu0 %vm1621_vm15, %v3753_v45  ;;  %v7443_v25 = vpop.f32.mrf.mxu1 }
 0x1cf   : > { %v2555_v45 = vsel %vm2079_vm13, %v8572_v60, %v2554_v47  ;;  %v8579_v60 = vld [vmem:[#allocation21_spill] sm:$0xff] }
 0x1d0   : > { %v7445_v9 = vpop.f32.mrf.mxu1 }
 0x1d1   : > { %v7447_v2 = vpop.f32.mrf.mxu0 }
 0x1d2   : > { %v7451_v37 = vpop.f32.mrf.mxu1 }
 0x1d3   : > { %5787 = vmatmul.mubr.msk.bf16.gmra.mxu1 %vm1621_vm15, %v8569_v19  ;;  %v7453_v23 = vpop.f32.mrf.mxu0 }
 0x1d4   : > { %5790 = vmatprep.mubr.msk.bf16.mxu1 %vm1621_vm15, %v8570_v54  ;;  %v8575_v54 = vld [vmem:[#allocation19_spill] sm:$0xff] }
 0x1d5   : > { %v7458_v59 = vpop.f32.mrf.mxu0  ;;  %5905 = vmatmul.mubr.msk.bf16.gmra.mxu0 %vm1621_vm15, %v3755_v43 }
 0x1d6   : > { %5948 = vmatprep.mubr.msk.bf16.mxu0 %vm1621_vm15, %v8571_v28  ;;  %v4258_v28 = vsel %vm1676_vm2, %v7333_v48, 0 }
 0x1d7   : > { %v7463_v52 = vpop.f32.mrf.mxu1  ;;  %v7465_v22 = vpop.f32.mrf.mxu0 }
 0x1d9   : > { %v7467_v14 = vpop.f32.mrf.mxu1 }
 0x1db   : > { %5791 = vmatmul.mubr.msk.bf16.gmra.mxu1 %vm1621_vm15, %v2555_v45  ;;  %v7473_v50 = vpop.f32.mrf.mxu1  ;;  %v7475_v35 = vpop.f32.mrf.mxu0  ;;  %v8580_v45 = vld [vmem:[#allocation22_spill] sm:$0xff] }
 0x1dc   : > { %8573 = vst [vmem:[#allocation3_spill] sm:$0xff] %v7475_v35  ;;  %5834 = vmatprep.mubr.msk.bf16.mxu1 %vm1621_vm15, %v7062_v21 }
 0x1dd   : > { %v7479_v19 = vpop.f32.mrf.mxu1  ;;  %v7481_v16 = vpop.f32.mrf.mxu0  ;;  %5949 = vmatmul.mubr.msk.bf16.vlgmr.msra.gmra.mxu0 %vm1621_vm15, %v8575_v54 }
 0x1de   : > { %8574 = vst [vmem:[#allocation4_spill] sm:$0xff] %v7481_v16  ;;  %5952 = vmatprep.mubr.msk.bf16.mxu0 %vm1621_vm15, %v8576_v42 }
 0x1df   : > { %v7487_v55 = vpop.f32.mrf.mxu0 }
 0x1e0   : > { %8577 = vst [vmem:[#allocation5_spill] sm:$0xff] %v7487_v55  ;;  %v7489_v43 = vpop.f32.mrf.mxu1 }
 0x1e1   : > { %v7493_v47 = vpop.f32.mrf.mxu0 }
 0x1e2   : > { %8578 = vst [vmem:[#allocation6_spill] sm:$0xff] %v7493_v47  ;;  %v7495_v21 = vpop.f32.mrf.mxu1  ;;  %v8584_v47 = vld [vmem:[#allocation23_spill] sm:$0xff] }
 0x1e3   : > { %5835 = vmatmul.mubr.msk.bf16.vlgmr.msra.gmra.mxu1 %vm1621_vm15, %v8579_v60 }
 0x1e4   : > { %5909 = vmatpush3.bf16.msra.mxu1 %v4258_v28  ;;  %5838 = vmatprep.mubr.msk.bf16.mxu1 %vm1621_vm15, %v8580_v45  ;;  %v7501_v54 = vpop.f32.mrf.mxu1  ;;  %v7503_v42 = vpop.f32.mrf.mxu0  ;;  %v8588_v45 = vld [vmem:[#allocation24_spill] sm:$0xff] }
 0x1e5   : > { %8581 = vst [vmem:[#allocation7_spill] sm:$0xff] %v7503_v42  ;;  %5953 = vmatmul.mubr.msk.bf16.gmra.mxu0 %vm1621_vm15, %v7074_v11 }
 0x1e6   : > { %v7505_v55 = vpop.f32.mrf.mxu1  ;;  %v7509_v48 = vpop.f32.mrf.mxu0  ;;  %5956 = vmatprep.mubr.msk.bf16.mxu0 %vm1621_vm15, %v8584_v47  ;;  %v8593_v47 = vld [vmem:[#allocation26_spill] sm:$0xff] }
 0x1e7   : > { %8582 = vst [vmem:[#allocation8_spill] sm:$0xff] %v7505_v55  ;;  %8583 = vst [vmem:[#allocation9_spill] sm:$0xff] %v7509_v48  ;;  %v8592_v55 = vld [vmem:[#allocation25_spill] sm:$0xff] }
 0x1e8   : > { %v7513_v16 = vpop.f32.mrf.mxu0 }
 0x1e9   : > { %8585 = vst [vmem:[#allocation10_spill] sm:$0xff] %v7513_v16 }
 0x1ea   : > { %v7515_v28 = vpop.f32.mrf.mxu1  ;;  %v7517_v60 = vpop.f32.mrf.mxu0 }
 0x1eb   : > { %8586 = vst [vmem:[#allocation11_spill] sm:$0xff] %v7515_v28  ;;  %8587 = vst [vmem:[#allocation12_spill] sm:$0xff] %v7517_v60  ;;  %5839 = vmatmul.mubr.msk.bf16.gmra.mxu1 %vm1621_vm15, %v8588_v45 }
 0x1ec   : > { %5842 = vmatprep.mubr.msk.bf16.mxu1 %vm1621_vm15, %v7085_v5  ;;  %v7523_v42 = vpop.f32.mrf.mxu1  ;;  %v8598_v5 = vld [vmem:[#allocation27_spill] sm:$0xff] }
 0x1ed   : > { %8589 = vst [vmem:[#allocation13_spill] sm:$0xff] %v7523_v42  ;;  %v7527_v48 = vpop.f32.mrf.mxu0  ;;  %5957 = vmatmul.mubr.msk.bf16.gmra.mxu0 %vm1621_vm15, %v8592_v55 }
 0x1ee   : > { %v7525_v11 = vpop.f32.mrf.mxu1  ;;  %8591 = vst [vmem:[#allocation15_spill] sm:$0xff] %v7527_v48  ;;  %5960 = vmatprep.mubr.msk.bf16.mxu0 %vm1621_vm15, %v8593_v47 }
 0x1ef   : > { %8590 = vst [vmem:[#allocation14_spill] sm:$0xff] %v7525_v11  ;;  %v7535_v60 = vpop.f32.mrf.mxu0 }
 0x1f0   : > { %v7533_v16 = vpop.f32.mrf.mxu1  ;;  %8595 = vst [vmem:[#allocation17_spill] sm:$0xff] %v7535_v60 }
 0x1f1   : > { %8594 = vst [vmem:[#allocation16_spill] sm:$0xff] %v7533_v16  ;;  %v7537_v45 = vpop.f32.mrf.mxu0 }
 0x1f2   : > { %8596 = vst [vmem:[#allocation18_spill] sm:$0xff] %v7537_v45  ;;  %v8603_v45 = vld [vmem:[#allocation28_spill] sm:$0xff] }
 0x1f3   : > { %v7539_v28 = vpop.f32.mrf.mxu1  ;;  %5843 = vmatmul.mubr.msk.bf16.gmra.mxu1 %vm1621_vm15, %v7104_v6  ;;  %v7545_v48 = vpop.f32.mrf.mxu0 }
 0x1f4   : > { %8597 = vst [vmem:[#allocation19_spill] sm:$0xff] %v7539_v28  ;;  %5846 = vmatprep.mubr.msk.bf16.mxu1 %vm1621_vm15, %v8598_v5  ;;  %8599 = vst [vmem:[#allocation20_spill] sm:$0xff] %v7545_v48  ;;  %v8608_v48 = vld [vmem:[#allocation29_spill] sm:$0xff] }
 0x1f5   : > { %v7547_v55 = vpop.f32.mrf.mxu1  ;;  %v7549_v11 = vpop.f32.mrf.mxu0  ;;  %5961 = vmatmul.mubr.msk.bf16.gmra.mxu0 %vm1621_vm15, %v7118_v26 }
 0x1f6   : > { %8600 = vst [vmem:[#allocation21_spill] sm:$0xff] %v7547_v55  ;;  %8601 = vst [vmem:[#allocation22_spill] sm:$0xff] %v7549_v11  ;;  %5964 = vmatprep.mubr.msk.bf16.mxu0 %vm1621_vm15, %v8603_v45  ;;  %v8609_v11 = vld [vmem:[#allocation30_spill] sm:$0xff]  ;;  %v8613_v45 = vld [vmem:[#allocation31_spill] sm:$0xff] }
 0x1f7   : > { %v7553_v47 = vpop.f32.mrf.mxu1  ;;  %v7557_v60 = vpop.f32.mrf.mxu0 }
 0x1f8   : > { %8602 = vst [vmem:[#allocation23_spill] sm:$0xff] %v7553_v47  ;;  %8604 = vst [vmem:[#allocation24_spill] sm:$0xff] %v7557_v60 }
 0x1f9   : > { %v7559_v6 = vpop.f32.mrf.mxu1  ;;  %v7561_v28 = vpop.f32.mrf.mxu0 }
 0x1fa   : > { %8605 = vst [vmem:[#allocation25_spill] sm:$0xff] %v7559_v6  ;;  %8606 = vst [vmem:[#allocation26_spill] sm:$0xff] %v7561_v28  ;;  %v8615_v28 = vld [vmem:[#allocation32_spill] sm:$0xff] }
 0x1fb   : > { %v7563_v5 = vpop.f32.mrf.mxu1  ;;  %5847 = vmatmul.mubr.msk.bf16.gmra.mxu1 %vm1621_vm15, %v8608_v48  ;;  %v7569_v26 = vpop.f32.mrf.mxu0 }
 0x1fc   : > { %8607 = vst [vmem:[#allocation27_spill] sm:$0xff] %v7563_v5  ;;  %5850 = vmatprep.mubr.msk.bf16.mxu1 %vm1621_vm15, %v8609_v11  ;;  %8610 = vst [vmem:[#allocation28_spill] sm:$0xff] %v7569_v26 }
 0x1fd   : > { %v7571_v47 = vpop.f32.mrf.mxu1  ;;  %v7573_v55 = vpop.f32.mrf.mxu0  ;;  %5965 = vmatmul.mubr.msk.bf16.gmra.mxu0 %vm1621_vm15, %v8613_v45 }
 0x1fe   : > { %8611 = vst [vmem:[#allocation29_spill] sm:$0xff] %v7571_v47  ;;  %8612 = vst [vmem:[#allocation30_spill] sm:$0xff] %v7573_v55  ;;  %5968 = vmatprep.mubr.msk.bf16.mxu0 %vm1621_vm15, %v8615_v28  ;;  %v8623_v28 = vld [vmem:[#allocation33_spill] sm:$0xff] }
 0x1ff   : > { %v7577_v60 = vpop.f32.mrf.mxu1  ;;  %v7581_v5 = vpop.f32.mrf.mxu0 }
 0x200   : > { %8614 = vst [vmem:[#allocation31_spill] sm:$0xff] %v7577_v60  ;;  %8616 = vst [vmem:[#allocation32_spill] sm:$0xff] %v7581_v5 }
 0x201   : > { %v7583_v48 = vpop.f32.mrf.mxu1  ;;  %v7585_v6 = vpop.f32.mrf.mxu0 }
 0x202   : > { %8617 = vst [vmem:[#allocation43_spill] sm:$0xff] %v7583_v48  ;;  %8618 = vst [vmem:[#allocation44_spill] sm:$0xff] %v7585_v6  ;;  %v8625_v6 = vld [vmem:[#allocation34_spill] sm:$0xff] }
 0x203   : > { %v7587_v11 = vpop.f32.mrf.mxu1  ;;  %5851 = vmatmul.mubr.msk.bf16.gmra.mxu1 %vm1621_vm15, %v7150_v29  ;;  %v7593_v45 = vpop.f32.mrf.mxu0 }
 0x204   : > { %8619 = vst [vmem:[#allocation45_spill] sm:$0xff] %v7587_v11  ;;  %5854 = vmatprep.mubr.msk.bf16.mxu1 %vm1621_vm15, %v7153_v1  ;;  %8620 = vst [vmem:[#allocation46_spill] sm:$0xff] %v7593_v45 }
 0x205   : > { %v7595_v55 = vpop.f32.mrf.mxu1  ;;  %v7597_v26 = vpop.f32.mrf.mxu0  ;;  %5969 = vmatmul.mubr.msk.bf16.gmra.mxu0 %vm1621_vm15, %v8623_v28 }
 0x206   : > { %8621 = vst [vmem:[#allocation47_spill] sm:$0xff] %v7595_v55  ;;  %8622 = vst [vmem:[#allocation48_spill] sm:$0xff] %v7597_v26  ;;  %5972 = vmatprep.mubr.msk.bf16.mxu0 %vm1621_vm15, %v8625_v6 }
 0x207   : > { %v7601_v5 = vpop.f32.mrf.mxu1  ;;  %v7605_v11 = vpop.f32.mrf.mxu0 }
 0x208   : > { %8624 = vst [vmem:[#allocation33_spill] sm:$0xff] %v7601_v5  ;;  %8626 = vst [vmem:[#allocation34_spill] sm:$0xff] %v7605_v11 }
 0x209   : > { %v7607_v29 = vpop.f32.mrf.mxu1  ;;  %v7609_v48 = vpop.f32.mrf.mxu0 }
 0x20a   : > { %8627 = vst [vmem:[#allocation49_spill] sm:$0xff] %v7607_v29  ;;  %8628 = vst [vmem:[#allocation50_spill] sm:$0xff] %v7609_v48 }
 0x20b   : > { %v7611_v1 = vpop.f32.mrf.mxu1  ;;  %5855 = vmatmul.mubr.msk.bf16.gmra.mxu1 %vm1621_vm15, %v7168_v56  ;;  %v7617_v28 = vpop.f32.mrf.mxu0 }
 0x20c   : > { %8629 = vst [vmem:[#allocation51_spill] sm:$0xff] %v7611_v1  ;;  %5858 = vmatprep.mubr.msk.bf16.mxu1 %vm1621_vm15, %v7171_v36  ;;  %8630 = vst [vmem:[#allocation52_spill] sm:$0xff] %v7617_v28 }
 0x20d   : > { %v7619_v26 = vpop.f32.mrf.mxu1  ;;  %v7621_v45 = vpop.f32.mrf.mxu0  ;;  %5973 = vmatmul.mubr.msk.bf16.gmra.mxu0 %vm1621_vm15, %v7176_v17 }
 0x20e   : > { %8631 = vst [vmem:[#allocation53_spill] sm:$0xff] %v7619_v26  ;;  %8632 = vst [vmem:[#allocation54_spill] sm:$0xff] %v7621_v45  ;;  %5976 = vmatprep.mubr.msk.bf16.mxu0 %vm1621_vm15, %v7179_v39  ;;  %v8637_v45 = vld [vmem:[#allocation35_spill] sm:$0xff]  ;;  %v8640_v39 = vld [vmem:[#allocation36_spill] sm:$0xff] }
 0x20f   : > { %v7625_v6 = vpop.f32.mrf.mxu1  ;;  %v7629_v48 = vpop.f32.mrf.mxu0 }
 0x210   : > { %8633 = vst [vmem:[#allocation55_spill] sm:$0xff] %v7625_v6  ;;  %8634 = vst [vmem:[#allocation56_spill] sm:$0xff] %v7629_v48 }
 0x211   : > { %v7631_v56 = vpop.f32.mrf.mxu1  ;;  %v7633_v11 = vpop.f32.mrf.mxu0 }
 0x212   : > { %8635 = vst [vmem:[#allocation57_spill] sm:$0xff] %v7631_v56  ;;  %8636 = vst [vmem:[#allocation58_spill] sm:$0xff] %v7633_v11  ;;  %v8641_v11 = vld [vmem:[#allocation37_spill] sm:$0xff] }
 0x213   : > { %v7635_v36 = vpop.f32.mrf.mxu1  ;;  %5859 = vmatmul.mubr.msk.bf16.gmra.mxu1 %vm1621_vm15, %v7186_v27  ;;  %v7641_v17 = vpop.f32.mrf.mxu0 }
 0x214   : > { %5862 = vmatprep.mubr.msk.bf16.mxu1 %vm1621_vm15, %v8637_v45  ;;  %8638 = vst [vmem:[#allocation35_spill] sm:$0xff] %v7641_v17  ;;  %v8644_v17 = vld [vmem:[#allocation38_spill] sm:$0xff] }
 0x215   : > { %v7643_v28 = vpop.f32.mrf.mxu1  ;;  %v7645_v6 = vpop.f32.mrf.mxu0  ;;  %5977 = vmatmul.mubr.msk.bf16.gmra.mxu0 %vm1621_vm15, %v8640_v39 }
 0x216   : > { %8639 = vst [vmem:[#allocation59_spill] sm:$0xff] %v7645_v6  ;;  %5980 = vmatprep.mubr.msk.bf16.mxu0 %vm1621_vm15, %v8641_v11  ;;  %v8645_v6 = vld [vmem:[#allocation39_spill] sm:$0xff]  ;;  %v8648_v11 = vld [vmem:[#allocation40_spill] sm:$0xff] }
 0x217   : > { %v7649_v48 = vpop.f32.mrf.mxu1  ;;  %v7653_v56 = vpop.f32.mrf.mxu0 }
 0x218   : > { %8642 = vst [vmem:[#allocation36_spill] sm:$0xff] %v7653_v56 }
 0x219   : > { %v7655_v27 = vpop.f32.mrf.mxu1  ;;  %v7657_v26 = vpop.f32.mrf.mxu0 }
 0x21a   : > { %8643 = vst [vmem:[#allocation37_spill] sm:$0xff] %v7657_v26 }
 0x21b   : > { %v7659_v45 = vpop.f32.mrf.mxu1  ;;  %5863 = vmatmul.mubr.msk.bf16.gmra.mxu1 %vm1621_vm15, %v8644_v17  ;;  %v7665_v39 = vpop.f32.mrf.mxu0 }
 0x21c   : > { %5866 = vmatprep.mubr.msk.bf16.mxu1 %vm1621_vm15, %v8645_v6  ;;  %8646 = vst [vmem:[#allocation38_spill] sm:$0xff] %v7665_v39  ;;  %v8651_v6 = vld [vmem:[#allocation41_spill] sm:$0xff] }
 0x21d   : > { %v7667_v1 = vpop.f32.mrf.mxu1  ;;  %v7669_v29 = vpop.f32.mrf.mxu0  ;;  %5981 = vmatmul.mubr.msk.bf16.gmra.mxu0 %vm1621_vm15, %v8648_v11 }
 0x21e   : > { %8647 = vst [vmem:[#allocation39_spill] sm:$0xff] %v7669_v29 }
 0x21f   : > { %v7673_v56 = vpop.f32.mrf.mxu1  ;;  %v7675_v26 = vpop.f32.mrf.mxu0 }
 0x220   : > { %8649 = vst [vmem:[#allocation40_spill] sm:$0xff] %v7675_v26 }
 0x221   : > { %v7677_v5 = vpop.f32.mrf.mxu1  ;;  %v7679_v55 = vpop.f32.mrf.mxu0 }
 0x222   : > { %8650 = vst [vmem:[#allocation60_spill] sm:$0xff] %v7679_v55 }
 0x223   : > { %v7681_v17 = vpop.f32.mrf.mxu1  ;;  %5867 = vmatmul.mubr.msk.bf16.gmra.mxu1 %vm1621_vm15, %v8651_v6  ;;  %v7687_v29 = vpop.f32.mrf.mxu0 }
 0x224   : > { %5910 = vmatprep.mubr.msk.bf16.mxu1 %vm1621_vm15, %v7237_v12  ;;  %8652 = vst [vmem:[#allocation41_spill] sm:$0xff] %v7687_v29 }
 0x225   : > { %v7689_v39 = vpop.f32.mrf.mxu1  ;;  %v7691_v11 = vpop.f32.mrf.mxu0 }
 0x226   : > { %8653 = vst [vmem:[#allocation61_spill] sm:$0xff] %v7691_v11 }
 0x227   : > { %v7693_v60 = vpop.f32.mrf.mxu1  ;;  %v7695_v26 = vpop.f32.mrf.mxu0 }
 0x228   : > { %8654 = vst [vmem:[#allocation62_spill] sm:$0xff] %v7695_v26 }
 0x229   : > { %v7697_v47 = vpop.f32.mrf.mxu1  ;;  %v7699_v55 = vpop.f32.mrf.mxu0 }
 0x22a   : > { %8655 = vst [vmem:[#allocation63_spill] sm:$0xff] %v7699_v55 }
 0x22b   : > { %v7701_v16 = vpop.f32.mrf.mxu1  ;;  %5911 = vmatmul.mubr.msk.bf16.vlgmr.msra.gmra.mxu1 %vm1621_vm15, %v7240_v10  ;;  %v7707_v12 = vpop.f32.mrf.mxu0 }
 0x22c   : > { %5914 = vmatprep.mubr.msk.bf16.mxu1 %vm1621_vm15, %v7246_v63  ;;  %8656 = vst [vmem:[#allocation64_spill] sm:$0xff] %v7707_v12 }
 0x22d   : > { %v7709_v6 = vpop.f32.mrf.mxu1  ;;  %v7711_v11 = vpop.f32.mrf.mxu0 }
 0x22e   : > { %8657 = vst [vmem:[#allocation65_spill] sm:$0xff] %v7711_v11 }
 0x22f   : > { %v7713_v29 = vpop.f32.mrf.mxu1  ;;  %v7715_v26 = vpop.f32.mrf.mxu0 }
 0x230   : > { %8658 = vst [vmem:[#allocation66_spill] sm:$0xff] %v7715_v26 }
 0x231   : > { %v7717_v42 = vpop.f32.mrf.mxu1  ;;  %v7719_v55 = vpop.f32.mrf.mxu0 }
 0x232   : > { %8659 = vst [vmem:[#allocation67_spill] sm:$0xff] %v7717_v42  ;;  %8660 = vst [vmem:[#allocation68_spill] sm:$0xff] %v7719_v55 }
 0x233   : > { %v7721_v35 = vpop.f32.mrf.mxu1  ;;  %5915 = vmatmul.mubr.msk.bf16.gmra.mxu1 %vm1621_vm15, %v7254_v7  ;;  %v7727_v10 = vpop.f32.mrf.mxu0 }
 0x234   : > { %8661 = vst [vmem:[#allocation69_spill] sm:$0xff] %v7721_v35  ;;  %5918 = vmatprep.mubr.msk.bf16.mxu1 %vm1621_vm15, %v7259_v8  ;;  %8662 = vst [vmem:[#allocation70_spill] sm:$0xff] %v7727_v10 }
 0x235   : > { %v7729_v63 = vpop.f32.mrf.mxu1  ;;  %v7731_v11 = vpop.f32.mrf.mxu0 }
 0x236   : > { %8663 = vst [vmem:[#allocation71_spill] sm:$0xff] %v7731_v11 }
 0x237   : > { %v7733_v12 = vpop.f32.mrf.mxu1  ;;  %v7735_v26 = vpop.f32.mrf.mxu0 }
 0x238   : > { %8664 = vst [vmem:[#allocation72_spill] sm:$0xff] %v7735_v26 }
 0x239   : > { %v7737_v42 = vpop.f32.mrf.mxu1  ;;  %v7739_v55 = vpop.f32.mrf.mxu0 }
 0x23a   : > { %8665 = vst [vmem:[#allocation73_spill] sm:$0xff] %v7737_v42  ;;  %8666 = vst [vmem:[#allocation74_spill] sm:$0xff] %v7739_v55 }
 0x23b   : > { %v7741_v35 = vpop.f32.mrf.mxu1  ;;  %5919 = vmatmul.mubr.msk.bf16.gmra.mxu1 %vm1621_vm15, %v7265_v49  ;;  %v7747_v7 = vpop.f32.mrf.mxu0 }
 0x23c   : > { %8667 = vst [vmem:[#allocation75_spill] sm:$0xff] %v7741_v35  ;;  %5922 = vmatprep.mubr.msk.bf16.mxu1 %vm1621_vm15, %v7274_v32  ;;  %8668 = vst [vmem:[#allocation76_spill] sm:$0xff] %v7747_v7 }
 0x23d   : > { %v7749_v8 = vpop.f32.mrf.mxu1  ;;  %v7751_v11 = vpop.f32.mrf.mxu0 }
 0x23e   : > { %8669 = vst [vmem:[#allocation77_spill] sm:$0xff] %v7751_v11 }
 0x23f   : > { %v7753_v10 = vpop.f32.mrf.mxu1  ;;  %v7755_v26 = vpop.f32.mrf.mxu0 }
 0x240   : > { %8670 = vst [vmem:[#allocation78_spill] sm:$0xff] %v7755_v26 }
 0x241   : > { %v7757_v42 = vpop.f32.mrf.mxu1  ;;  %v7759_v55 = vpop.f32.mrf.mxu0 }
 0x242   : > { %8671 = vst [vmem:[#allocation79_spill] sm:$0xff] %v7757_v42  ;;  %8672 = vst [vmem:[#allocation80_spill] sm:$0xff] %v7759_v55 }
 0x243   : > { %v7761_v35 = vpop.f32.mrf.mxu1  ;;  %5923 = vmatmul.mubr.msk.bf16.gmra.mxu1 %vm1621_vm15, %v7280_v0  ;;  %v7767_v49 = vpop.f32.mrf.mxu0  ;;  %v8681_v0 = vld [vmem:[#allocation42_spill] sm:$0xff] }
 0x244   : > { %8673 = vst [vmem:[#allocation81_spill] sm:$0xff] %v7761_v35  ;;  %5926 = vmatprep.mubr.msk.bf16.mxu1 %vm1621_vm15, %v7287_v13  ;;  %8674 = vst [vmem:[#allocation82_spill] sm:$0xff] %v7767_v49 }
 0x245   : > { %v7769_v32 = vpop.f32.mrf.mxu1  ;;  %v7771_v11 = vpop.f32.mrf.mxu0 }
 0x246   : > { %8675 = vst [vmem:[#allocation83_spill] sm:$0xff] %v7771_v11 }
 0x247   : > { %v7773_v7 = vpop.f32.mrf.mxu1  ;;  %v7775_v26 = vpop.f32.mrf.mxu0 }
 0x248   : > { %8676 = vst [vmem:[#allocation84_spill] sm:$0xff] %v7773_v7  ;;  %8677 = vst [vmem:[#allocation85_spill] sm:$0xff] %v7775_v26 }
 0x249   : > { %v7777_v42 = vpop.f32.mrf.mxu1  ;;  %v7779_v55 = vpop.f32.mrf.mxu0 }
 0x24a   : > { %8678 = vst [vmem:[#allocation86_spill] sm:$0xff] %v7777_v42  ;;  %8679 = vst [vmem:[#allocation87_spill] sm:$0xff] %v7779_v55 }
 0x24b   : > { %v7781_v35 = vpop.f32.mrf.mxu1  ;;  %5927 = vmatmul.mubr.msk.bf16.gmra.mxu1 %vm1621_vm15, %v7292_v61  ;;  %v7787_v13 = vpop.f32.mrf.mxu0 }
 0x24c   : > { %8680 = vst [vmem:[#allocation88_spill] sm:$0xff] %v7781_v35  ;;  %5930 = vmatprep.mubr.msk.bf16.mxu1 %vm1621_vm15, %v8681_v0  ;;  %8682 = vst [vmem:[#allocation42_spill] sm:$0xff] %v7787_v13 }
 0x24d   : > { %v7789_v49 = vpop.f32.mrf.mxu1  ;;  %v7791_v11 = vpop.f32.mrf.mxu0 }
 0x24e   : > { %8683 = vst [vmem:[#allocation89_spill] sm:$0xff] %v7791_v11  ;;  %v1939_v11 = vadd.f32 %v7635_v36, %v7404_v38  ;;  %v1934_v38 = vadd.f32 %v7655_v27, %v7423_v46 }
 0x24f   : > { %v7793_v7 = vpop.f32.mrf.mxu1  ;;  %v7795_v26 = vpop.f32.mrf.mxu0 }
 0x250   : > { %8684 = vst [vmem:[#allocation90_spill] sm:$0xff] %v7795_v26 }
 0x251   : > { %v7797_v42 = vpop.f32.mrf.mxu1  ;;  %v7799_v55 = vpop.f32.mrf.mxu0 }
 0x252   : > { %8685 = vst [vmem:[#allocation91_spill] sm:$0xff] %v7797_v42  ;;  %8686 = vst [vmem:[#allocation92_spill] sm:$0xff] %v7799_v55  ;;  %v1931_v55 = vadd.f32 %v7643_v28, %v7413_v30 }
 0x253   : > { %v7801_v35 = vpop.f32.mrf.mxu1  ;;  %5931 = vmatmul.mubr.msk.bf16.gmra.mxu1 %vm1621_vm15, %v7308_v40  ;;  %v7807_v61 = vpop.f32.mrf.mxu0 }
 0x254   : > { %8687 = vst [vmem:[#allocation93_spill] sm:$0xff] %v7801_v35  ;;  %5934 = vmatprep.mubr.msk.bf16.mxu1 %vm1621_vm15, %v7313_v31  ;;  %8688 = vst [vmem:[#allocation94_spill] sm:$0xff] %v7807_v61  ;;  %v1942_v31 = vadd.f32 %v7649_v48, %v7418_v62  ;;  %v2353_v61 = vadd.f32 %v7393_v15, %v1939_v11  ;;  %v2351_v30 = vadd.f32 %v7398_v3, %v1931_v55 }
 0x255   : > { %v7809_v0 = vpop.f32.mrf.mxu1  ;;  %v7813_v26 = vpop.f32.mrf.mxu0  ;;  %v1955_v15 = vadd.f32 %v7659_v45, %v7436_v18  ;;  %v1958_v18 = vadd.f32 %v7673_v56, %v7445_v9 }
 0x256   : > { %8689 = vst [vmem:[#allocation95_spill] sm:$0xff] %v7809_v0 }
 0x257   : > { %v7815_v13 = vpop.f32.mrf.mxu1  ;;  %v7819_v35 = vpop.f32.mrf.mxu0 }
 0x259   : > { %v7821_v40 = vpop.f32.mrf.mxu1  ;;  %v7826_v0 = vpop.f32.mrf.mxu0 }
 0x25b   : > { %v5760_v42 = vpop.f32.mrf.mxu1  ;;  %5935 = vmatmul.mubr.msk.bf16.gmra.mxu1 %vm1621_vm15, %v7320_v33  ;;  %v7837_v28 = vpop.f32.mrf.mxu0  ;;  %v2354_v33 = vadd.f32 %v7401_v51, %v1942_v31  ;;  %v2357_v51 = vadd.f32 %v7421_v58, %v1955_v15  ;;  %v1971_v58 = vadd.f32 %v7681_v17, %v7463_v52  ;;  %v1974_v52 = vadd.f32 %v7693_v60, %v7473_v50 }
 0x25c   : > { %v7832_v36 = vadd.f32 %v5760_v42, %v2353_v61  ;;  %5938 = vmatprep.mubr.msk.bf16.mxu1 %vm1621_vm15, %v7328_v4  ;;  %v1947_v42 = vadd.f32 %v7667_v1, %v7443_v25  ;;  %v2352_v4 = vadd.f32 %v7408_v57, %v1934_v38  ;;  %v1950_v25 = vadd.f32 %v7677_v5, %v7451_v37 }
 0x25d   : > { %v2647_v62 = vpop.f32.mrf.mxu1  ;;  %v7844_v11 = vpop.f32.mrf.mxu0  ;;  %v1963_v5 = vadd.f32 %v7689_v39, %v7467_v14  ;;  %v1966_v14 = vadd.f32 %v7697_v47, %v7479_v19  ;;  %v1987_v60 = vadd.f32 %v7701_v16, %v7489_v43  ;;  %v1979_v19 = vadd.f32 %v7709_v6, %v7495_v21 }
 0x25e   : > { %v7841_v48 = vadd.f32 %v2647_v62, %v2351_v30  ;;  %v2355_v9 = vadd.f32 %v7426_v20, %v1947_v42  ;;  %v1990_v16 = vadd.f32 %v7713_v29, %v7501_v54 }
 0x25f   : > { %v5761_v46 = vpop.f32.mrf.mxu1  ;;  %v7851_v3 = vpop.f32.mrf.mxu0  ;;  %v2359_v39 = vadd.f32 %v7453_v23, %v1963_v5  ;;  %v2360_v23 = vadd.f32 %v7465_v22, %v1966_v14 }
 0x260   : > { %v7848_v27 = vadd.f32 %v5761_v46, %v2354_v33 }
 0x261   : > { %v2650_v55 = vpop.f32.mrf.mxu1  ;;  %v7858_v61 = vpop.f32.mrf.mxu0 }
 0x262   : > { %v7855_v45 = vadd.f32 %v2650_v55, %v2352_v4  ;;  %v2362_v4 = vadd.f32 %v7458_v59, %v1974_v52  ;;  %v8703_v52 = vld [vmem:[#allocation5_spill] sm:$0xff] }
 0x263   : > { %v5764_v31 = vpop.f32.mrf.mxu1  ;;  %5939 = vmatmul.mubr.msk.bf16.gmra.mxu1 %vm1621_vm15, %v7336_v44  ;;  %v7869_v1 = vpop.f32.mrf.mxu0  ;;  %v2358_v44 = vadd.f32 %v7430_v34, %v1958_v18  ;;  %v2361_v34 = vadd.f32 %v7447_v2, %v1971_v58  ;;  %v8698_v58 = vld [vmem:[#allocation67_spill] sm:$0xff] }
 0x264   : > { %v7864_v57 = vadd.f32 %v5764_v31, %v2357_v51  ;;  %5942 = vmatprep.mubr.msk.bf16.mxu1 %vm1621_vm15, %v7344_v24  ;;  %v2356_v24 = vadd.f32 %v7438_v41, %v1950_v25  ;;  %v8695_v31 = vld [vmem:[#allocation3_spill] sm:$0xff] }
 0x265   : > { %v2663_v56 = vpop.f32.mrf.mxu1  ;;  %v7876_v30 = vpop.f32.mrf.mxu0  ;;  %v2365_v59 = vadd.f32 %v8695_v31, %v1987_v60 }
 0x266   : > { %v7873_v38 = vadd.f32 %v2663_v56, %v2355_v9  ;;  %v8697_v56 = vld [vmem:[#allocation8_spill] sm:$0xff] }
 0x267   : > { %v5765_v37 = vpop.f32.mrf.mxu1  ;;  %v7883_v20 = vpop.f32.mrf.mxu0  ;;  %v1982_v21 = vadd.f32 %v8698_v58, %v8697_v56 }
 0x268   : > { %v7880_v62 = vadd.f32 %v5765_v37, %v2358_v44  ;;  %8690 = vst [vmem:[#allocation96_spill] sm:$0xff] %v7883_v20  ;;  %v8699_v44 = vld [vmem:[#allocation4_spill] sm:$0xff] }
 0x269   : > { %v2666_v15 = vpop.f32.mrf.mxu1  ;;  %v7890_v33 = vpop.f32.mrf.mxu0  ;;  %v2363_v22 = vadd.f32 %v8699_v44, %v1979_v19  ;;  %v8711_v44 = vld [vmem:[#allocation16_spill] sm:$0xff] }
 0x26a   : > { %v7887_v17 = vadd.f32 %v2666_v15, %v2356_v24  ;;  %8691 = vst [vmem:[#allocation97_spill] sm:$0xff] %v7890_v33  ;;  %v8701_v24 = vld [vmem:[#allocation11_spill] sm:$0xff]  ;;  %v8702_v15 = vld [vmem:[#allocation69_spill] sm:$0xff] }
 0x26b   : > { %v5768_v46 = vpop.f32.mrf.mxu1  ;;  %5943 = vmatmul.mubr.msk.bf16.gmra.mxu1 %vm1621_vm15, %v7352_v53  ;;  %v7899_v42 = vpop.f32.mrf.mxu0  ;;  %v2003_v54 = vadd.f32 %v8702_v15, %v8701_v24  ;;  %v8713_v24 = vld [vmem:[#allocation9_spill] sm:$0xff] }
 0x26c   : > { %v7896_v41 = vadd.f32 %v5768_v46, %v2361_v34  ;;  %8692 = vst [vmem:[#allocation98_spill] sm:$0xff] %v7899_v42  ;;  %v2366_v34 = vadd.f32 %v8703_v52, %v1990_v16 }
 0x26d   : > { %v2679_v50 = vpop.f32.mrf.mxu1  ;;  %v7906_v55 = vpop.f32.mrf.mxu0 }
 0x26e   : > { %v7903_v2 = vadd.f32 %v2679_v50, %v2359_v39  ;;  %8693 = vst [vmem:[#allocation99_spill] sm:$0xff] %v7906_v55  ;;  %v8705_v39 = vld [vmem:[#allocation13_spill] sm:$0xff]  ;;  %v8763_v55 = vld [vmem:[#allocation95_spill] sm:$0xff] }
 0x26f   : > { %v5769_v53 = vpop.f32.mrf.mxu1  ;;  %v7913_v18 = vpop.f32.mrf.mxu0  ;;  %v1995_v50 = vadd.f32 %v7729_v63, %v8705_v39 }
 0x270   : > { %v7910_v47 = vadd.f32 %v5769_v53, %v2362_v4  ;;  %8694 = vst [vmem:[#allocation100_spill] sm:$0xff] %v7913_v18  ;;  %v8706_v4 = vld [vmem:[#allocation6_spill] sm:$0xff]  ;;  %v8759_v18 = vld [vmem:[#allocation93_spill] sm:$0xff] }
 0x271   : > { %v2682_v51 = vpop.f32.mrf.mxu1  ;;  %v7920_v25 = vpop.f32.mrf.mxu0  ;;  %v2364_v53 = vadd.f32 %v8706_v4, %v1982_v21  ;;  %v2367_v21 = vadd.f32 %v8713_v24, %v1995_v50  ;;  %v8717_v4 = vld [vmem:[#allocation10_spill] sm:$0xff]  ;;  %v8722_v24 = vld [vmem:[#allocation23_spill] sm:$0xff] }
 0x272   : > { %v7917_v43 = vadd.f32 %v2682_v51, %v2360_v23  ;;  %8696 = vst [vmem:[#allocation3_spill] sm:$0xff] %v7920_v25  ;;  %v8708_v51 = vld [vmem:[#allocation14_spill] sm:$0xff]  ;;  %v8755_v25 = vld [vmem:[#allocation91_spill] sm:$0xff] }
 0x273   : > { %v5772_v9 = vpop.f32.mrf.mxu1  ;;  %v7927_v37 = vpop.f32.mrf.mxu0  ;;  %v2006_v31 = vadd.f32 %v7733_v12, %v8708_v51  ;;  %v8719_v51 = vld [vmem:[#allocation21_spill] sm:$0xff] }
 0x274   : > { %v7924_v6 = vadd.f32 %v5772_v9, %v2365_v59  ;;  %8700 = vst [vmem:[#allocation8_spill] sm:$0xff] %v7927_v37  ;;  %v8709_v9 = vld [vmem:[#allocation7_spill] sm:$0xff]  ;;  %v8745_v37 = vld [vmem:[#allocation88_spill] sm:$0xff] }
 0x275   : > { %v2695_v5 = vpop.f32.mrf.mxu1  ;;  %v7934_v46 = vpop.f32.mrf.mxu0  ;;  %v2369_v16 = vadd.f32 %v8709_v9, %v2003_v54  ;;  %v2370_v54 = vadd.f32 %v8717_v4, %v2006_v31  ;;  %v2011_v9 = vadd.f32 %v7749_v8, %v8719_v51 }
 0x276   : > { %v7931_v29 = vadd.f32 %v2695_v5, %v2363_v22  ;;  %8704 = vst [vmem:[#allocation67_spill] sm:$0xff] %v7934_v46  ;;  %v8712_v22 = vld [vmem:[#allocation73_spill] sm:$0xff]  ;;  %v8741_v46 = vld [vmem:[#allocation86_spill] sm:$0xff] }
 0x277   : > { %v5773_v14 = vpop.f32.mrf.mxu1  ;;  %v7941_v19 = vpop.f32.mrf.mxu0  ;;  %v1998_v63 = vadd.f32 %v8712_v22, %v8711_v44 }
 0x278   : > { %v7938_v60 = vadd.f32 %v5773_v14, %v2366_v34  ;;  %8707 = vst [vmem:[#allocation4_spill] sm:$0xff] %v7941_v19  ;;  %v8715_v34 = vld [vmem:[#allocation19_spill] sm:$0xff]  ;;  %v8737_v19 = vld [vmem:[#allocation84_spill] sm:$0xff] }
 0x279   : > { %v2698_v23 = vpop.f32.mrf.mxu1  ;;  %v7948_v56 = vpop.f32.mrf.mxu0  ;;  %v8716_v14 = vld [vmem:[#allocation75_spill] sm:$0xff] }
 0x27a   : > { %v7945_v59 = vadd.f32 %v2698_v23, %v2364_v53  ;;  %8710 = vst [vmem:[#allocation11_spill] sm:$0xff] %v7948_v56  ;;  %v2019_v12 = vadd.f32 %v8716_v14, %v8715_v34  ;;  %v2022_v34 = vadd.f32 %v7753_v10, %v8722_v24  ;;  %v8730_v56 = vld [vmem:[#allocation81_spill] sm:$0xff] }
 0x27b   : > { %v5776_v58 = vpop.f32.mrf.mxu1  ;;  %v7955_v15 = vpop.f32.mrf.mxu0 }
 0x27c   : > { %v7952_v5 = vadd.f32 %v5776_v58, %v2369_v16  ;;  %8714 = vst [vmem:[#allocation69_spill] sm:$0xff] %v7955_v15  ;;  %v8720_v58 = vld [vmem:[#allocation12_spill] sm:$0xff]  ;;  %v8726_v15 = vld [vmem:[#allocation79_spill] sm:$0xff] }
 0x27d   : > { %v2711_v52 = vpop.f32.mrf.mxu1  ;;  %v7962_v53 = vpop.f32.mrf.mxu0  ;;  %v2368_v50 = vadd.f32 %v8720_v58, %v1998_v63 }
 0x27e   : > { %v7959_v39 = vadd.f32 %v2711_v52, %v2367_v21  ;;  %8718 = vst [vmem:[#allocation5_spill] sm:$0xff] %v7962_v53  ;;  %v8723_v52 = vld [vmem:[#allocation15_spill] sm:$0xff]  ;;  %v8725_v53 = vld [vmem:[#allocation25_spill] sm:$0xff] }
 0x27f   : > { %v5777_v23 = vpop.f32.mrf.mxu1  ;;  %v7969_v44 = vpop.f32.mrf.mxu0  ;;  %v2373_v31 = vadd.f32 %v8723_v52, %v2019_v12  ;;  %v2014_v8 = vadd.f32 %v8726_v15, %v8725_v53 }
 0x280   : > { %v7966_v16 = vadd.f32 %v5777_v23, %v2370_v54  ;;  %8721 = vst [vmem:[#allocation13_spill] sm:$0xff] %v7969_v44  ;;  %v8727_v23 = vld [vmem:[#allocation17_spill] sm:$0xff]  ;;  %v8729_v44 = vld [vmem:[#allocation27_spill] sm:$0xff] }
 0x281   : > { %v2714_v22 = vpop.f32.mrf.mxu1  ;;  %v7976_v14 = vpop.f32.mrf.mxu0  ;;  %v2371_v63 = vadd.f32 %v8727_v23, %v2011_v9  ;;  %v2035_v10 = vadd.f32 %v8730_v56, %v8729_v44 }
 0x282   : > { %v7973_v21 = vadd.f32 %v2714_v22, %v2368_v50  ;;  %8724 = vst [vmem:[#allocation6_spill] sm:$0xff] %v7976_v14  ;;  %v8731_v22 = vld [vmem:[#allocation18_spill] sm:$0xff]  ;;  %v8733_v14 = vld [vmem:[#allocation29_spill] sm:$0xff] }
 0x283   : > { %v5780_v4 = vpop.f32.mrf.mxu1  ;;  %v7983_v51 = vpop.f32.mrf.mxu0  ;;  %v2374_v12 = vadd.f32 %v8731_v22, %v2022_v34  ;;  %v2027_v15 = vadd.f32 %v7769_v32, %v8733_v14 }
 0x284   : > { %v7980_v54 = vadd.f32 %v5780_v4, %v2373_v31  ;;  %8728 = vst [vmem:[#allocation14_spill] sm:$0xff] %v7983_v51  ;;  %v8734_v31 = vld [vmem:[#allocation20_spill] sm:$0xff]  ;;  %v8736_v51 = vld [vmem:[#allocation31_spill] sm:$0xff] }
 0x285   : > { %v2727_v58 = vpop.f32.mrf.mxu1  ;;  %v7990_v24 = vpop.f32.mrf.mxu0  ;;  %v2372_v9 = vadd.f32 %v8734_v31, %v2014_v8  ;;  %v2038_v56 = vadd.f32 %v8737_v19, %v8736_v51 }
 0x286   : > { %v7987_v50 = vadd.f32 %v2727_v58, %v2371_v63  ;;  %8732 = vst [vmem:[#allocation7_spill] sm:$0xff] %v7990_v24  ;;  %v8738_v63 = vld [vmem:[#allocation22_spill] sm:$0xff]  ;;  %v8740_v24 = vld [vmem:[#allocation43_spill] sm:$0xff] }
 0x287   : > { %v5781_v52 = vpop.f32.mrf.mxu1  ;;  %v7997_v4 = vpop.f32.mrf.mxu0  ;;  %v2377_v34 = vadd.f32 %v8738_v63, %v2035_v10  ;;  %v2030_v32 = vadd.f32 %v8741_v46, %v8740_v24 }
 0x288   : > { %v7994_v53 = vadd.f32 %v5781_v52, %v2374_v12  ;;  %8735 = vst [vmem:[#allocation16_spill] sm:$0xff] %v7997_v4  ;;  %v8742_v12 = vld [vmem:[#allocation24_spill] sm:$0xff]  ;;  %v8744_v4 = vld [vmem:[#allocation45_spill] sm:$0xff] }
 0x289   : > { %v2730_v23 = vpop.f32.mrf.mxu1  ;;  %v8004_v58 = vpop.f32.mrf.mxu0  ;;  %v2375_v8 = vadd.f32 %v8742_v12, %v2027_v15  ;;  %v2051_v19 = vadd.f32 %v8745_v37, %v8744_v4 }
 0x28a   : > { %v8001_v44 = vadd.f32 %v2730_v23, %v2372_v9  ;;  %8739 = vst [vmem:[#allocation73_spill] sm:$0xff] %v8004_v58  ;;  %v8746_v9 = vld [vmem:[#allocation26_spill] sm:$0xff]  ;;  %v8748_v58 = vld [vmem:[#allocation47_spill] sm:$0xff] }
 0x28b   : > { %v5784_v22 = vpop.f32.mrf.mxu1  ;;  %v8011_v52 = vpop.f32.mrf.mxu0  ;;  %v2378_v10 = vadd.f32 %v8746_v9, %v2038_v56  ;;  %v2043_v46 = vadd.f32 %v7789_v49, %v8748_v58 }
 0x28c   : > { %v8008_v14 = vadd.f32 %v5784_v22, %v2377_v34  ;;  %8743 = vst [vmem:[#allocation9_spill] sm:$0xff] %v8011_v52  ;;  %v8749_v34 = vld [vmem:[#allocation28_spill] sm:$0xff]  ;;  %v8751_v52 = vld [vmem:[#allocation33_spill] sm:$0xff] }
 0x28d   : > { %v2743_v31 = vpop.f32.mrf.mxu1  ;;  %v8018_v23 = vpop.f32.mrf.mxu0  ;;  %v2376_v15 = vadd.f32 %v8749_v34, %v2030_v32  ;;  %v2054_v37 = vadd.f32 %v7793_v7, %v8751_v52 }
 0x28e   : > { %v8015_v51 = vadd.f32 %v2743_v31, %v2375_v8  ;;  %8747 = vst [vmem:[#allocation19_spill] sm:$0xff] %v8018_v23  ;;  %v8752_v8 = vld [vmem:[#allocation30_spill] sm:$0xff]  ;;  %v8754_v23 = vld [vmem:[#allocation49_spill] sm:$0xff] }
 0x28f   : > { %v5785_v63 = vpop.f32.mrf.mxu1  ;;  %v8025_v22 = vpop.f32.mrf.mxu0  ;;  %v2381_v56 = vadd.f32 %v8752_v8, %v2051_v19  ;;  %v2046_v49 = vadd.f32 %v8755_v25, %v8754_v23 }
 0x290   : > { %v8022_v24 = vadd.f32 %v5785_v63, %v2378_v10  ;;  %8750 = vst [vmem:[#allocation75_spill] sm:$0xff] %v8025_v22  ;;  %v8756_v10 = vld [vmem:[#allocation32_spill] sm:$0xff]  ;;  %v8758_v22 = vld [vmem:[#allocation51_spill] sm:$0xff] }
 0x291   : > { %v2746_v12 = vpop.f32.mrf.mxu1  ;;  %v8032_v31 = vpop.f32.mrf.mxu0  ;;  %v2379_v32 = vadd.f32 %v8756_v10, %v2043_v46  ;;  %v2067_v7 = vadd.f32 %v8759_v18, %v8758_v22  ;;  %v8765_v10 = vld [vmem:[#allocation55_spill] sm:$0xff]  ;;  %v8766_v18 = vld [vmem:[#allocation48_spill] sm:$0xff] }
 0x292   : > { %v8029_v4 = vadd.f32 %v2746_v12, %v2376_v15  ;;  %8753 = vst [vmem:[#allocation10_spill] sm:$0xff] %v8032_v31  ;;  %v8760_v15 = vld [vmem:[#allocation44_spill] sm:$0xff]  ;;  %v8762_v31 = vld [vmem:[#allocation53_spill] sm:$0xff] }
 0x293   : > { %v5788_v9 = vpop.f32.mrf.mxu1  ;;  %v8039_v63 = vpop.f32.mrf.mxu0  ;;  %v2382_v19 = vadd.f32 %v8760_v15, %v2054_v37  ;;  %v2059_v25 = vadd.f32 %v8763_v55, %v8762_v31  ;;  %v2385_v22 = vadd.f32 %v8766_v18, %v2067_v7  ;;  %v8769_v55 = vld [vmem:[#allocation34_spill] sm:$0xff]  ;;  %v8772_v7 = vld [vmem:[#allocation52_spill] sm:$0xff] }
 0x294   : > { %v8036_v58 = vadd.f32 %v5788_v9, %v2381_v56  ;;  %8757 = vst [vmem:[#allocation21_spill] sm:$0xff] %v8039_v63  ;;  %v8764_v56 = vld [vmem:[#allocation46_spill] sm:$0xff]  ;;  %v2070_v63 = vadd.f32 %v7815_v13, %v8765_v10 }
 0x295   : > { %v2759_v34 = vpop.f32.mrf.mxu1  ;;  %v8046_v8 = vpop.f32.mrf.mxu0  ;;  %v2380_v46 = vadd.f32 %v8764_v56, %v2046_v49  ;;  %v2383_v31 = vadd.f32 %v8769_v55, %v2059_v25 }
 0x296   : > { %v8043_v52 = vadd.f32 %v2759_v34, %v2379_v32  ;;  %8761 = vst [vmem:[#allocation12_spill] sm:$0xff] %v8046_v8  ;;  %v8768_v34 = vld [vmem:[#allocation57_spill] sm:$0xff] }
 0x297   : > { %v5789_v12 = vpop.f32.mrf.mxu1  ;;  %v8058_v37 = vpop.f32.mrf.mxu0  ;;  %v2062_v15 = vadd.f32 %v7821_v40, %v8768_v34  ;;  %v8773_v40 = vld [vmem:[#allocation54_spill] sm:$0xff] }
 0x298   : > { %v8050_v23 = vadd.f32 %v5789_v12, %v2382_v19  ;;  %8767 = vst [vmem:[#allocation23_spill] sm:$0xff] %v8058_v37  ;;  %v8770_v12 = vld [vmem:[#allocation50_spill] sm:$0xff] }
 0x299   : > { %v2762_v9 = vpop.f32.mrf.mxu1  ;;  %v2386_v56 = vadd.f32 %v8770_v12, %v2070_v63  ;;  %v8068_v13 = vpop.f32.mrf.mxu0  ;;  %v2384_v10 = vadd.f32 %v8772_v7, %v2062_v15  ;;  %v8775_v63 = vld [vmem:[#allocation56_spill] sm:$0xff]  ;;  %v8776_v12 = vld [vmem:[#allocation58_spill] sm:$0xff] }
 0x29a   : > { %v8055_v42 = vadd.f32 %v2762_v9, %v2380_v46  ;;  %8771 = vst [vmem:[#allocation15_spill] sm:$0xff] %v8068_v13  ;;  %v3237_v55 = vadd.f32 %v8775_v63, %v7841_v48  ;;  %v3240_v15 = vadd.f32 %v8776_v12, %v7848_v27  ;;  %v8779_v27 = vld [vmem:[#allocation36_spill] sm:$0xff] }
 0x29b   : > { %v5792_v32 = vpop.f32.mrf.mxu1 }
 0x29c   : > { %v8062_v8 = vadd.f32 %v5792_v32, %v2385_v22  ;;  %v3239_v22 = vadd.f32 %v8773_v40, %v7832_v36  ;;  %v8077_v32 = vpop.f32.mrf.mxu0  ;;  %v8777_v36 = vld [vmem:[#allocation35_spill] sm:$0xff] }
 0x29d   : > { %v2775_v19 = vpop.f32.mrf.mxu1  ;;  %8774 = vst [vmem:[#allocation25_spill] sm:$0xff] %v8077_v32 }
 0x29e   : > { %v8065_v49 = vadd.f32 %v2775_v19, %v2383_v31 }
 0x29f   : > { %v5793_v46 = vpop.f32.mrf.mxu1 }
 0x2a0   : > { %v8070_v9 = vadd.f32 %v5793_v46, %v2386_v56  ;;  %v8087_v56 = vpop.f32.mrf.mxu0 }
 0x2a1   : > { %v2778_v18 = vpop.f32.mrf.mxu1 }
 0x2a2   : > { %v8073_v37 = vadd.f32 %v2778_v18, %v2384_v10  ;;  %v3238_v10 = vadd.f32 %v8777_v36, %v7855_v45 }
 0x2a3   : > { %v5836_v25 = vpop.f32.mrf.mxu1 }
 0x2a4   : > { %v8079_v34 = vadd.f32 %v5836_v25, %v3239_v22  ;;  %v8778_v22 = vld [vmem:[#allocation59_spill] sm:$0xff]  ;;  %v8097_v25 = vpop.f32.mrf.mxu0 }
 0x2a5   : > { %v3408_v31 = vpop.f32.mrf.mxu1  ;;  %v3243_v48 = vadd.f32 %v8778_v22, %v7864_v57  ;;  %v8781_v57 = vld [vmem:[#allocation38_spill] sm:$0xff] }
 0x2a6   : > { %v8083_v19 = vadd.f32 %v3408_v31, %v3237_v55  ;;  %v3241_v31 = vadd.f32 %v8779_v27, %v7873_v38  ;;  %v8107_v36 = vpop.f32.mrf.mxu0  ;;  %v3242_v22 = vadd.f32 %v8781_v57, %v7887_v17 }
 0x2a7   : > { %v5837_v46 = vpop.f32.mrf.mxu1 }
 0x2a8   : > { %v8089_v7 = vadd.f32 %v5837_v46, %v3240_v15  ;;  %v8780_v46 = vld [vmem:[#allocation37_spill] sm:$0xff]  ;;  %v8117_v27 = vpop.f32.mrf.mxu0 }
 0x2a9   : > { %v3411_v18 = vpop.f32.mrf.mxu1  ;;  %v3244_v45 = vadd.f32 %v8780_v46, %v7880_v62  ;;  %v8783_v62 = vld [vmem:[#allocation40_spill] sm:$0xff] }
 0x2aa   : > { %v8093_v40 = vadd.f32 %v3411_v18, %v3238_v10  ;;  %v3245_v46 = vadd.f32 %v8783_v62, %v7903_v2  ;;  %v8127_v57 = vpop.f32.mrf.mxu0 }
 0x2ab   : > { %v5840_v63 = vpop.f32.mrf.mxu1 }
 0x2ac   : > { %v8099_v55 = vadd.f32 %v5840_v63, %v3243_v48  ;;  %v8782_v63 = vld [vmem:[#allocation39_spill] sm:$0xff]  ;;  %v8137_v62 = vpop.f32.mrf.mxu0 }
 0x2ad   : > { %v3424_v12 = vpop.f32.mrf.mxu1  ;;  %v3247_v38 = vadd.f32 %v8782_v63, %v7896_v41  ;;  %v8785_v41 = vld [vmem:[#allocation41_spill] sm:$0xff] }
 0x2ae   : > { %v8103_v15 = vadd.f32 %v3424_v12, %v3241_v31  ;;  %v3246_v63 = vadd.f32 %v8785_v41, %v7917_v43  ;;  %v8147_v41 = vpop.f32.mrf.mxu0 }
 0x2af   : > { %v5841_v10 = vpop.f32.mrf.mxu1 }
 0x2b0   : > { %v8109_v18 = vadd.f32 %v5841_v10, %v3244_v45  ;;  %v8784_v10 = vld [vmem:[#allocation60_spill] sm:$0xff] }
 0x2b1   : > { %v3427_v32 = vpop.f32.mrf.mxu1  ;;  %v3248_v17 = vadd.f32 %v8784_v10, %v7910_v47  ;;  %v8788_v47 = vld [vmem:[#allocation62_spill] sm:$0xff] }
 0x2b2   : > { %v8113_v48 = vadd.f32 %v3427_v32, %v3242_v22  ;;  %v3249_v10 = vadd.f32 %v8788_v47, %v7931_v29  ;;  %v8157_v47 = vpop.f32.mrf.mxu0 }
 0x2b3   : > { %v5844_v31 = vpop.f32.mrf.mxu1 }
 0x2b4   : > { %v8119_v12 = vadd.f32 %v5844_v31, %v3247_v38  ;;  %v8787_v31 = vld [vmem:[#allocation61_spill] sm:$0xff] }
 0x2b5   : > { %v3440_v13 = vpop.f32.mrf.mxu1  ;;  %v3251_v2 = vadd.f32 %v8787_v31, %v7924_v6  ;;  %v8791_v6 = vld [vmem:[#allocation64_spill] sm:$0xff] }
 0x2b6   : > { %v8123_v45 = vadd.f32 %v3440_v13, %v3245_v46  ;;  %v3250_v31 = vadd.f32 %v8791_v6, %v7945_v59  ;;  %v8167_v6 = vpop.f32.mrf.mxu0 }
 0x2b7   : > { %v5845_v32 = vpop.f32.mrf.mxu1 }
 0x2b8   : > { %v8129_v22 = vadd.f32 %v5845_v32, %v3248_v17  ;;  %v8790_v32 = vld [vmem:[#allocation63_spill] sm:$0xff] }
 0x2b9   : > { %v3443_v33 = vpop.f32.mrf.mxu1  ;;  %v3252_v43 = vadd.f32 %v8790_v32, %v7938_v60  ;;  %v8794_v60 = vld [vmem:[#allocation66_spill] sm:$0xff] }
 0x2ba   : > { %v8133_v38 = vadd.f32 %v3443_v33, %v3246_v63  ;;  %v3253_v32 = vadd.f32 %v8794_v60, %v7959_v39  ;;  %v8177_v60 = vpop.f32.mrf.mxu0 }
 0x2bb   : > { %v5848_v13 = vpop.f32.mrf.mxu1 }
 0x2bc   : > { %8786 = vst [vmem:[#allocation79_spill] sm:$0xff] %v8133_v38  ;;  %v8139_v46 = vadd.f32 %v5848_v13, %v3251_v2  ;;  %v8793_v13 = vld [vmem:[#allocation65_spill] sm:$0xff] }
 0x2bd   : > { %v3456_v20 = vpop.f32.mrf.mxu1  ;;  %v3255_v29 = vadd.f32 %v8793_v13, %v7952_v5  ;;  %v8797_v5 = vld [vmem:[#allocation70_spill] sm:$0xff] }
 0x2be   : > { %v8143_v17 = vadd.f32 %v3456_v20, %v3249_v10  ;;  %v3254_v13 = vadd.f32 %v8797_v5, %v7973_v21  ;;  %v8187_v5 = vpop.f32.mrf.mxu0 }
 0x2bf   : > { %v5849_v33 = vpop.f32.mrf.mxu1 }
 0x2c0   : > { %8789 = vst [vmem:[#allocation17_spill] sm:$0xff] %v8143_v17  ;;  %v8149_v63 = vadd.f32 %v5849_v33, %v3252_v43  ;;  %v8796_v33 = vld [vmem:[#allocation68_spill] sm:$0xff] }
 0x2c1   : > { %v3459_v38 = vpop.f32.mrf.mxu1  ;;  %v3256_v59 = vadd.f32 %v8796_v33, %v7966_v16  ;;  %v8800_v16 = vld [vmem:[#allocation72_spill] sm:$0xff] }
 0x2c2   : > { %v8153_v2 = vadd.f32 %v3459_v38, %v3250_v31  ;;  %v3257_v33 = vadd.f32 %v8800_v16, %v7987_v50  ;;  %v8197_v16 = vpop.f32.mrf.mxu0 }
 0x2c3   : > { %v5852_v20 = vpop.f32.mrf.mxu1 }
 0x2c4   : > { %8792 = vst [vmem:[#allocation27_spill] sm:$0xff] %v8153_v2  ;;  %v8159_v10 = vadd.f32 %v5852_v20, %v3255_v29  ;;  %v8799_v20 = vld [vmem:[#allocation71_spill] sm:$0xff] }
 0x2c5   : > { %v3472_v17 = vpop.f32.mrf.mxu1  ;;  %v3259_v39 = vadd.f32 %v8799_v20, %v7980_v54  ;;  %v8803_v54 = vld [vmem:[#allocation76_spill] sm:$0xff] }
 0x2c6   : > { %v8163_v43 = vadd.f32 %v3472_v17, %v3253_v32  ;;  %v3258_v20 = vadd.f32 %v8803_v54, %v8001_v44  ;;  %v8207_v54 = vpop.f32.mrf.mxu0 }
 0x2c7   : > { %v5853_v38 = vpop.f32.mrf.mxu1 }
 0x2c8   : > { %8795 = vst [vmem:[#allocation81_spill] sm:$0xff] %v8163_v43  ;;  %v8169_v31 = vadd.f32 %v5853_v38, %v3256_v59  ;;  %v8802_v38 = vld [vmem:[#allocation74_spill] sm:$0xff] }
 0x2c9   : > { %v3475_v2 = vpop.f32.mrf.mxu1  ;;  %v3260_v21 = vadd.f32 %v8802_v38, %v7994_v53  ;;  %v8806_v53 = vld [vmem:[#allocation78_spill] sm:$0xff] }
 0x2ca   : > { %v8173_v29 = vadd.f32 %v3475_v2, %v3254_v13  ;;  %v3261_v38 = vadd.f32 %v8806_v53, %v8015_v51  ;;  %v8217_v53 = vpop.f32.mrf.mxu0 }
 0x2cb   : > { %v5856_v17 = vpop.f32.mrf.mxu1 }
 0x2cc   : > { %8798 = vst [vmem:[#allocation18_spill] sm:$0xff] %v8173_v29  ;;  %v8179_v32 = vadd.f32 %v5856_v17, %v3259_v39  ;;  %v8805_v17 = vld [vmem:[#allocation77_spill] sm:$0xff] }
 0x2cd   : > { %v3488_v43 = vpop.f32.mrf.mxu1  ;;  %v3263_v50 = vadd.f32 %v8805_v17, %v8008_v14  ;;  %v8809_v14 = vld [vmem:[#allocation82_spill] sm:$0xff] }
 0x2ce   : > { %v8183_v59 = vadd.f32 %v3488_v43, %v3257_v33  ;;  %v3262_v17 = vadd.f32 %v8809_v14, %v8029_v4  ;;  %v8227_v14 = vpop.f32.mrf.mxu0 }
 0x2cf   : > { %v5857_v2 = vpop.f32.mrf.mxu1 }
 0x2d0   : > { %8801 = vst [vmem:[#allocation29_spill] sm:$0xff] %v8183_v59  ;;  %v8189_v13 = vadd.f32 %v5857_v2, %v3260_v21  ;;  %v8808_v2 = vld [vmem:[#allocation80_spill] sm:$0xff] }
 0x2d1   : > { %v3491_v29 = vpop.f32.mrf.mxu1  ;;  %v3264_v44 = vadd.f32 %v8808_v2, %v8022_v24  ;;  %v8812_v24 = vld [vmem:[#allocation85_spill] sm:$0xff] }
 0x2d2   : > { %v8193_v39 = vadd.f32 %v3491_v29, %v3258_v20  ;;  %v3265_v2 = vadd.f32 %v8812_v24, %v8043_v52  ;;  %v8237_v24 = vpop.f32.mrf.mxu0 }
 0x2d3   : > { %v5860_v43 = vpop.f32.mrf.mxu1 }
 0x2d4   : > { %8804 = vst [vmem:[#allocation20_spill] sm:$0xff] %v8193_v39  ;;  %v8199_v33 = vadd.f32 %v5860_v43, %v3263_v50  ;;  %v8811_v43 = vld [vmem:[#allocation83_spill] sm:$0xff] }
 0x2d5   : > { %v3504_v59 = vpop.f32.mrf.mxu1  ;;  %v3267_v51 = vadd.f32 %v8811_v43, %v8036_v58  ;;  %v8815_v58 = vld [vmem:[#allocation42_spill] sm:$0xff] }
 0x2d6   : > { %v8203_v21 = vadd.f32 %v3504_v59, %v3261_v38  ;;  %v3266_v43 = vadd.f32 %v8815_v58, %v8055_v42  ;;  %v8818_v42 = vld [vmem:[#allocation92_spill] sm:$0xff] }
 0x2d7   : > { %v5861_v29 = vpop.f32.mrf.mxu1 }
 0x2d8   : > { %8807 = vst [vmem:[#allocation31_spill] sm:$0xff] %v8203_v21  ;;  %v8209_v20 = vadd.f32 %v5861_v29, %v3264_v44  ;;  %v8814_v29 = vld [vmem:[#allocation87_spill] sm:$0xff] }
 0x2d9   : > { %v3507_v39 = vpop.f32.mrf.mxu1  ;;  %v3268_v4 = vadd.f32 %v8814_v29, %v8050_v23  ;;  %v8817_v23 = vld [vmem:[#allocation90_spill] sm:$0xff] }
 0x2da   : > { %v8213_v50 = vadd.f32 %v3507_v39, %v3262_v17  ;;  %v3269_v29 = vadd.f32 %v8817_v23, %v8065_v49  ;;  %v3992_v49 = vadd.f32 %v7813_v26, %v8079_v34  ;;  %v3993_v26 = vadd.f32 %v7826_v0, %v8089_v7 }
 0x2db   : > { %v5864_v59 = vpop.f32.mrf.mxu1 }
 0x2dc   : > { %8810 = vst [vmem:[#allocation84_spill] sm:$0xff] %v8213_v50  ;;  %v8219_v38 = vadd.f32 %v5864_v59, %v3267_v51  ;;  %v8816_v59 = vld [vmem:[#allocation89_spill] sm:$0xff] }
 0x2dd   : > { %v3520_v21 = vpop.f32.mrf.mxu1  ;;  %v3271_v52 = vadd.f32 %v8816_v59, %v8062_v8  ;;  %v8819_v8 = vld [vmem:[#allocation94_spill] sm:$0xff] }
 0x2de   : > { %v8223_v44 = vadd.f32 %v3520_v21, %v3265_v2  ;;  %v3270_v59 = vadd.f32 %v8819_v8, %v8073_v37 }
 0x2df   : > { %v5865_v39 = vpop.f32.mrf.mxu1 }
 0x2e0   : > { %8813 = vst [vmem:[#allocation22_spill] sm:$0xff] %v8223_v44  ;;  %v8229_v17 = vadd.f32 %v5865_v39, %v3268_v4  ;;  %v3272_v39 = vadd.f32 %v8818_v42, %v8070_v9  ;;  %v3990_v9 = vadd.f32 %v7819_v35, %v8083_v19  ;;  %v8264_v42 = vld [vmem:[%s8510_s5] ss:$0 sm:$0xff] }
 0x2e1   : > { %v3523_v50 = vpop.f32.mrf.mxu1 }
 0x2e2   : > { %v8233_v51 = vadd.f32 %v3523_v50, %v3266_v43  ;;  %v8247_v50 = vpop.f32.mrf.mxu0 }
 0x2e3   : > { %v5868_v21 = vpop.f32.mrf.mxu1 }
 0x2e4   : > { %v8239_v2 = vadd.f32 %v5868_v21, %v3271_v52  ;;  %v8257_v23 = vpop.f32.mrf.mxu0 }
 0x2e5   : > { %v3536_v44 = vpop.f32.mrf.mxu1 }
 0x2e6   : > { %v8243_v4 = vadd.f32 %v3536_v44, %v3269_v29  ;;  %v8270_v34 = vpop.f32.mrf.mxu0 }
 0x2e7   : > { %v5869_v58 = vpop.f32.mrf.mxu1 }
 0x2e8   : > { %v8249_v43 = vadd.f32 %v5869_v58, %v3272_v39 }
 0x2e9   : > { %v3539_v52 = vpop.f32.mrf.mxu1 }
 0x2ea   : > { %v8253_v21 = vadd.f32 %v3539_v52, %v3270_v59  ;;  %v3991_v52 = vadd.f32 %v7837_v28, %v8093_v40  ;;  %v3994_v40 = vadd.f32 %v7851_v3, %v8103_v15 }
 0x2eb   : > { %v5912_v44 = vpop.f32.mrf.mxu1 }
 0x2ec   : > { %v4439_v29 = vadd.f32 %v5912_v44, %v3992_v49  ;;  %v8283_v44 = vpop.f32.mrf.mxu0 }
 0x2ed   : > { %v4294_v39 = vpop.f32.mrf.mxu1 }
 0x2ee   : > { %v4753_v37 = vadd.f32 %v8087_v56, %v4439_v29  ;;  %v4437_v58 = vadd.f32 %v4294_v39, %v3990_v9  ;;  %v3996_v29 = vadd.f32 %v7844_v11, %v8099_v55  ;;  %v3997_v11 = vadd.f32 %v7858_v61, %v8109_v18  ;;  %v8295_v3 = vpop.f32.mrf.mxu0 }
 0x2ef   : > { %v5913_v8 = vpop.f32.mrf.mxu1  ;;  %v3995_v61 = vadd.f32 %v7869_v1, %v8113_v48  ;;  %v4000_v1 = vadd.f32 %v7876_v30, %v8119_v12 }
 0x2f0   : > { %v4796_v59 = vadd.f32 %v8264_v42, %v4753_v37  ;;  %v4751_v35 = vadd.f32 %v8097_v25, %v4437_v58  ;;  %v4440_v19 = vadd.f32 %v5913_v8, %v3993_v26 }
 0x2f1   : > { %v4297_v49 = vpop.f32.mrf.mxu1 }
 0x2f2   : > { %vm4832_vm2 = vcmp.gt.f32.partialorder %v4796_v59, 0.0  ;;  %v4868_v0 = vmul.f32 0.1, %v4796_v59  ;;  %v4794_v56 = vadd.f32 %v8264_v42, %v4751_v35  ;;  %v4754_v7 = vadd.f32 %v8107_v36, %v4440_v19 }
 0x2f3   : > { %v4438_v25 = vadd.f32 %v4297_v49, %v3991_v52  ;;  %v5916_v28 = vpop.f32.mrf.mxu1 }
 0x2f4   : > { %v4904_v9 = vsel %vm4832_vm2, %v4796_v59, %v4868_v0  ;;  %vm4830_vm13 = vcmp.gt.f32.partialorder %v4794_v56, 0.0  ;;  %v4866_v39 = vmul.f32 0.1, %v4794_v56  ;;  %v4797_v37 = vadd.f32 %v8264_v42, %v4754_v7 }
 0x2f5   : > { %4940 = vst.msk [vmem:[%s8279_s9 + $0x10] sm:$0xff] %vm412_vm1, %v4904_v9  ;;  %v4752_v36 = vadd.f32 %v8117_v27, %v4438_v25  ;;  %v4443_v58 = vadd.f32 %v5916_v28, %v3996_v29  ;;  %v4310_v26 = vpop.f32.mrf.mxu1  ;;  %v8309_v29 = vpop.f32.mrf.mxu0 }
 0x2f6   : > { %v4902_v55 = vsel %vm4830_vm13, %v4794_v56, %v4866_v39  ;;  %vm4833_vm15 = vcmp.gt.f32.partialorder %v4797_v37, 0.0  ;;  %v4869_v8 = vmul.f32 0.1, %v4797_v37  ;;  %v4441_v35 = vadd.f32 %v4310_v26, %v3994_v40 }
 0x2f7   : > { %4938 = vst.msk [vmem:[%s8279_s9] sm:$0xff] %vm412_vm1, %v4902_v55  ;;  %v4795_v15 = vadd.f32 %v8264_v42, %v4752_v36  ;;  %v4757_v59 = vadd.f32 %v8127_v57, %v4443_v58  ;;  %v5917_v19 = vpop.f32.mrf.mxu1  ;;  %v8820_v36 = vld [vmem:[#allocation96_spill] sm:$0xff] }
 0x2f8   : > { %v4905_v27 = vsel %vm4833_vm15, %v4797_v37, %v4869_v8  ;;  %v4755_v52 = vadd.f32 %v8137_v62, %v4441_v35  ;;  %v4444_v49 = vadd.f32 %v5917_v19, %v3997_v11  ;;  %v3998_v58 = vadd.f32 %v8820_v36, %v8123_v45  ;;  %v8821_v11 = vld [vmem:[#allocation97_spill] sm:$0xff]  ;;  %v8324_v35 = vpop.f32.mrf.mxu0  ;;  %v8823_v19 = vld [vmem:[#allocation98_spill] sm:$0xff] }
 0x2f9   : > { %4941 = vst.msk [vmem:[%s8279_s9 + $0x18] sm:$0xff] %vm412_vm1, %v4905_v27  ;;  %vm4831_vm7 = vcmp.gt.f32.partialorder %v4795_v15, 0.0  ;;  %v4867_v18 = vmul.f32 0.1, %v4795_v15  ;;  %v4800_v0 = vadd.f32 %v8264_v42, %v4757_v59  ;;  %v4313_v56 = vpop.f32.mrf.mxu1  ;;  %v4001_v55 = vadd.f32 %v8821_v11, %v8129_v22  ;;  %v8822_v59 = vld [vmem:[#allocation79_spill] sm:$0xff] }
 0x2fa   : > { %v4798_v7 = vadd.f32 %v8264_v42, %v4755_v52  ;;  %v4758_v57 = vadd.f32 %v8147_v41, %v4444_v49  ;;  %v4442_v25 = vadd.f32 %v4313_v56, %v3995_v61  ;;  %v3999_v22 = vadd.f32 %v8823_v19, %v8822_v59 }
 0x2fb   : > { %v4903_v62 = vsel %vm4831_vm7, %v4795_v15, %v4867_v18  ;;  %vm4836_vm8 = vcmp.gt.f32.partialorder %v4800_v0, 0.0  ;;  %v4872_v28 = vmul.f32 0.1, %v4800_v0  ;;  %v5920_v48 = vpop.f32.mrf.mxu1 }
 0x2fc   : > { %4939 = vst.msk [vmem:[%s8279_s9 + $0x8] sm:$0xff] %vm412_vm1, %v4903_v62  ;;  %vm4834_vm9 = vcmp.gt.f32.partialorder %v4798_v7, 0.0  ;;  %v4870_v40 = vmul.f32 0.1, %v4798_v7  ;;  %v4801_v9 = vadd.f32 %v8264_v42, %v4758_v57  ;;  %v4756_v41 = vadd.f32 %v8157_v47, %v4442_v25  ;;  %v8824_v57 = vld [vmem:[#allocation99_spill] sm:$0xff]  ;;  %v8338_v62 = vpop.f32.mrf.mxu0 }
 0x2fd   : > { %v4908_v39 = vsel %vm4836_vm8, %v4800_v0, %v4872_v28  ;;  %v4447_v37 = vadd.f32 %v5920_v48, %v4000_v1  ;;  %v4326_v26 = vpop.f32.mrf.mxu1  ;;  %v4004_v25 = vadd.f32 %v8824_v57, %v8139_v46  ;;  %v8826_v46 = vld [vmem:[#allocation100_spill] sm:$0xff] }
 0x2fe   : > { %4944 = vst.msk [vmem:[%s8279_s9 + $0x30] sm:$0xff] %vm412_vm1, %v4908_v39  ;;  %v4906_v30 = vsel %vm4834_vm9, %v4798_v7, %v4870_v40  ;;  %vm4837_vm10 = vcmp.gt.f32.partialorder %v4801_v9, 0.0  ;;  %v4873_v12 = vmul.f32 0.1, %v4801_v9  ;;  %v4799_v8 = vadd.f32 %v8264_v42, %v4756_v41  ;;  %v8825_v39 = vld [vmem:[#allocation17_spill] sm:$0xff] }
 0x2ff   : > { %4942 = vst.msk [vmem:[%s8279_s9 + $0x20] sm:$0xff] %vm412_vm1, %v4906_v30  ;;  %v4761_v47 = vadd.f32 %v8167_v6, %v4447_v37  ;;  %v4445_v15 = vadd.f32 %v4326_v26, %v3998_v58  ;;  %v5921_v45 = vpop.f32.mrf.mxu1  ;;  %v4002_v37 = vadd.f32 %v8826_v46, %v8825_v39 }
 0x300   : > { %v4909_v27 = vsel %vm4837_vm10, %v4801_v9, %v4873_v12  ;;  %vm4835_vm11 = vcmp.gt.f32.partialorder %v4799_v8, 0.0  ;;  %v4871_v52 = vmul.f32 0.1, %v4799_v8  ;;  %v4448_v49 = vadd.f32 %v5921_v45, %v4001_v55  ;;  %v8351_v55 = vpop.f32.mrf.mxu0  ;;  %v8827_v12 = vld [vmem:[#allocation3_spill] sm:$0xff]  ;;  %v8829_v45 = vld [vmem:[#allocation8_spill] sm:$0xff] }
 0x301   : > { %4945 = vst.msk [vmem:[%s8279_s9 + $0x38] sm:$0xff] %vm412_vm1, %v4909_v27  ;;  %v4804_v61 = vadd.f32 %v8264_v42, %v4761_v47  ;;  %v4759_v18 = vadd.f32 %v8177_v60, %v4445_v15  ;;  %v4329_v0 = vpop.f32.mrf.mxu1  ;;  %v8828_v15 = vld [vmem:[#allocation27_spill] sm:$0xff] }
 0x302   : > { %v4907_v56 = vsel %vm4835_vm11, %v4799_v8, %v4871_v52  ;;  %v4762_v6 = vadd.f32 %v8187_v5, %v4448_v49  ;;  %v4446_v7 = vadd.f32 %v4329_v0, %v3999_v22  ;;  %v4005_v8 = vadd.f32 %v8827_v12, %v8149_v63  ;;  %v8830_v63 = vld [vmem:[#allocation67_spill] sm:$0xff] }
 0x303   : > { %4943 = vst.msk [vmem:[%s8279_s9 + $0x28] sm:$0xff] %vm412_vm1, %v4907_v56  ;;  %vm4840_vm12 = vcmp.gt.f32.partialorder %v4804_v61, 0.0  ;;  %v4876_v28 = vmul.f32 0.1, %v4804_v61  ;;  %v4802_v1 = vadd.f32 %v8264_v42, %v4759_v18  ;;  %v5924_v48 = vpop.f32.mrf.mxu1  ;;  %v4003_v59 = vadd.f32 %v8829_v45, %v8828_v15 }
 0x304   : > { %v4805_v60 = vadd.f32 %v8264_v42, %v4762_v6  ;;  %v4760_v40 = vadd.f32 %v8197_v16, %v4446_v7  ;;  %v4451_v9 = vadd.f32 %v5924_v48, %v4004_v25  ;;  %v8365_v6 = vpop.f32.mrf.mxu0  ;;  %v8831_v48 = vld [vmem:[#allocation81_spill] sm:$0xff] }
 0x305   : > { %v4912_v5 = vsel %vm4840_vm12, %v4804_v61, %v4876_v28  ;;  %vm4838_vm14 = vcmp.gt.f32.partialorder %v4802_v1, 0.0  ;;  %v4874_v41 = vmul.f32 0.1, %v4802_v1  ;;  %v4342_v36 = vpop.f32.mrf.mxu1  ;;  %v4008_v61 = vadd.f32 %v8830_v63, %v8159_v10  ;;  %v8837_v63 = vld [vmem:[#allocation29_spill] sm:$0xff] }
 0x306   : > { %4948 = vst.msk [vmem:[%s8279_s9 + $0x50] sm:$0xff] %vm412_vm1, %v4912_v5  ;;  %vm4841_vm0 = vcmp.gt.f32.partialorder %v4805_v60, 0.0  ;;  %v4877_v58 = vmul.f32 0.1, %v4805_v60  ;;  %v4803_v26 = vadd.f32 %v8264_v42, %v4760_v40  ;;  %v4765_v11 = vadd.f32 %v8207_v54, %v4451_v9  ;;  %v8379_v46 = vpop.f32.mrf.mxu0 }
 0x307   : > { %v4910_v16 = vsel %vm4838_vm14, %v4802_v1, %v4874_v41  ;;  %v4449_v30 = vadd.f32 %v4342_v36, %v4002_v37  ;;  %v5925_v47 = vpop.f32.mrf.mxu1  ;;  %v8833_v36 = vld [vmem:[#allocation11_spill] sm:$0xff] }
 0x308   : > { %4946 = vst.msk [vmem:[%s8279_s9 + $0x40] sm:$0xff] %vm412_vm1, %v4910_v16  ;;  %v4913_v19 = vsel %vm4841_vm0, %v4805_v60, %v4877_v58  ;;  %vm4839_vm4 = vcmp.gt.f32.partialorder %v4803_v26, 0.0  ;;  %v4875_v22 = vmul.f32 0.1, %v4803_v26  ;;  %v4808_v27 = vadd.f32 %v8264_v42, %v4765_v11  ;;  %v8832_v60 = vld [vmem:[#allocation4_spill] sm:$0xff] }
 0x309   : > { %4949 = vst.msk [vmem:[%s8279_s9 + $0x58] sm:$0xff] %vm412_vm1, %v4913_v19  ;;  %v4763_v54 = vadd.f32 %v8217_v53, %v4449_v30  ;;  %v4452_v52 = vadd.f32 %v5925_v47, %v4005_v8  ;;  %v4345_v49 = vpop.f32.mrf.mxu1  ;;  %v4006_v10 = vadd.f32 %v8832_v60, %v8831_v48  ;;  %v4009_v58 = vadd.f32 %v8833_v36, %v8169_v31  ;;  %v8834_v8 = vld [vmem:[#allocation18_spill] sm:$0xff]  ;;  %v8835_v47 = vld [vmem:[#allocation69_spill] sm:$0xff] }
 0x30a   : > { %v4911_v18 = vsel %vm4839_vm4, %v4803_v26, %v4875_v22  ;;  %vm4844_vm5 = vcmp.gt.f32.partialorder %v4808_v27, 0.0  ;;  %v4880_v0 = vmul.f32 0.1, %v4808_v27  ;;  %v4450_v56 = vadd.f32 %v4345_v49, %v4003_v59  ;;  %v8836_v59 = vld [vmem:[#allocation5_spill] sm:$0xff] }
 0x30b   : > { %4947 = vst.msk [vmem:[%s8279_s9 + $0x48] sm:$0xff] %vm412_vm1, %v4911_v18  ;;  %v4806_v7 = vadd.f32 %v8264_v42, %v4763_v54  ;;  %v4766_v57 = vadd.f32 %v8227_v14, %v4452_v52  ;;  %v5928_v25 = vpop.f32.mrf.mxu1  ;;  %v4007_v15 = vadd.f32 %v8835_v47, %v8834_v8  ;;  %v4012_v19 = vadd.f32 %v8836_v59, %v8179_v32  ;;  %v8394_v54 = vpop.f32.mrf.mxu0  ;;  %v8843_v8 = vld [vmem:[#allocation31_spill] sm:$0xff]  ;;  %v8844_v47 = vld [vmem:[#allocation16_spill] sm:$0xff] }
 0x30c   : > { %v4916_v53 = vsel %vm4844_vm5, %v4808_v27, %v4880_v0  ;;  %v4764_v28 = vadd.f32 %v8237_v24, %v4450_v56  ;;  %v4455_v1 = vadd.f32 %v5928_v25, %v4008_v61  ;;  %v8838_v61 = vld [vmem:[#allocation13_spill] sm:$0xff] }
 0x30d   : > { %4952 = vst.msk [vmem:[%s8279_s9 + $0x70] sm:$0xff] %vm412_vm1, %v4916_v53  ;;  %vm4842_vm3 = vcmp.gt.f32.partialorder %v4806_v7, 0.0  ;;  %v4878_v40 = vmul.f32 0.1, %v4806_v7  ;;  %v4809_v9 = vadd.f32 %v8264_v42, %v4766_v57  ;;  %v4358_v5 = vpop.f32.mrf.mxu1  ;;  %v4010_v32 = vadd.f32 %v8838_v61, %v8837_v63  ;;  %v8408_v60 = vpop.f32.mrf.mxu0 }
 0x30e   : > { %v4807_v41 = vadd.f32 %v8264_v42, %v4764_v28  ;;  %v4769_v14 = vadd.f32 %v8247_v50, %v4455_v1  ;;  %v4453_v39 = vadd.f32 %v4358_v5, %v4006_v10  ;;  %v8839_v1 = vld [vmem:[#allocation6_spill] sm:$0xff] }
 0x30f   : > { %v4914_v24 = vsel %vm4842_vm3, %v4806_v7, %v4878_v40  ;;  %vm4845_vm6 = vcmp.gt.f32.partialorder %v4809_v9, 0.0  ;;  %v4881_v37 = vmul.f32 0.1, %v4809_v9  ;;  %v5929_v26 = vpop.f32.mrf.mxu1  ;;  %v4013_v48 = vadd.f32 %v8839_v1, %v8189_v13  ;;  %v8841_v13 = vld [vmem:[#allocation14_spill] sm:$0xff] }
 0x310   : > { %4950 = vst.msk [vmem:[%s8279_s9 + $0x60] sm:$0xff] %vm412_vm1, %v4914_v24  ;;  %vm4843_vm2 = vcmp.gt.f32.partialorder %v4807_v41, 0.0  ;;  %v4879_v11 = vmul.f32 0.1, %v4807_v41  ;;  %v4812_v16 = vadd.f32 %v8264_v42, %v4769_v14  ;;  %v4767_v50 = vadd.f32 %v8257_v23, %v4453_v39  ;;  %v8840_v39 = vld [vmem:[#allocation20_spill] sm:$0xff] }
 0x311   : > { %v4917_v30 = vsel %vm4845_vm6, %v4809_v9, %v4881_v37  ;;  %v4456_v12 = vadd.f32 %v5929_v26, %v4009_v58  ;;  %v4361_v45 = vpop.f32.mrf.mxu1  ;;  %v4011_v24 = vadd.f32 %v8841_v13, %v8840_v39  ;;  %v8849_v39 = vld [vmem:[#allocation22_spill] sm:$0xff]  ;;  %v8850_v13 = vld [vmem:[#allocation75_spill] sm:$0xff] }
 0x312   : > { %4953 = vst.msk [vmem:[%s8279_s9 + $0x78] sm:$0xff] %vm412_vm1, %v4917_v30  ;;  %v4915_v31 = vsel %vm4843_vm2, %v4807_v41, %v4879_v11  ;;  %vm4848_vm13 = vcmp.gt.f32.partialorder %v4812_v16, 0.0  ;;  %v4884_v22 = vmul.f32 0.1, %v4812_v16  ;;  %v4810_v27 = vadd.f32 %v8264_v42, %v4767_v50  ;;  %v8421_v11 = vpop.f32.mrf.mxu0  ;;  %v8842_v50 = vld [vmem:[#allocation7_spill] sm:$0xff] }
 0x313   : > { %4951 = vst.msk [vmem:[%s8279_s9 + $0x68] sm:$0xff] %vm412_vm1, %v4915_v31  ;;  %v4770_v23 = vadd.f32 %v8270_v34, %v4456_v12  ;;  %v4454_v52 = vadd.f32 %v4361_v45, %v4007_v15  ;;  %v5932_v49 = vpop.f32.mrf.mxu1  ;;  %v4016_v30 = vadd.f32 %v8842_v50, %v8199_v33  ;;  %v4014_v15 = vadd.f32 %v8844_v47, %v8843_v8  ;;  %v8845_v33 = vld [vmem:[#allocation73_spill] sm:$0xff] }
 0x314   : > { %v4920_v18 = vsel %vm4848_vm13, %v4812_v16, %v4884_v22  ;;  %vm4846_vm15 = vcmp.gt.f32.partialorder %v4810_v27, 0.0  ;;  %v4882_v0 = vmul.f32 0.1, %v4810_v27  ;;  %v4459_v56 = vadd.f32 %v5932_v49, %v4012_v19  ;;  %v5979_v63 = vpop.f32.mrf.mxu0 }
 0x315   : > { %4956 = vst.msk [vmem:[%s8279_s9 + $0x90] sm:$0xff] %vm412_vm1, %v4920_v18  ;;  %v4813_v7 = vadd.f32 %v8264_v42, %v4770_v23  ;;  %v4768_v57 = vadd.f32 %v8283_v44, %v4454_v52  ;;  %v4374_v25 = vpop.f32.mrf.mxu1 }
 0x316   : > { %v4918_v53 = vsel %vm4846_vm15, %v4810_v27, %v4882_v0  ;;  %v4773_v34 = vadd.f32 %v8295_v3, %v4459_v56  ;;  %v4457_v28 = vadd.f32 %v4374_v25, %v4010_v32  ;;  %v4017_v27 = vadd.f32 %v8845_v33, %v8209_v20 }
 0x317   : > { %4954 = vst.msk [vmem:[%s8279_s9 + $0x80] sm:$0xff] %vm412_vm1, %v4918_v53  ;;  %vm4849_vm7 = vcmp.gt.f32.partialorder %v4813_v7, 0.0  ;;  %v4885_v10 = vmul.f32 0.1, %v4813_v7  ;;  %v4811_v40 = vadd.f32 %v8264_v42, %v4768_v57  ;;  %v5933_v9 = vpop.f32.mrf.mxu1  ;;  %v8847_v57 = vld [vmem:[#allocation9_spill] sm:$0xff] }
 0x318   : > { %v4816_v44 = vadd.f32 %v8264_v42, %v4773_v34  ;;  %v4771_v5 = vadd.f32 %v8309_v29, %v4457_v28  ;;  %v4460_v41 = vadd.f32 %v5933_v9, %v4013_v48  ;;  %v4723_v48 = vpop.f32.mrf.mxu0 }
 0x319   : > { %v4921_v3 = vsel %vm4849_vm7, %v4813_v7, %v4885_v10  ;;  %vm4847_vm8 = vcmp.gt.f32.partialorder %v4811_v40, 0.0  ;;  %v4883_v14 = vmul.f32 0.1, %v4811_v40  ;;  %v4377_v37 = vpop.f32.mrf.mxu1  ;;  %v8846_v7 = vld [vmem:[#allocation84_spill] sm:$0xff] }
 0x31a   : > { %4957 = vst.msk [vmem:[%s8279_s9 + $0x98] sm:$0xff] %vm412_vm1, %v4921_v3  ;;  %vm4852_vm9 = vcmp.gt.f32.partialorder %v4816_v44, 0.0  ;;  %v4888_v36 = vmul.f32 0.1, %v4816_v44  ;;  %v4814_v58 = vadd.f32 %v8264_v42, %v4771_v5  ;;  %v4774_v26 = vadd.f32 %v8324_v35, %v4460_v41 }
 0x31b   : > { %v4919_v29 = vsel %vm4847_vm8, %v4811_v40, %v4883_v14  ;;  %v4458_v16 = vadd.f32 %v4377_v37, %v4011_v24  ;;  %v5936_v12 = vpop.f32.mrf.mxu1  ;;  %v4015_v20 = vadd.f32 %v8847_v57, %v8846_v7  ;;  %v8848_v40 = vld [vmem:[#allocation19_spill] sm:$0xff]  ;;  %v4018_v24 = vadd.f32 %v8850_v13, %v8849_v39 }
 0x31c   : > { %4955 = vst.msk [vmem:[%s8279_s9 + $0x88] sm:$0xff] %vm412_vm1, %v4919_v29  ;;  %v4924_v45 = vsel %vm4852_vm9, %v4816_v44, %v4888_v36  ;;  %vm4850_vm10 = vcmp.gt.f32.partialorder %v4814_v58, 0.0  ;;  %v4886_v59 = vmul.f32 0.1, %v4814_v58  ;;  %v4817_v19 = vadd.f32 %v8264_v42, %v4774_v26  ;;  %v8851_v36 = vld [vmem:[#allocation10_spill] sm:$0xff] }
 0x31d   : > { %4960 = vst.msk [vmem:[%s8279_s9 + $0xb0] sm:$0xff] %vm412_vm1, %v4924_v45  ;;  %v4772_v35 = vadd.f32 %v8338_v62, %v4458_v16  ;;  %v4463_v31 = vadd.f32 %v5936_v12, %v4016_v30  ;;  %v4390_v22 = vpop.f32.mrf.mxu1  ;;  %v4020_v9 = vadd.f32 %v8848_v40, %v8219_v38  ;;  %v5982_v16 = vpop.f32.mrf.mxu0  ;;  %v8852_v12 = vld [vmem:[#allocation21_spill] sm:$0xff] }
 0x31e   : > { %v4922_v23 = vsel %vm4850_vm10, %v4814_v58, %v4886_v59  ;;  %vm4853_vm11 = vcmp.gt.f32.partialorder %v4817_v19, 0.0  ;;  %v4889_v52 = vmul.f32 0.1, %v4817_v19  ;;  %v4461_v49 = vadd.f32 %v4390_v22, %v4014_v15  ;;  %v8853_v22 = vld [vmem:[#allocation12_spill] sm:$0xff] }
 0x31f   : > { %4958 = vst.msk [vmem:[%s8279_s9 + $0xa0] sm:$0xff] %vm412_vm1, %v4922_v23  ;;  %v4815_v61 = vadd.f32 %v8264_v42, %v4772_v35  ;;  %v4777_v32 = vadd.f32 %v8351_v55, %v4463_v31  ;;  %v5937_v18 = vpop.f32.mrf.mxu1  ;;  %v4021_v58 = vadd.f32 %v8851_v36, %v8229_v17  ;;  %v4019_v8 = vadd.f32 %v8852_v12, %v8233_v51 }
 0x320   : > { %v4925_v0 = vsel %vm4853_vm11, %v4817_v19, %v4889_v52  ;;  %v4775_v62 = vadd.f32 %v8365_v6, %v4461_v49  ;;  %v4464_v56 = vadd.f32 %v5937_v18, %v4017_v27  ;;  %v4024_v33 = vadd.f32 %v8853_v22, %v8239_v2  ;;  %v4736_v27 = vpop.f32.mrf.mxu0  ;;  %v8854_v18 = vld [vmem:[#allocation23_spill] sm:$0xff] }
 0x321   : > { %4961 = vst.msk [vmem:[%s8279_s9 + $0xb8] sm:$0xff] %vm412_vm1, %v4925_v0  ;;  %vm4851_vm12 = vcmp.gt.f32.partialorder %v4815_v61, 0.0  ;;  %v4887_v25 = vmul.f32 0.1, %v4815_v61  ;;  %v4820_v53 = vadd.f32 %v8264_v42, %v4777_v32  ;;  %v4393_v34 = vpop.f32.mrf.mxu1  ;;  %v4022_v0 = vadd.f32 %v8854_v18, %v8243_v4 }
 0x322   : > { %v4818_v28 = vadd.f32 %v8264_v42, %v4775_v62  ;;  %v4778_v55 = vadd.f32 %v8379_v46, %v4464_v56  ;;  %v4462_v1 = vadd.f32 %v4393_v34, %v4015_v20  ;;  %v5983_v57 = vpop.f32.mrf.mxu0 }
 0x323   : > { %v4923_v6 = vsel %vm4851_vm12, %v4815_v61, %v4887_v25  ;;  %vm4856_vm14 = vcmp.gt.f32.partialorder %v4820_v53, 0.0  ;;  %v4892_v10 = vmul.f32 0.1, %v4820_v53  ;;  %v5940_v44 = vpop.f32.mrf.mxu1 }
 0x324   : > { %4959 = vst.msk [vmem:[%s8279_s9 + $0xa8] sm:$0xff] %vm412_vm1, %v4923_v6  ;;  %vm4854_vm0 = vcmp.gt.f32.partialorder %v4818_v28, 0.0  ;;  %v4890_v5 = vmul.f32 0.1, %v4818_v28  ;;  %v4821_v41 = vadd.f32 %v8264_v42, %v4778_v55  ;;  %v4776_v3 = vadd.f32 %v8394_v54, %v4462_v1  ;;  %v8856_v55 = vld [vmem:[#allocation25_spill] sm:$0xff] }
 0x325   : > { %v4928_v46 = vsel %vm4856_vm14, %v4820_v53, %v4892_v10  ;;  %v4467_v14 = vadd.f32 %v5940_v44, %v4020_v9  ;;  %v4406_v37 = vpop.f32.mrf.mxu1  ;;  %v8855_v53 = vld [vmem:[#allocation15_spill] sm:$0xff]  ;;  %v4023_v4 = vadd.f32 %v8856_v55, %v8253_v21 }
 0x326   : > { %4964 = vst.msk [vmem:[%s8279_s9 + $0xd0] sm:$0xff] %vm412_vm1, %v4928_v46  ;;  %v4926_v38 = vsel %vm4854_vm0, %v4818_v28, %v4890_v5  ;;  %vm4857_vm4 = vcmp.gt.f32.partialorder %v4821_v41, 0.0  ;;  %v4893_v26 = vmul.f32 0.1, %v4821_v41  ;;  %v4819_v29 = vadd.f32 %v8264_v42, %v4776_v3 }
 0x327   : > { %4962 = vst.msk [vmem:[%s8279_s9 + $0xc0] sm:$0xff] %vm412_vm1, %v4926_v38  ;;  %v4781_v54 = vadd.f32 %v8408_v60, %v4467_v14  ;;  %v4465_v50 = vadd.f32 %v4406_v37, %v4018_v24  ;;  %v5941_v30 = vpop.f32.mrf.mxu1  ;;  %v4025_v34 = vadd.f32 %v8855_v53, %v8249_v43 }
 0x328   : > { %v4929_v17 = vsel %vm4857_vm4, %v4821_v41, %v4893_v26  ;;  %vm4855_vm5 = vcmp.gt.f32.partialorder %v4819_v29, 0.0  ;;  %v4891_v47 = vmul.f32 0.1, %v4819_v29  ;;  %v4468_v15 = vadd.f32 %v5941_v30, %v4021_v58  ;;  %v4739_v41 = vpop.f32.mrf.mxu0 }
 0x329   : > { %4965 = vst.msk [vmem:[%s8279_s9 + $0xd8] sm:$0xff] %vm412_vm1, %v4929_v17  ;;  %v4824_v45 = vadd.f32 %v8264_v42, %v4781_v54  ;;  %v4779_v59 = vadd.f32 %v8421_v11, %v4465_v50  ;;  %v4409_v19 = vpop.f32.mrf.mxu1 }
 0x32a   : > { %v4927_v35 = vsel %vm4855_vm5, %v4819_v29, %v4891_v47  ;;  %v4782_v31 = vadd.f32 %v5979_v63, %v4468_v15  ;;  %v4466_v60 = vadd.f32 %v4409_v19, %v4019_v8 }
 0x32b   : > { %4963 = vst.msk [vmem:[%s8279_s9 + $0xc8] sm:$0xff] %vm412_vm1, %v4927_v35  ;;  %vm4860_vm3 = vcmp.gt.f32.partialorder %v4824_v45, 0.0  ;;  %v4896_v51 = vmul.f32 0.1, %v4824_v45  ;;  %v4822_v23 = vadd.f32 %v8264_v42, %v4779_v59  ;;  %v5944_v52 = vpop.f32.mrf.mxu1 }
 0x32c   : > { %v4825_v49 = vadd.f32 %v8264_v42, %v4782_v31  ;;  %v4780_v61 = vadd.f32 %v4723_v48, %v4466_v60  ;;  %v4471_v11 = vadd.f32 %v5944_v52, %v4024_v33 }
 0x32d   : > { %v4932_v32 = vsel %vm4860_vm3, %v4824_v45, %v4896_v51  ;;  %vm4858_vm6 = vcmp.gt.f32.partialorder %v4822_v23, 0.0  ;;  %v4894_v63 = vmul.f32 0.1, %v4822_v23  ;;  %v4422_v2 = vpop.f32.mrf.mxu1 }
 0x32e   : > { %4968 = vst.msk [vmem:[%s8279_s9 + $0xf0] sm:$0xff] %vm412_vm1, %v4932_v32  ;;  %vm4861_vm2 = vcmp.gt.f32.partialorder %v4825_v49, 0.0  ;;  %v4897_v62 = vmul.f32 0.1, %v4825_v49  ;;  %v4823_v56 = vadd.f32 %v8264_v42, %v4780_v61  ;;  %v4785_v7 = vadd.f32 %v5982_v16, %v4471_v11 }
 0x32f   : > { %v4930_v20 = vsel %vm4858_vm6, %v4822_v23, %v4894_v63  ;;  %v4469_v25 = vadd.f32 %v4422_v2, %v4022_v0  ;;  %v5945_v28 = vpop.f32.mrf.mxu1 }
 0x330   : > { %4966 = vst.msk [vmem:[%s8279_s9 + $0xe0] sm:$0xff] %vm412_vm1, %v4930_v20  ;;  %v4933_v1 = vsel %vm4861_vm2, %v4825_v49, %v4897_v62  ;;  %vm4859_vm13 = vcmp.gt.f32.partialorder %v4823_v56, 0.0  ;;  %v4895_v48 = vmul.f32 0.1, %v4823_v56  ;;  %v4828_v6 = vadd.f32 %v8264_v42, %v4785_v7 }
 0x331   : > { %4969 = vst.msk [vmem:[%s8279_s9 + $0xf8] sm:$0xff] %vm412_vm1, %v4933_v1  ;;  %v4783_v10 = vadd.f32 %v4736_v27, %v4469_v25  ;;  %v4472_v40 = vadd.f32 %v5945_v28, %v4025_v34  ;;  %v4425_v9 = vpop.f32.mrf.mxu1 }
 0x332   : > { %v4931_v44 = vsel %vm4859_vm13, %v4823_v56, %v4895_v48  ;;  %vm4864_vm15 = vcmp.gt.f32.partialorder %v4828_v6, 0.0  ;;  %v4900_v43 = vmul.f32 0.1, %v4828_v6  ;;  %v4470_v5 = vadd.f32 %v4425_v9, %v4023_v4 }
 0x333   : > { %4967 = vst.msk [vmem:[%s8279_s9 + $0xe8] sm:$0xff] %vm412_vm1, %v4931_v44  ;;  %v4826_v21 = vadd.f32 %v8264_v42, %v4783_v10  ;;  %v4786_v3 = vadd.f32 %v5983_v57, %v4472_v40 }
 0x334   : > { %v4936_v46 = vsel %vm4864_vm15, %v4828_v6, %v4900_v43  ;;  %v4784_v14 = vadd.f32 %v4739_v41, %v4470_v5 }
 0x335   : > { %4972 = vst.msk [vmem:[%s8279_s9 + $0x110] sm:$0xff] %vm412_vm1, %v4936_v46  ;;  %vm4862_vm7 = vcmp.gt.f32.partialorder %v4826_v21, 0.0  ;;  %v4898_v39 = vmul.f32 0.1, %v4826_v21  ;;  %v4829_v13 = vadd.f32 %v8264_v42, %v4786_v3 }
 0x336   : > { %v4827_v24 = vadd.f32 %v8264_v42, %v4784_v14 }
 0x337   : > { %v4934_v37 = vsel %vm4862_vm7, %v4826_v21, %v4898_v39  ;;  %vm4865_vm8 = vcmp.gt.f32.partialorder %v4829_v13, 0.0  ;;  %v4901_v36 = vmul.f32 0.1, %v4829_v13 }
 0x338   : > { %4970 = vst.msk [vmem:[%s8279_s9 + $0x100] sm:$0xff] %vm412_vm1, %v4934_v37  ;;  %vm4863_vm9 = vcmp.gt.f32.partialorder %v4827_v24, 0.0  ;;  %v4899_v58 = vmul.f32 0.1, %v4827_v24 }
 0x339   : > { %v4937_v38 = vsel %vm4865_vm8, %v4829_v13, %v4901_v36 }
 0x33a   : > { %4973 = vst.msk [vmem:[%s8279_s9 + $0x118] sm:$0xff] %vm412_vm1, %v4937_v38  ;;  %v4935_v26 = vsel %vm4863_vm9, %v4827_v24, %v4899_v58 }
 0x33b   : > { %4971 = vst.msk [vmem:[%s8279_s9 + $0x108] sm:$0xff] %vm412_vm1, %v4935_v26 }
 0x33c PF: > { %s16_s21 = sadd.s32 1, %s6107_s21  }
 0x33d   : > { %p13_p4 = scmp.ge.s32.totalorder %s16_s21, 4  }
 0x33f   :  { %15 = sbr.rel (!%p13_p4) target bundleno = 1 (0x1), region = 82 }

</bundles_post_ra>
